<compile_context>
chip_gen: v5e
topology: v5e:2x2
jax: 0.10.0
libtpu: 0.0.40
codegen_flags: <defaults>
</compile_context>

<pallas_src>
import functools

import jax
import jax.numpy as jnp
import numpy as np
from jax.experimental import pallas as pl
from jax.experimental.pallas import tpu as pltpu

# ---------------------------------------------------------------------------
# Static model geometry (fc1 in_features=320 forces 28x28 inputs).
H0 = W0 = 28                 # input spatial size
KS = 5                       # conv kernel size
H1 = W1 = H0 - KS + 1        # 24 : conv1 output grid
C1, C2 = 10, 20              # conv channel counts
HP1 = H1 // 2                # 12 : after pool1
H2 = HP1 - KS + 1            # 8  : conv2 output grid
HP2 = H2 // 2                # 4  : after pool2
F1 = C2 * HP2 * HP2          # 320 : fc1 in_features
FHID = 50                    # fc1 out_features
LA1 = (W1 - 1) * C1          # 230 : pool1 output lane width
LA2 = (H2 - 1) * C2          # 140 : pool2 output lane width


def _align8(n):
    return (n + 7) & ~7


def _slab_layout(cin, nc):
    """Static, 8-aligned row offsets of every parameter block in the slab."""
    off, r = {}, 0
    for name, n in [("w1", KS * W0 * cin), ("b1", 1),
                    ("w2", KS * LA1), ("b2", 1),
                    ("f1", HP2 * LA2), ("bf1", 1),
                    ("f2", FHID), ("bf2", 1)]:
        off[name] = r
        r = _align8(r + n)
    width = W1 * C1                       # 240 lanes (>= 160, 50, nc)
    return off, r, width


def _cnn_mnist_kernel(x_ref, w_ref, o_ref, *, bb, cin, nc, off):
    """Whole CNNMnist forward for one batch block of bb images.

    x_ref : (1, H0*bb, W0*cin)  raw images, row = h*bb+b, lane = w*cin+ci
    w_ref : (slab_rows, 240)    packed weights (banded conv/fc blocks)
    o_ref : (1, bb, nc)         logits
    """
    f32 = jnp.float32
    x = x_ref[0]                                            # (H0*bb, W0*cin)

    # ---- conv1: in-kernel patch extraction, ONE matmul ---------------------
    # Lane-concat the KS vertical (kh) shifts; the banded weight block does
    # the horizontal (kw) taps, producing all wo positions in the lanes.
    xcat = jnp.concatenate(
        [x[kh * bb: kh * bb + H1 * bb, :] for kh in range(KS)], axis=1)
    w1 = w_ref[off["w1"]: off["w1"] + KS * W0 * cin, :W1 * C1]
    b1 = w_ref[off["b1"]: off["b1"] + 1, :W1 * C1]
    z1 = jnp.dot(xcat, w1, preferred_element_type=f32) + b1   # (H1*bb, 240)
    # z1[ho*bb+b, wo*C1+co] == conv1(x)[b, co, ho, wo]

    # ---- maxpool1 (2x2) + ReLU: horiz. partner = +C1 lanes, vert. = +bb rows
    h1 = jnp.maximum(z1[:, :LA1], z1[:, C1:C1 + LA1])
    a1 = jnp.maximum(
        jnp.maximum(h1[:(H1 - 1) * bb, :], h1[bb:H1 * bb, :]), 0.0)
    # valid entries: a1[2*hp*bb+b, 2*wp*C1+ci]; odd rows/lanes are garbage
    # that the banded conv2 weights zero out.

    # ---- conv2: ONE K=5*230 matmul ------------------------------------------
    r2 = (2 * (H2 - 1) + 1) * bb                            # 15*bb rows
    acat = jnp.concatenate(
        [a1[2 * kh * bb: 2 * kh * bb + r2, :] for kh in range(KS)], axis=1)
    w2 = w_ref[off["w2"]: off["w2"] + KS * LA1, :H2 * C2]
    b2 = w_ref[off["b2"]: off["b2"] + 1, :H2 * C2]
    y2 = jnp.dot(acat, w2, preferred_element_type=f32) + b2   # (15*bb, 160)
    # valid entries: y2[2*i2*bb+b, j2*C2+co]
    # TODO(synk): conv2_drop / F.dropout are identity in eval mode; the
    # training-mode random masks are not implemented in this inference kernel.

    # ---- maxpool2 (2x2) + ReLU: horiz. = +C2 lanes, vert. = +2*bb rows ------
    h2 = jnp.maximum(y2[:, :LA2], y2[:, C2:C2 + LA2])
    r3 = (4 * (HP2 - 1) + 1) * bb                           # 13*bb rows
    a2 = jnp.maximum(
        jnp.maximum(h2[:r3, :], h2[2 * bb:r3 + 2 * bb, :]), 0.0)
    # valid entries: a2[4*i3*bb+b, 2*j3*C2+c]

    # ---- flatten + fc1 + ReLU (ONE K=4*140 matmul) --------------------------
    # The fc1 slab block has zero rows at the pool2-garbage lane positions and
    # is pre-permuted for PyTorch's (c, h, w) flatten order.
    af = jnp.concatenate(
        [a2[4 * i3 * bb: 4 * i3 * bb + bb, :] for i3 in range(HP2)], axis=1)
    wf1 = w_ref[off["f1"]: off["f1"] + HP2 * LA2, :FHID]
    bf1 = w_ref[off["bf1"]: off["bf1"] + 1, :FHID]
    h = jnp.maximum(jnp.dot(af, wf1, preferred_element_type=f32) + bf1, 0.0)

    # ---- fc2 ----------------------------------------------------------------
    wf2 = w_ref[off["f2"]: off["f2"] + FHID, :nc]
    bf2 = w_ref[off["bf2"]: off["bf2"] + 1, :nc]
    o_ref[0] = jnp.dot(h, wf2, preferred_element_type=f32) + bf2


def _pack_slab(params, cin, nc, off, rows, width):
    """Pack all weights/biases into one (rows, 240) f32 slab (single DMA)."""
    w1, b1, w2, b2, fw1, fb1, fw2, fb2 = params
    f32 = jnp.float32
    hp = jax.lax.Precision.HIGHEST        # exact 0/1 placement contractions
    slab = jnp.zeros((rows, width), f32)

    def put(s, row, arr):
        arr = jnp.asarray(arr, f32)
        if arr.ndim == 1:
            arr = arr[None, :]
        return s.at[row:row + arr.shape[0], :arr.shape[1]].set(arr)

    # conv1 banded weights: row = kh*(W0*cin) + w*cin + ci, col = wo*C1 + co,
    # value = w1[co, ci, kh, w - wo] when 0 <= w - wo < KS, else 0.
    e1 = np.zeros((KS, W0, W1), np.float32)
    for kw in range(KS):
        for wo in range(W1):
            e1[kw, wo + kw, wo] = 1.0
    w1b = jnp.einsum("kWw,oihk->hWiwo", e1, w1.astype(f32),
                     precision=hp).reshape(KS * W0 * cin, W1 * C1)
    slab = put(slab, off["w1"], w1b)
    slab = put(slab, off["b1"], jnp.tile(b1.astype(f32), W1))

    # conv2 banded weights: row = kh*LA1 + w*C1 + ci, col = j2*C2 + co,
    # value = w2[co, ci, kh, kw] where w = 2*(j2 + kw); other rows 0
    # (also masks pool1's odd-lane garbage).
    e2 = np.zeros((KS, W1 - 1, H2), np.float32)
    for kw in range(KS):
        for j2 in range(H2):
            e2[kw, 2 * (j2 + kw), j2] = 1.0
    w2b = jnp.einsum("kWj,oihk->hWijo", e2, w2.astype(f32),
                     precision=hp).reshape(KS * LA1, H2 * C2)
    slab = put(slab, off["w2"], w2b)
    slab = put(slab, off["b2"], jnp.tile(b2.astype(f32), H2))

    # fc1: row = i3*LA2 + j2*C2 + c (only even j2 nonzero), col = f.
    t = fw1.astype(f32).reshape(FHID, C2, HP2, HP2).transpose(2, 3, 1, 0)
    f1b = jnp.zeros((HP2, H2 - 1, C2, FHID), f32).at[:, ::2].set(t)
    slab = put(slab, off["f1"], f1b.reshape(HP2 * LA2, FHID))
    slab = put(slab, off["bf1"], fb1.astype(f32))

    slab = put(slab, off["f2"], fw2.astype(f32).T)            # (50, nc)
    slab = put(slab, off["bf2"], fb2.astype(f32))
    return slab


@functools.partial(jax.jit, static_argnames=("batch_block",))
def cnn_mnist_forward(x, params, *, batch_block=8):
    """x: (B, Cin, 28, 28) f32 -> (B, num_classes) f32, CNNMnist.forward (eval)."""
    w1, b1, w2, b2, fw1, fb1, fw2, fb2 = params
    batch, cin = x.shape[0], x.shape[1]
    nc = fw2.shape[0]
    bb = batch_block
    assert bb % 8 == 0, "batch_block must be a multiple of 8 (sublane-aligned)"
    assert x.shape[2] == H0 and x.shape[3] == W0

    off, slab_rows, slab_w = _slab_layout(cin, nc)
    assert nc <= slab_w

    # Pad batch to a multiple of the batch block (padded rows are sliced off).
    bp = pl.cdiv(batch, bb) * bb
    nblk = bp // bb
    xp = jnp.pad(x.astype(jnp.float32),
                 ((0, bp - batch), (0, 0), (0, 0), (0, 0)))
    # Raw-image layout for the kernel: row = h*bb + b, lane = w*cin + ci.
    x2d = xp.reshape(nblk, bb, cin, H0, W0).transpose(0, 3, 1, 4, 2)
    x2d = x2d.reshape(nblk, H0 * bb, W0 * cin)

    slab = _pack_slab(params, cin, nc, off, slab_rows, slab_w)

    kernel = functools.partial(_cnn_mnist_kernel, bb=bb, cin=cin, nc=nc,
                               off=off)
    out = pl.pallas_call(
        kernel,
        out_shape=jax.ShapeDtypeStruct((nblk, bb, nc), jnp.float32),
        grid=(nblk,),
        in_specs=[
            pl.BlockSpec((1, H0 * bb, W0 * cin), lambda i: (i, 0, 0)),
            pl.BlockSpec((slab_rows, slab_w), lambda i: (0, 0)),  # resident
        ],
        out_specs=pl.BlockSpec((1, bb, nc), lambda i: (i, 0, 0)),
        compiler_params=pltpu.CompilerParams(
            dimension_semantics=("parallel",),
            vmem_limit_bytes=48 * 1024 * 1024),
    )(x2d, slab)
    return out.reshape(bp, nc)[:batch]


def init_params(key, cin=1, num_classes=10):
    """Deterministic torch-like (uniform fan-in) parameter init."""
    shapes = [
        ("conv1_w", (C1, cin, KS, KS)), ("conv1_b", (C1,)),
        ("conv2_w", (C2, C1, KS, KS)), ("conv2_b", (C2,)),
        ("fc1_w", (FHID, F1)), ("fc1_b", (FHID,)),
        ("fc2_w", (num_classes, FHID)), ("fc2_b", (num_classes,)),
    ]
    fan_in = {"conv1": cin * KS * KS, "conv2": C1 * KS * KS,
              "fc1": F1, "fc2": FHID}
    params = []
    for (name, shape), k in zip(shapes, jax.random.split(key, len(shapes))):
        bound = 1.0 / np.sqrt(fan_in[name.split("_")[0]])
        params.append(jax.random.uniform(k, shape, jnp.float32, -bound, bound))
    return tuple(params)


def ref_forward(x, params):
    """Pure-JAX reference with PyTorch (eval-mode) semantics, for validation."""
    w1, b1, w2, b2, fw1, fb1, fw2, fb2 = params
    hp = jax.lax.Precision.HIGHEST

    def conv2d(h, w, b):
        out = jax.lax.conv_general_dilated(
            h, w, window_strides=(1, 1), padding="VALID",
            dimension_numbers=("NCHW", "OIHW", "NCHW"), precision=hp)
        return out + b[None, :, None, None]

    def pool(h):
        return jax.lax.reduce_window(h, -jnp.inf, jax.lax.max,
                                     (1, 1, 2, 2), (1, 1, 2, 2), "VALID")

    h = jax.nn.relu(pool(conv2d(x, w1, b1)))
    h = jax.nn.relu(pool(conv2d(h, w2, b2)))      # Dropout2d: identity (eval)
    h = h.reshape(h.shape[0], -1)
    h = jax.nn.relu(jnp.dot(h, fw1.T, precision=hp) + fb1)
    return jnp.dot(h, fw2.T, precision=hp) + fb2  # Dropout: identity (eval)


if __name__ == "__main__":
    B, CIN, NC = 16, 1, 10                       # 2 grid blocks of 8 images
    key = jax.random.PRNGKey(0)
    kx, kp = jax.random.split(key)
    x = jax.random.normal(kx, (B, CIN, H0, W0), jnp.float32)
    params = init_params(kp, cin=CIN, num_classes=NC)

    out = jax.block_until_ready(cnn_mnist_forward(x, params))
    ref = ref_forward(x, params)

    assert out.shape == (B, NC), out.shape
    # Kernel dots use the MXU's native (bf16-input) path instead of f32
    # emulation, so compare against the f32 HIGHEST reference loosely.
    np.testing.assert_allclose(np.asarray(out), np.asarray(ref),
                               rtol=2e-2, atol=2e-2)
    print("KERNEL_OK")
</pallas_src>

<mosaic_0001>
module attributes {stable_mosaic.version = 11 : i64} {
  func.func @_cnn_mnist_kernel(%arg0: i32, %arg1: memref<1x224x28xf32, #tpu.memory_space<vmem>>, %arg2: memref<1944x240xf32, #tpu.memory_space<vmem>>, %arg3: memref<1x8x10xf32, #tpu.memory_space<vmem>>) attributes {dimension_semantics = [#tpu.dimension_semantics<parallel>], iteration_bounds = array<i64: 2>, scalar_prefetch = 0 : i64, scratch_operands = 0 : i64, tpu.core_type = #tpu.core_type<tc>, window_params = [{transform_indices = @transform_0, window_bounds = array<i64: 1, 224, 28>}, {pipeline_mode = #tpu.pipeline_mode<synchronous>, transform_indices = @transform_1, window_bounds = array<i64: 1944, 240>}, {transform_indices = @transform_2, window_bounds = array<i64: 1, 8, 10>}]} {
    %c0 = arith.constant 0 : index
    %c0_0 = arith.constant 0 : index
    %c0_1 = arith.constant 0 : index
    %0 = vector.load %arg1[%c0, %c0_0, %c0_1] : memref<1x224x28xf32, #tpu.memory_space<vmem>>, vector<1x224x28xf32>
    %1 = vector.shape_cast %0 : vector<1x224x28xf32> to vector<224x28xf32>
    %2 = vector.extract_strided_slice %1 {offsets = [0, 0], sizes = [192, 28], strides = [1, 1]} : vector<224x28xf32> to vector<192x28xf32>
    %3 = vector.extract_strided_slice %1 {offsets = [8, 0], sizes = [192, 28], strides = [1, 1]} : vector<224x28xf32> to vector<192x28xf32>
    %4 = vector.extract_strided_slice %1 {offsets = [16, 0], sizes = [192, 28], strides = [1, 1]} : vector<224x28xf32> to vector<192x28xf32>
    %5 = vector.extract_strided_slice %1 {offsets = [24, 0], sizes = [192, 28], strides = [1, 1]} : vector<224x28xf32> to vector<192x28xf32>
    %6 = vector.extract_strided_slice %1 {offsets = [32, 0], sizes = [192, 28], strides = [1, 1]} : vector<224x28xf32> to vector<192x28xf32>
    %7 = tpu.concatenate %2, %3, %4, %5, %6 in 1 : vector<192x28xf32>, vector<192x28xf32>, vector<192x28xf32>, vector<192x28xf32>, vector<192x28xf32> -> vector<192x140xf32>
    %c0_2 = arith.constant 0 : index
    %c0_3 = arith.constant 0 : index
    %8 = vector.load %arg2[%c0_2, %c0_3] : memref<1944x240xf32, #tpu.memory_space<vmem>>, vector<140x240xf32>
    %c144 = arith.constant 144 : index
    %c0_4 = arith.constant 0 : index
    %9 = vector.load %arg2[%c144, %c0_4] : memref<1944x240xf32, #tpu.memory_space<vmem>>, vector<1x240xf32>
    %cst = arith.constant dense<0.000000e+00> : vector<192x240xf32>
    %10 = tpu.matmul %7, %8, %cst {dimension_numbers = #tpu.dot_dimension_numbers<[1], [0], [0], [1], [0, 0, 1, 1], [], []>} : vector<192x140xf32>, vector<140x240xf32>, vector<192x240xf32> -> vector<192x240xf32>
    %11 = vector.broadcast %9 : vector<1x240xf32> to vector<192x240xf32>
    %12 = arith.addf %10, %11 : vector<192x240xf32>
    %13 = vector.extract_strided_slice %12 {offsets = [0, 0], sizes = [192, 230], strides = [1, 1]} : vector<192x240xf32> to vector<192x230xf32>
    %14 = vector.extract_strided_slice %12 {offsets = [0, 10], sizes = [192, 230], strides = [1, 1]} : vector<192x240xf32> to vector<192x230xf32>
    %15 = arith.maximumf %13, %14 : vector<192x230xf32>
    %16 = vector.extract_strided_slice %15 {offsets = [0, 0], sizes = [184, 230], strides = [1, 1]} : vector<192x230xf32> to vector<184x230xf32>
    %17 = vector.extract_strided_slice %15 {offsets = [8, 0], sizes = [184, 230], strides = [1, 1]} : vector<192x230xf32> to vector<184x230xf32>
    %18 = arith.maximumf %16, %17 : vector<184x230xf32>
    %cst_5 = arith.constant 0.000000e+00 : f32
    %19 = vector.broadcast %cst_5 : f32 to vector<184x230xf32>
    %20 = arith.maximumf %18, %19 : vector<184x230xf32>
    %21 = vector.extract_strided_slice %20 {offsets = [0, 0], sizes = [120, 230], strides = [1, 1]} : vector<184x230xf32> to vector<120x230xf32>
    %22 = vector.extract_strided_slice %20 {offsets = [16, 0], sizes = [120, 230], strides = [1, 1]} : vector<184x230xf32> to vector<120x230xf32>
    %23 = vector.extract_strided_slice %20 {offsets = [32, 0], sizes = [120, 230], strides = [1, 1]} : vector<184x230xf32> to vector<120x230xf32>
    %24 = vector.extract_strided_slice %20 {offsets = [48, 0], sizes = [120, 230], strides = [1, 1]} : vector<184x230xf32> to vector<120x230xf32>
    %25 = vector.extract_strided_slice %20 {offsets = [64, 0], sizes = [120, 230], strides = [1, 1]} : vector<184x230xf32> to vector<120x230xf32>
    %26 = tpu.concatenate %21, %22, %23, %24, %25 in 1 : vector<120x230xf32>, vector<120x230xf32>, vector<120x230xf32>, vector<120x230xf32>, vector<120x230xf32> -> vector<120x1150xf32>
    %c152 = arith.constant 152 : index
    %c0_6 = arith.constant 0 : index
    %27 = vector.load %arg2[%c152, %c0_6] : memref<1944x240xf32, #tpu.memory_space<vmem>>, vector<1150x160xf32>
    %c1304 = arith.constant 1304 : index
    %c0_7 = arith.constant 0 : index
    %28 = vector.load %arg2[%c1304, %c0_7] : memref<1944x240xf32, #tpu.memory_space<vmem>>, vector<1x160xf32>
    %cst_8 = arith.constant dense<0.000000e+00> : vector<120x160xf32>
    %29 = tpu.matmul %26, %27, %cst_8 {dimension_numbers = #tpu.dot_dimension_numbers<[1], [0], [0], [1], [0, 0, 1, 1], [], []>} : vector<120x1150xf32>, vector<1150x160xf32>, vector<120x160xf32> -> vector<120x160xf32>
    %30 = vector.broadcast %28 : vector<1x160xf32> to vector<120x160xf32>
    %31 = arith.addf %29, %30 : vector<120x160xf32>
    %32 = vector.extract_strided_slice %31 {offsets = [0, 0], sizes = [120, 140], strides = [1, 1]} : vector<120x160xf32> to vector<120x140xf32>
    %33 = vector.extract_strided_slice %31 {offsets = [0, 20], sizes = [120, 140], strides = [1, 1]} : vector<120x160xf32> to vector<120x140xf32>
    %34 = arith.maximumf %32, %33 : vector<120x140xf32>
    %35 = vector.extract_strided_slice %34 {offsets = [0, 0], sizes = [104, 140], strides = [1, 1]} : vector<120x140xf32> to vector<104x140xf32>
    %36 = vector.extract_strided_slice %34 {offsets = [16, 0], sizes = [104, 140], strides = [1, 1]} : vector<120x140xf32> to vector<104x140xf32>
    %37 = arith.maximumf %35, %36 : vector<104x140xf32>
    %cst_9 = arith.constant 0.000000e+00 : f32
    %38 = vector.broadcast %cst_9 : f32 to vector<104x140xf32>
    %39 = arith.maximumf %37, %38 : vector<104x140xf32>
    %40 = vector.extract_strided_slice %39 {offsets = [0, 0], sizes = [8, 140], strides = [1, 1]} : vector<104x140xf32> to vector<8x140xf32>
    %41 = vector.extract_strided_slice %39 {offsets = [32, 0], sizes = [8, 140], strides = [1, 1]} : vector<104x140xf32> to vector<8x140xf32>
    %42 = vector.extract_strided_slice %39 {offsets = [64, 0], sizes = [8, 140], strides = [1, 1]} : vector<104x140xf32> to vector<8x140xf32>
    %43 = vector.extract_strided_slice %39 {offsets = [96, 0], sizes = [8, 140], strides = [1, 1]} : vector<104x140xf32> to vector<8x140xf32>
    %44 = tpu.concatenate %40, %41, %42, %43 in 1 : vector<8x140xf32>, vector<8x140xf32>, vector<8x140xf32>, vector<8x140xf32> -> vector<8x560xf32>
    %c1312 = arith.constant 1312 : index
    %c0_10 = arith.constant 0 : index
    %45 = vector.load %arg2[%c1312, %c0_10] : memref<1944x240xf32, #tpu.memory_space<vmem>>, vector<560x50xf32>
    %c1872 = arith.constant 1872 : index
    %c0_11 = arith.constant 0 : index
    %46 = vector.load %arg2[%c1872, %c0_11] : memref<1944x240xf32, #tpu.memory_space<vmem>>, vector<1x50xf32>
    %cst_12 = arith.constant dense<0.000000e+00> : vector<8x50xf32>
    %47 = tpu.matmul %44, %45, %cst_12 {dimension_numbers = #tpu.dot_dimension_numbers<[1], [0], [0], [1], [0, 0, 1, 1], [], []>} : vector<8x560xf32>, vector<560x50xf32>, vector<8x50xf32> -> vector<8x50xf32>
    %48 = vector.broadcast %46 : vector<1x50xf32> to vector<8x50xf32>
    %49 = arith.addf %47, %48 : vector<8x50xf32>
    %cst_13 = arith.constant 0.000000e+00 : f32
    %50 = vector.broadcast %cst_13 : f32 to vector<8x50xf32>
    %51 = arith.maximumf %49, %50 : vector<8x50xf32>
    %c1880 = arith.constant 1880 : index
    %c0_14 = arith.constant 0 : index
    %52 = vector.load %arg2[%c1880, %c0_14] : memref<1944x240xf32, #tpu.memory_space<vmem>>, vector<50x10xf32>
    %c1936 = arith.constant 1936 : index
    %c0_15 = arith.constant 0 : index
    %53 = vector.load %arg2[%c1936, %c0_15] : memref<1944x240xf32, #tpu.memory_space<vmem>>, vector<1x10xf32>
    %cst_16 = arith.constant dense<0.000000e+00> : vector<8x10xf32>
    %54 = tpu.matmul %51, %52, %cst_16 {dimension_numbers = #tpu.dot_dimension_numbers<[1], [0], [0], [1], [0, 0, 1, 1], [], []>} : vector<8x50xf32>, vector<50x10xf32>, vector<8x10xf32> -> vector<8x10xf32>
    %55 = vector.broadcast %53 : vector<1x10xf32> to vector<8x10xf32>
    %56 = arith.addf %54, %55 : vector<8x10xf32>
    %c0_17 = arith.constant 0 : index
    %c0_18 = arith.constant 0 : index
    %c0_19 = arith.constant 0 : index
    %57 = vector.load %arg3[%c0_17, %c0_18, %c0_19] : memref<1x8x10xf32, #tpu.memory_space<vmem>>, vector<1x8x10xf32>
    %58 = vector.shape_cast %57 : vector<1x8x10xf32> to vector<8x10xf32>
    %59 = vector.shape_cast %56 : vector<8x10xf32> to vector<1x8x10xf32>
    tpu.vector_store %arg3[%c0_17, %c0_18, %c0_19], %59 {strides = array<i32>} : memref<1x8x10xf32, #tpu.memory_space<vmem>>, vector<1x8x10xf32>,
    return
  }
  func.func @transform_0(%arg0: i32) -> (i32, i32, i32) {
    %c0_i32 = arith.constant 0 : i32
    %c0_i32_0 = arith.constant 0 : i32
    %c0_i32_1 = arith.constant 0 : i32
    return %arg0, %c0_i32, %c0_i32_0 : i32, i32, i32
  }
  func.func @transform_1(%arg0: i32) -> (i32, i32) {
    %c0_i32 = arith.constant 0 : i32
    %c0_i32_0 = arith.constant 0 : i32
    %c0_i32_1 = arith.constant 0 : i32
    return %c0_i32, %c0_i32_0 : i32, i32
  }
  func.func @transform_2(%arg0: i32) -> (i32, i32, i32) {
    %c0_i32 = arith.constant 0 : i32
    %c0_i32_0 = arith.constant 0 : i32
    %c0_i32_1 = arith.constant 0 : i32
    return %arg0, %c0_i32, %c0_i32_0 : i32, i32, i32
  }
}

</mosaic_0001>

<bundles_post_ra>
// kernel: tile.13
= control target key start
LH: loop header
LB: loop body
LE: loop exit
PB: predicated region body
PF: predicated region fallthrough
CT: control target
= control target key end

     0   :  { %s34_s0 = inlined_call_operand.vmem [shape: f32[10], index: 0, kind: input, shape index: {}]   ;;  %s35_s1 = inlined_call_operand.vmem [shape: f32[24,10], index: 1, kind: output, shape index: {}]  }
   0x1   :  { %v4_v0 = vld [vmem:[%s34_s0] ss:$0 sm:$0xff] }
   0x2   :  { %5 = vst [vmem:[%s35_s1] sm:$0xff] %v4_v0 }
   0x3   :  { %10 = vst [vmem:[%s35_s1 + $0x8] sm:$0xff] %v4_v0 }
   0x4   :  { %11 = vst [vmem:[%s35_s1 + $0x10] sm:$0xff] %v4_v0 }

// kernel: tile.18
= control target key start
LH: loop header
LB: loop body
LE: loop exit
PB: predicated region body
PF: predicated region fallthrough
CT: control target
= control target key end

     0   :  { %s22_s0 = inlined_call_operand.vmem [shape: f32[20], index: 0, kind: input, shape index: {}]   ;;  %s23_s1 = inlined_call_operand.vmem [shape: f32[8,20], index: 1, kind: output, shape index: {}]  }
   0x1   :  { %v4_v0 = vld [vmem:[%s22_s0] ss:$0 sm:$0xff] }
   0x2   :  { %5 = vst [vmem:[%s23_s1] sm:$0xff] %v4_v0 }

// kernel: cnn_mnist_forward.1
= control target key start
LH: loop header
LB: loop body
LE: loop exit
PB: predicated region body
PF: predicated region fallthrough
CT: control target
= control target key end

     0   :  { %7 = vsyncpa [#allocation3], 0  ;;  %s8413_s0 = inlined_call_operand.vmem [shape: f32[2,224,28], index: 0, kind: input, shape index: {}]   ;;  %s8414_s1 = inlined_call_operand.vmem [shape: f32[1944,240], index: 1, kind: input, shape index: {}]   ;;  %s8415_s2 = inlined_call_operand.hbm [shape: f32[2,8,10], index: 2, kind: output, shape index: {}]  }
   0x1   :  { %9 = vsyncpa [#allocation3 + $0x1], 0  ;;  %s4428_s9 = smov 0   ;;  %s4430_s10 = smov 0  }
   0x2   :  { %s4432_s11 = smov 0   ;;  %s4434_s12 = smov 0  }
   0x3 LB: > { %s4449_s13 = sadd.s32 4294967295, %s4399_s12   ;;  %s3698_s14 = sadd.s32 4294967294, %s4399_s12   ;;  %s4399_s12 = sphi %s4434_s12, %s8916_s12   ;;  %s4395_s11 = sphi %s4432_s11, %s8915_s11   ;;  %s4391_s10 = sphi %s4430_s10, %s8914_s10   ;;  %s4387_s9 = sphi %s4428_s9, %s8913_s9  }
   0x4   : > { %s4453_s15 = sadd.s32 1, %s4399_s12   ;;  %s69_s16 = sadd.s32 1, %s4395_s11 }
   0x5   : > { %s66_s17 = ssub.s32 %s4399_s12, %s4453_s15  ;;  %p79_p0 = scmp.ne.s32.totalorder %s4395_s11, %s4391_s10 }
   0x6   : > { %p67_p1 = scmp.eq.s32.totalorder %s66_s17, 0  ;;  %p80_p2 = scmp.eq.s32.totalorder %s4449_s13, 1 }
   0x7   : > { %p85_p3 = scmp.ne.s32.totalorder %s4391_s10, %s4387_s9  ;;  %p86_p4 = scmp.eq.s32.totalorder %s3698_s14, 1 }
   0x8   : > { %s4464_s18 = scalar_select %p67_p1, %s4395_s11, %s69_s16  }
   0x9   : > { %p4466_p5 = por %p80_p2, %p79_p0  ;;  %p4470_p6 = por %p86_p4, %p85_p3 }
   0xa   : > { %p3701_p7 = scmp.ge.s32.totalorder %s4399_s12, 1  ;;  %p115_p8 = scmp.lt.s32.totalorder %s4399_s12, 3 }
   0xc   : > { %p116_p9 = pnand %p3701_p7, %p115_p8 }
   0xe   : > { %119 = sbr.rel (%p116_p9) target bundleno = 2102 (0x836), region = 28 }
  0x13   : > { %p137_p10 = scmp.lt.s32.totalorder %s4449_s13, 1  ;;  %s4401_s26 = smov 112   ;;  %v615_v19 = vld [vmem:[%s8414_s1 + $0xf0] sm:$0xff]  ;;  %v616_v20 = vld [vmem:[%s8414_s1 + $0xf8] sm:$0xff]  ;;  %v613_v21 = vld [vmem:[%s8414_s1 + $0xe0] sm:$0xff]  ;;  %vm677_vm0 = vcmask 1043456  }
  0x14   : > { %s4402_s27 = smov 84   ;;  %s4403_s28 = smov 28   ;;  %684 = vmatpush.msra.mxu0 %v615_v19  ;;  %862 = vmatpush.msra.mxu2 %v616_v20  ;;  %v614_v22 = vld [vmem:[%s8414_s1 + $0xe8] sm:$0xff]  ;;  %v611_v23 = vld [vmem:[%s8414_s1 + $0xd0] sm:$0xff]  ;;  %v612_v24 = vld [vmem:[%s8414_s1 + $0xd8] sm:$0xff]  ;;  %vm628_vm1 = vcmask 97280  }
  0x15   : > { %s138_s21 = scalar_select %p137_p10, %s4449_s13, 1  ;;  %v609_v27 = vld [vmem:[%s8414_s1 + $0xc0] sm:$0xff]  ;;  %v610_v28 = vld [vmem:[%s8414_s1 + $0xc8] sm:$0xff]  ;;  %v607_v29 = vld [vmem:[%s8414_s1 + $0xb0] sm:$0xff]  ;;  %vm485_vm2 = vcmask 228352   ;;  %vm510_vm3 = vcmask 457728  }
  0x16   : > { %s4404_s29 = smov 56   ;;  %685 = vmatpush.msra.mxu0 %v613_v21  ;;  %863 = vmatpush.msra.mxu2 %v614_v22  ;;  %v608_v30 = vld [vmem:[%s8414_s1 + $0xb8] sm:$0xff]  ;;  %v605_v31 = vld [vmem:[%s8414_s1 + $0xa0] sm:$0xff]  ;;  %v606_v32 = vld [vmem:[%s8414_s1 + $0xa8] sm:$0xff]  ;;  %vm535_vm4 = vcmask 687104   ;;  %vm560_vm5 = vcmask 916480  }
  0x17   : > { %s3795_s22 = smul.u32 224, %s138_s21  ;;  %v603_v35 = vld [vmem:[%s8414_s1 + $0x90] sm:$0xff]  ;;  %v604_v36 = vld [vmem:[%s8414_s1 + $0x98] sm:$0xff]  ;;  %v601_v37 = vld [vmem:[%s8414_s1 + $0x80] sm:$0xff]  ;;  %s4405_s6 = smov 118   ;;  %vm1184_vm6 = vcmask 965632  }
  0x18   : > { %686 = vmatpush.msra.mxu0 %v611_v23  ;;  %864 = vmatpush.msra.mxu2 %v612_v24  ;;  %v602_v38 = vld [vmem:[%s8414_s1 + $0x88] sm:$0xff]  ;;  %v599_v39 = vld [vmem:[%s8414_s1 + $0x70] sm:$0xff]  ;;  %v600_v41 = vld [vmem:[%s8414_s1 + $0x78] sm:$0xff]  ;;  %s4406_s16 = smov 102   ;;  %vm1487_vm7 = vcmask 834560   ;;  %s4407_s3 = smov 76  }
  0x19   : > { %s4481_s25 = scalar_lea.vmem %s8413_s0, %s3795_s22  ;;  %v597_v47 = vld [vmem:[%s8414_s1 + $0x60] sm:$0xff]  ;;  %v598_v48 = vld [vmem:[%s8414_s1 + $0x68] sm:$0xff]  ;;  %v595_v49 = vld [vmem:[%s8414_s1 + $0x50] sm:$0xff]  ;;  %vm1612_vm8 = vcmask 621568   ;;  %vm1737_vm9 = vcmask 408576   ;;  %vm2279_vm10 = vcmask 1045504  }
  0x1a   : > { %v4484_v0 = vld [vmem:[%s4481_s25 + $0x18] sm:$0xff]  ;;  %v4487_v1 = vld [vmem:[%s4481_s25 + $0x20] sm:$0xff]  ;;  %v4490_v2 = vld [vmem:[%s4481_s25 + $0x8] sm:$0xff]  ;;  %687 = vmatpush.msra.mxu0 %v609_v27  ;;  %865 = vmatpush.msra.mxu2 %v610_v28  ;;  %vm1862_vm11 = vcmask 195584   ;;  %vm2248_vm12 = vcmask 1031168   ;;  %vm3324_vm13 = vcmask 883712  }
  0x1b   : > { %v3857_v3 = vpack.i.bf16 %v4487_v1, %v4484_v0  ;;  %v4495_v4 = vld [vmem:[%s4481_s25 + $0x10] sm:$0xff]  ;;  %v4498_v5 = vld [vmem:[%s4481_s25 + $0x28] sm:$0xff]  ;;  %v4524_v11 = vld [vmem:[%s4481_s25 + $0x38] sm:$0xff]  ;;  %s4412_s14 = smov 36   ;;  %vm3405_vm14 = vcmask 293888   ;;  %vm3482_vm15 = vcmask 392192  }
  0x1c   : > { %v3847_v6 = vpack.i.bf16 %v4495_v4, %v4490_v2  ;;  %415 = vrot.lane.b32.xlu2 %v4498_v5, %s4401_s26  ;;  %v3852_v7 = vpack.i.bf16 %v4484_v0, %v4495_v4  ;;  %v4513_v8 = vld [vmem:[%s4481_s25 + $0x30] sm:$0xff]  ;;  %v3867_v10 = vpack.i.bf16 %v4498_v5, %v4487_v1  ;;  %v4533_v13 = vld [vmem:[%s4481_s25 + $0x40] sm:$0xff]  ;;  %v4538_v15 = vld [vmem:[%s4481_s25 + $0x48] sm:$0xff]  ;;  %688 = vmatpush.msra.mxu0 %v607_v29  ;;  %s134_s21 = sand.u32 1, %s4391_s10  }
  0x1d   : > { %3858 = vrot.lane.b32.xlu1 %v3857_v3, %s4402_s27  ;;  %v3872_v9 = vpack.i.bf16 %v4513_v8, %v4498_v5  ;;  %v3882_v12 = vpack.i.bf16 %v4524_v11, %v4513_v8  ;;  %v3887_v14 = vpack.i.bf16 %v4533_v13, %v4524_v11  ;;  %v4546_v16 = vld [vmem:[%s4481_s25 + $0x50] sm:$0xff]  ;;  %v3897_v18 = vpack.i.bf16 %v4538_v15, %v4533_v13  ;;  %v4574_v25 = vld [vmem:[%s4481_s25 + $0x58] sm:$0xff]  ;;  %v4580_v26 = vld [vmem:[%s4481_s25 + $0x60] sm:$0xff]  ;;  %s3702_s22 = sshll.u32 %s134_s21, 3  ;;  %s3624_s7 = scalar_lea.sflag [#allocation3], %s134_s21 }
  0x1e   : > { %3848 = vrot.lane.b32.xlu0 %v3847_v6, %s4403_s28  ;;  %v3902_v17 = vpack.i.bf16 %v4546_v16, %v4538_v15  ;;  %v3917_v33 = vpack.i.bf16 %v4580_v26, %v4574_v25  ;;  %866 = vmatpush.msra.mxu2 %v608_v30  ;;  %v3912_v34 = vpack.i.bf16 %v4574_v25, %v4546_v16  ;;  %v4626_v40 = vld [vmem:[%s4481_s25 + $0x68] sm:$0xff]  ;;  %v4638_v43 = vld [vmem:[%s4481_s25 + $0x70] sm:$0xff]  ;;  %v4643_v45 = vld [vmem:[%s4481_s25 + $0x78] sm:$0xff] }
  0x1f   : > { %689 = vmatpush.msra.mxu0 %v605_v31  ;;  %v3927_v42 = vpack.i.bf16 %v4626_v40, %v4580_v26  ;;  %v3932_v44 = vpack.i.bf16 %v4638_v43, %v4626_v40  ;;  %v3942_v46 = vpack.i.bf16 %v4643_v45, %v4638_v43  ;;  %v596_v50 = vld [vmem:[%s8414_s1 + $0x58] sm:$0xff]  ;;  %v4667_v51 = vld [vmem:[%s4481_s25 + $0x88] sm:$0xff]  ;;  %v593_v52 = vld [vmem:[%s8414_s1 + $0x40] sm:$0xff] }
  0x20   : > { %867 = vmatpush.msra.mxu2 %v606_v32  ;;  %v619_v53 = vld [vmem:[%s8414_s1 + $0x110] sm:$0xf]  ;;  %v4676_v54 = vld [vmem:[%s4481_s25 + $0x80] sm:$0xff]  ;;  %v594_v55 = vld [vmem:[%s8414_s1 + $0x48] sm:$0xff] }
  0x21   : > { %690 = vmatpush.msra.mxu0 %v603_v35  ;;  %v620_v56 = vld [vmem:[%s8414_s1 + $0x118] sm:$0xf]  ;;  %3705 = vmatpush.msk.msra.mxu1 %vm677_vm0, %v619_v53  ;;  %v591_v57 = vld [vmem:[%s8414_s1 + $0x30] sm:$0xff]  ;;  %v617_v58 = vld [vmem:[%s8414_s1 + $0x100] sm:$0xff] }
  0x22   : > { %868 = vmatpush.msra.mxu2 %v604_v36  ;;  %3730 = vmatpush.msk.msra.mxu3 %vm677_vm0, %v620_v56  ;;  %v592_v59 = vld [vmem:[%s8414_s1 + $0x38] sm:$0xff]  ;;  %v618_v60 = vld [vmem:[%s8414_s1 + $0x108] sm:$0xff]  ;;  %v589_v61 = vld [vmem:[%s8414_s1 + $0x20] sm:$0xff]  ;;  %vm3597_vm0 = vcmask 1041408  }
  0x23   : > { %691 = vmatpush.msra.mxu0 %v601_v37  ;;  %788 = vmatpush.msra.mxu1 %v617_v58  ;;  %v590_v62 = vld [vmem:[%s8414_s1 + $0x28] sm:$0xff]  ;;  %v587_v63 = vld [vmem:[%s8414_s1 + $0x10] sm:$0xff]  ;;  %v585_v6 = vld [vmem:[%s8414_s1] sm:$0xff] }
  0x24   : > { %3863 = vrot.lane.b32.xlu2 %v3857_v3, %s4403_s28  ;;  %869 = vmatpush.msra.mxu2 %v602_v38  ;;  %v588_v3 = vld [vmem:[%s8414_s1 + $0x18] sm:$0xff]  ;;  %v142_v19 = vld [vmem:[%s4481_s25] sm:$0xff] }
  0x25   : > { %413 = vrot.lane.b32.xlu1 %v4487_v1, %s4401_s26  ;;  %692 = vmatpush.msra.mxu0 %v599_v39 }
  0x26   : > { %3853 = vrot.lane.b32.xlu0 %v3852_v7, %s4404_s29  ;;  %870 = vmatpush.msra.mxu2 %v600_v41  ;;  %v586_v7 = vld [vmem:[%s8414_s1 + $0x8] sm:$0xff] }
  0x27   : > { %693 = vmatpush.msra.mxu0 %v597_v47  ;;  %966 = vmatpush.msra.mxu3 %v618_v60 }
  0x28   : > { %871 = vmatpush.msra.mxu2 %v598_v48 }
  0x29   : > { %694 = vmatpush.msra.mxu0 %v595_v49 }
  0x2a   : > { %872 = vmatpush.msra.mxu2 %v596_v50 }
  0x2b   : > { %695 = vmatpush.msra.mxu0 %v593_v52 }
  0x2c   : > { %417 = vrot.lane.b32.xlu2 %v4513_v8, %s4401_s26  ;;  %873 = vmatpush.msra.mxu2 %v594_v55 }
  0x2d   : > { %3873 = vrot.lane.b32.xlu1 %v3872_v9, %s4402_s27  ;;  %696 = vmatpush.msra.mxu0 %v591_v57 }
  0x2e   : > { %3868 = vrot.lane.b32.xlu0 %v3867_v10, %s4404_s29  ;;  %874 = vmatpush.msra.mxu2 %v592_v59 }
  0x2f   : > { %697 = vmatpush.msra.mxu0 %v589_v61 }
  0x30   : > { %875 = vmatpush.msra.mxu2 %v590_v62 }
  0x31   : > { %698 = vmatpush.msra.mxu0 %v587_v63 }
  0x32   : > { %876 = vmatpush.msra.mxu2 %v588_v3 }
  0x33   : > { %699 = vmatpush.msra.mxu0 %v585_v6 }
  0x34   : > { %3883 = vrot.lane.b32.xlu2 %v3882_v12, %s4404_s29  ;;  %877 = vmatpush.msra.mxu2 %v586_v7 }
  0x35   : > { %3878 = vrot.lane.b32.xlu1 %v3872_v9, %s4403_s28  ;;  %v4720_v9 = vpack.i.bf16 %v4676_v54, %v4643_v45 }
  0x36   : > { %419 = vrot.lane.b32.xlu0 %v4524_v11, %s4401_s26 }
  0x3c   : > { %423 = vrot.lane.b32.xlu2 %v4538_v15, %s4401_s26 }
  0x3d   : > { %421 = vrot.lane.b32.xlu1 %v4533_v13, %s4401_s26 }
  0x3e   : > { %3888 = vrot.lane.b32.xlu0 %v3887_v14, %s4402_s27 }
  0x44   : > { %3903 = vrot.lane.b32.xlu2 %v3902_v17, %s4402_s27 }
  0x45   : > { %3898 = vrot.lane.b32.xlu1 %v3897_v18, %s4404_s29 }
  0x46   : > { %3893 = vrot.lane.b32.xlu0 %v3887_v14, %s4403_s28 }
  0x4c   : > { %3908 = vrot.lane.b32.xlu2 %v3902_v17, %s4403_s28 }
  0x4d   : > { %427 = vrot.lane.b32.xlu1 %v4574_v25, %s4401_s26 }
  0x4e   : > { %425 = vrot.lane.b32.xlu0 %v4546_v16, %s4401_s26 }
  0x54   : > { %429 = vrot.lane.b32.xlu2 %v4580_v26, %s4401_s26 }
  0x55   : > { %3918 = vrot.lane.b32.xlu1 %v3917_v33, %s4402_s27 }
  0x56   : > { %3913 = vrot.lane.b32.xlu0 %v3912_v34, %s4404_s29 }
  0x5c   : > { %3928 = vrot.lane.b32.xlu2 %v3927_v42, %s4404_s29 }
  0x5d   : > { %3923 = vrot.lane.b32.xlu1 %v3917_v33, %s4403_s28 }
  0x5e   : > { %431 = vrot.lane.b32.xlu0 %v4626_v40, %s4401_s26 }
  0x64   : > { %435 = vrot.lane.b32.xlu2 %v4643_v45, %s4401_s26 }
  0x65   : > { %433 = vrot.lane.b32.xlu1 %v4638_v43, %s4401_s26 }
  0x66   : > { %3933 = vrot.lane.b32.xlu0 %v3932_v44, %s4402_s27 }
  0x6c   : > { %3948 = vrot.lane.b32.xlu2 %v4720_v9, %s4402_s27 }
  0x6d   : > { %3943 = vrot.lane.b32.xlu1 %v3942_v46, %s4404_s29 }
  0x6e   : > { %3938 = vrot.lane.b32.xlu0 %v3932_v44, %s4403_s28 }
  0x74   : > { %3953 = vrot.lane.b32.xlu2 %v4720_v9, %s4403_s28 }
  0x75   : > { %439 = vrot.lane.b32.xlu1 %v4667_v51, %s4401_s26 }
  0x76   : > { %437 = vrot.lane.b32.xlu0 %v4676_v54, %s4401_s26  ;;  %v416_v14 = vpop.permute.xlu2 %415 }
  0x7e   : > { %v3864_v29 = vpop.permute.xlu2 %3863 }
  0x7f   : > { %v3865_v35 = vunpack.i.l.bf16 %v3864_v29  ;;  %v3866_v47 = vunpack.i.h.bf16 %v3864_v29 }
  0x81   : > { %v488_v41 = vsel %vm485_vm2, %v4495_v4, %v3865_v35  ;;  %v489_v4 = vsel %vm485_vm2, %v4484_v0, %v3866_v47  ;;  %v4786_v47 = vld [vmem:[%s4481_s25 + $0x98] sm:$0xff] }
  0x86   : > { %v418_v44 = vpop.permute.xlu2 %417 }
  0x8e   : > { %v3884_v56 = vpop.permute.xlu2 %3883 }
  0x8f   : > { %v3859_v10 = vpop.permute.xlu1 %3858  ;;  %v3885_v60 = vunpack.i.l.bf16 %v3884_v56 }
  0x90   : > { %v3849_v12 = vpop.permute.xlu0 %3848  ;;  %v3860_v22 = vunpack.i.l.bf16 %v3859_v10  ;;  %v3861_v34 = vunpack.i.h.bf16 %v3859_v10 }
  0x91   : > { %v3850_v17 = vunpack.i.l.bf16 %v3849_v12  ;;  %v3851_v23 = vunpack.i.h.bf16 %v3849_v12 }
  0x93   : > { %v486_v24 = vsel %vm485_vm2, %v142_v19, %v3850_v17  ;;  %v487_v32 = vsel %vm485_vm2, %v4490_v2, %v3851_v23 }
  0x96   : > { %v424_v10 = vpop.permute.xlu2 %423 }
  0x97   : > { %v414_v18 = vpop.permute.xlu1 %413 }
  0x98   : > { %v3854_v20 = vpop.permute.xlu0 %3853  ;;  %3706 = vmatmul.msk.f32.vlgmr.msra.gmra.mxu1 %vm628_vm1, %v414_v18  ;;  %3731 = vmatmul.msk.f32.vlgmr.msra.gmra.mxu3 %vm628_vm1, %v414_v18 }
  0x99   : > { %v3855_v21 = vunpack.i.l.bf16 %v3854_v20  ;;  %v3856_v27 = vunpack.i.h.bf16 %v3854_v20 }
  0x9b   : > { %v511_v28 = vsel %vm510_vm3, %v486_v24, %v3855_v21  ;;  %v512_v33 = vsel %vm510_vm3, %v487_v32, %v3856_v27 }
  0x9c   : > { %v536_v30 = vsel %vm535_vm4, %v511_v28, %v3860_v22  ;;  %v537_v37 = vsel %vm535_vm4, %v512_v33, %v3861_v34  ;;  %v3957_v33 = vpack.i.bf16 %v4667_v51, %v4676_v54  ;;  %v4772_v34 = vld [vmem:[%s4481_s25 + $0x90] sm:$0xff] }
  0x9d   : > { %v561_v31 = vsel %vm560_vm5, %v536_v30, %v414_v18  ;;  %v562_v42 = vsel %vm560_vm5, %v537_v37, %v416_v14  ;;  %441 = vrot.lane.b32.xlu2 %v4772_v34, %s4401_s26 }
  0x9e   : > { %700 = vmatmul.f32.vlgmr.msra.gmra.mxu0 %v561_v31  ;;  %878 = vmatmul.f32.vlgmr.msra.gmra.mxu2 %v561_v31  ;;  %v3904_v24 = vpop.permute.xlu2 %3903 }
  0x9f   : > { %v3874_v39 = vpop.permute.xlu1 %3873  ;;  %v3905_v28 = vunpack.i.l.bf16 %v3904_v24  ;;  %3958 = vrot.lane.b32.xlu0 %v3957_v33, %s4404_s29 }
  0xa0   : > { %3707 = vmatmul.msk.f32.gmra.mxu1 %vm628_vm1, %v416_v14  ;;  %3732 = vmatmul.msk.f32.gmra.mxu3 %vm628_vm1, %v416_v14  ;;  %v3869_v36 = vpop.permute.xlu0 %3868  ;;  %v3875_v2 = vunpack.i.l.bf16 %v3874_v39  ;;  %v3876_v55 = vunpack.i.h.bf16 %v3874_v39  ;;  %v3886_v14 = vunpack.i.h.bf16 %v3884_v56 }
  0xa1   : > { %v3870_v38 = vunpack.i.l.bf16 %v3869_v36  ;;  %v3871_v49 = vunpack.i.h.bf16 %v3869_v36  ;;  %v3962_v36 = vpack.i.bf16 %v4772_v34, %v4667_v51 }
  0xa3   : > { %v513_v46 = vsel %vm510_vm3, %v488_v41, %v3870_v38  ;;  %v514_v57 = vsel %vm510_vm3, %v489_v4, %v3871_v49  ;;  %3963 = vrot.lane.b32.xlu1 %v3962_v36, %s4402_s27 }
  0xa4   : > { %v538_v48 = vsel %vm535_vm4, %v513_v46, %v3875_v2  ;;  %v539_v59 = vsel %vm535_vm4, %v514_v57, %v3876_v55  ;;  %v4799_v57 = vld [vmem:[%s4481_s25 + $0xa0] sm:$0xff] }
  0xa5   : > { %v563_v53 = vsel %vm560_vm5, %v538_v48, %v418_v44 }
  0xa6   : > { %703 = vmatmul.f32.gmra.mxu0 %v562_v42  ;;  %881 = vmatmul.f32.gmra.mxu2 %v562_v42  ;;  %v3909_v41 = vpop.permute.xlu2 %3908  ;;  %v3906_v42 = vunpack.i.h.bf16 %v3904_v24 }
  0xa7   : > { %v3879_v52 = vpop.permute.xlu1 %3878  ;;  %v3910_v46 = vunpack.i.l.bf16 %v3909_v41  ;;  %443 = vrot.lane.b32.xlu0 %v4786_v47, %s4401_s26  ;;  %v3911_v56 = vunpack.i.h.bf16 %v3909_v41 }
  0xa8   : > { %3708 = vmatmul.msk.f32.gmra.mxu1 %vm628_vm1, %v418_v44  ;;  %3733 = vmatmul.msk.f32.gmra.mxu3 %vm628_vm1, %v418_v44  ;;  %v420_v50 = vpop.permute.xlu0 %419  ;;  %v3880_v58 = vunpack.i.l.bf16 %v3879_v52  ;;  %v3881_v7 = vunpack.i.h.bf16 %v3879_v52 }
  0xa9   : > { %v564_v62 = vsel %vm560_vm5, %v539_v59, %v420_v50  ;;  %v4803_v59 = vpack.i.bf16 %v4799_v57, %v4786_v47 }
  0xaa   : > { %v490_v0 = vsel %vm485_vm2, %v4487_v1, %v3880_v58  ;;  %v491_v1 = vsel %vm485_vm2, %v4498_v5, %v3881_v7 }
  0xab   : > { %v515_v6 = vsel %vm510_vm3, %v490_v0, %v3885_v60  ;;  %v516_v22 = vsel %vm510_vm3, %v491_v1, %v3886_v14  ;;  %3968 = vrot.lane.b32.xlu1 %v3962_v36, %s4403_s28 }
  0xae   : > { %706 = vmatmul.f32.gmra.mxu0 %v563_v53  ;;  %884 = vmatmul.f32.gmra.mxu2 %v563_v53  ;;  %v430_v53 = vpop.permute.xlu2 %429 }
  0xaf   : > { %v422_v3 = vpop.permute.xlu1 %421  ;;  %3978 = vrot.lane.b32.xlu0 %v4803_v59, %s4402_s27 }
  0xb0   : > { %3709 = vmatmul.msk.f32.gmra.mxu1 %vm628_vm1, %v420_v50  ;;  %3734 = vmatmul.msk.f32.gmra.mxu3 %vm628_vm1, %v420_v50  ;;  %v3889_v61 = vpop.permute.xlu0 %3888  ;;  %v494_v50 = vsel %vm485_vm2, %v4533_v13, %v3910_v46  ;;  %v4852_v46 = vld [vmem:[%s4481_s25 + $0xa8] sm:$0xff] }
  0xb1   : > { %v3890_v63 = vunpack.i.l.bf16 %v3889_v61  ;;  %v3891_v19 = vunpack.i.h.bf16 %v3889_v61  ;;  %v495_v61 = vsel %vm485_vm2, %v4538_v15, %v3911_v56 }
  0xb3   : > { %v540_v12 = vsel %vm535_vm4, %v515_v6, %v3890_v63  ;;  %v541_v27 = vsel %vm535_vm4, %v516_v22, %v3891_v19  ;;  %445 = vrot.lane.b32.xlu1 %v4799_v57, %s4401_s26 }
  0xb4   : > { %v565_v18 = vsel %vm560_vm5, %v540_v12, %v422_v3  ;;  %v566_v29 = vsel %vm560_vm5, %v541_v27, %v424_v10 }
  0xb6   : > { %709 = vmatmul.f32.gmra.mxu0 %v564_v62  ;;  %887 = vmatmul.f32.gmra.mxu2 %v564_v62  ;;  %v3929_v6 = vpop.permute.xlu2 %3928 }
  0xb7   : > { %v3899_v21 = vpop.permute.xlu1 %3898  ;;  %v3930_v15 = vunpack.i.l.bf16 %v3929_v6 }
  0xb8   : > { %3710 = vmatmul.msk.f32.gmra.mxu1 %vm628_vm1, %v422_v3  ;;  %3735 = vmatmul.msk.f32.gmra.mxu3 %vm628_vm1, %v422_v3  ;;  %v3894_v17 = vpop.permute.xlu0 %3893  ;;  %v3900_v23 = vunpack.i.l.bf16 %v3899_v21  ;;  %v3901_v37 = vunpack.i.h.bf16 %v3899_v21 }
  0xb9   : > { %v3895_v20 = vunpack.i.l.bf16 %v3894_v17  ;;  %v3896_v32 = vunpack.i.h.bf16 %v3894_v17 }
  0xbb   : > { %v492_v5 = vsel %vm485_vm2, %v4513_v8, %v3895_v20  ;;  %v493_v38 = vsel %vm485_vm2, %v4524_v11, %v3896_v32  ;;  %v3972_v20 = vpack.i.bf16 %v4786_v47, %v4772_v34 }
  0xbc   : > { %v517_v31 = vsel %vm510_vm3, %v492_v5, %v3900_v23  ;;  %v518_v44 = vsel %vm510_vm3, %v493_v38, %v3901_v37 }
  0xbd   : > { %v542_v8 = vsel %vm535_vm4, %v517_v31, %v3905_v28  ;;  %v543_v48 = vsel %vm535_vm4, %v518_v44, %v3906_v42  ;;  %3973 = vrot.lane.b32.xlu2 %v3972_v20, %s4404_s29 }
  0xbe   : > { %712 = vmatmul.f32.gmra.mxu0 %v565_v18  ;;  %890 = vmatmul.f32.gmra.mxu2 %v565_v18  ;;  %v436_v21 = vpop.permute.xlu2 %435 }
  0xbf   : > { %v428_v35 = vpop.permute.xlu1 %427 }
  0xc0   : > { %3711 = vmatmul.msk.f32.gmra.mxu1 %vm628_vm1, %v424_v10  ;;  %3736 = vmatmul.msk.f32.gmra.mxu3 %vm628_vm1, %v424_v10  ;;  %v426_v30 = vpop.permute.xlu0 %425  ;;  %v568_v52 = vsel %vm560_vm5, %v543_v48, %v428_v35  ;;  %v4855_v48 = vld [vmem:[%s4481_s25 + $0xb0] sm:$0xff] }
  0xc1   : > { %v567_v39 = vsel %vm560_vm5, %v542_v8, %v426_v30  ;;  %449 = vrot.lane.b32.xlu0 %v4855_v48, %s4401_s26 }
  0xc5   : > { %447 = vrot.lane.b32.xlu2 %v4852_v46, %s4401_s26 }
  0xc6   : > { %715 = vmatmul.f32.gmra.mxu0 %v566_v29  ;;  %893 = vmatmul.f32.gmra.mxu2 %v566_v29  ;;  %v3949_v33 = vpop.permute.xlu2 %3948 }
  0xc7   : > { %v3919_v49 = vpop.permute.xlu1 %3918  ;;  %v3950_v36 = vunpack.i.l.bf16 %v3949_v33  ;;  %v3951_v44 = vunpack.i.h.bf16 %v3949_v33 }
  0xc8   : > { %3737 = vmatmul.msk.f32.gmra.mxu3 %vm628_vm1, %v426_v30  ;;  %3712 = vmatmul.msk.f32.gmra.mxu1 %vm628_vm1, %v426_v30  ;;  %v3914_v2 = vpop.permute.xlu0 %3913  ;;  %v3920_v4 = vunpack.i.l.bf16 %v3919_v49  ;;  %v3921_v62 = vunpack.i.h.bf16 %v3919_v49 }
  0xc9   : > { %v3915_v11 = vunpack.i.l.bf16 %v3914_v2  ;;  %v3916_v13 = vunpack.i.h.bf16 %v3914_v2 }
  0xcb   : > { %v519_v55 = vsel %vm510_vm3, %v494_v50, %v3915_v11  ;;  %v520_v3 = vsel %vm510_vm3, %v495_v61, %v3916_v13  ;;  %v4866_v50 = vld [vmem:[%s4481_s25 + $0xb8] sm:$0xff] }
  0xcc   : > { %v544_v60 = vsel %vm535_vm4, %v519_v55, %v3920_v4  ;;  %v545_v10 = vsel %vm535_vm4, %v520_v3, %v3921_v62  ;;  %451 = vrot.lane.b32.xlu0 %v4866_v50, %s4401_s26  ;;  %v3704_v3 = vld [vmem:[%s8414_s1 + $0x120] ss:$8 sm:$0x3] }
  0xcd   : > { %v569_v0 = vsel %vm560_vm5, %v544_v60, %v430_v53 }
  0xce   : > { %896 = vmatmul.f32.gmra.mxu2 %v567_v39  ;;  %718 = vmatmul.f32.gmra.mxu0 %v567_v39 }
  0xcf   : > { %v3924_v63 = vpop.permute.xlu1 %3923 }
  0xd0   : > { %3738 = vmatmul.msk.f32.gmra.mxu3 %vm628_vm1, %v428_v35  ;;  %3713 = vmatmul.msk.f32.gmra.mxu1 %vm628_vm1, %v428_v35  ;;  %v432_v58 = vpop.permute.xlu0 %431  ;;  %v3925_v7 = vunpack.i.l.bf16 %v3924_v63  ;;  %v3926_v18 = vunpack.i.h.bf16 %v3924_v63 }
  0xd1   : > { %v570_v14 = vsel %vm560_vm5, %v545_v10, %v432_v58  ;;  %v4900_v10 = vperm.slane %v3704_v3, 0 }
  0xd2   : > { %v496_v12 = vsel %vm485_vm2, %v4546_v16, %v3925_v7  ;;  %v3931_v16 = vunpack.i.h.bf16 %v3929_v6  ;;  %v497_v23 = vsel %vm485_vm2, %v4574_v25, %v3926_v18 }
  0xd3   : > { %v521_v1 = vsel %vm510_vm3, %v496_v12, %v3930_v15 }
  0xd4   : > { %v522_v28 = vsel %vm510_vm3, %v497_v23, %v3931_v16  ;;  %3983 = vrot.lane.b32.xlu0 %v4803_v59, %s4403_s28  ;;  %v4902_v59 = vperm.slane %v3704_v3, 1 }
  0xd6   : > { %899 = vmatmul.f32.gmra.mxu2 %v568_v52  ;;  %721 = vmatmul.f32.gmra.mxu0 %v568_v52  ;;  %v167_v52 = vld [vmem:[%s4481_s25 + $0xc8] sm:$0xff] }
  0xd7   : > { %v434_v19 = vpop.permute.xlu1 %433  ;;  %455 = vrot.lane.b32.xlu1 %v167_v52, %s4401_s26 }
  0xd8   : > { %3739 = vmatmul.msk.f32.gmra.mxu3 %vm628_vm1, %v430_v53  ;;  %3714 = vmatmul.msk.f32.gmra.mxu1 %vm628_vm1, %v430_v53  ;;  %v3934_v9 = vpop.permute.xlu0 %3933  ;;  %v4875_v53 = vld [vmem:[%s4481_s25 + $0xc0] sm:$0xff] }
  0xd9   : > { %v3935_v17 = vunpack.i.l.bf16 %v3934_v9  ;;  %v3936_v27 = vunpack.i.h.bf16 %v3934_v9  ;;  %453 = vrot.lane.b32.xlu2 %v4875_v53, %s4401_s26 }
  0xdb   : > { %v546_v22 = vsel %vm535_vm4, %v521_v1, %v3935_v17  ;;  %v547_v31 = vsel %vm535_vm4, %v522_v28, %v3936_v27 }
  0xdc   : > { %v571_v24 = vsel %vm560_vm5, %v546_v22, %v434_v19  ;;  %v572_v35 = vsel %vm560_vm5, %v547_v31, %v436_v21 }
  0xde   : > { %902 = vmatmul.f32.gmra.mxu2 %v569_v0  ;;  %724 = vmatmul.f32.gmra.mxu0 %v569_v0  ;;  %v168_v0 = vld [vmem:[%s4481_s25 + $0xd0] sm:$0xff] }
  0xdf   : > { %v3944_v30 = vpop.permute.xlu1 %3943  ;;  %457 = vrot.lane.b32.xlu0 %v168_v0, %s4401_s26 }
  0xe0   : > { %3740 = vmatmul.msk.f32.gmra.mxu3 %vm628_vm1, %v432_v58  ;;  %3715 = vmatmul.msk.f32.gmra.mxu1 %vm628_vm1, %v432_v58  ;;  %v3939_v5 = vpop.permute.xlu0 %3938  ;;  %v3945_v32 = vunpack.i.l.bf16 %v3944_v30  ;;  %v3946_v41 = vunpack.i.h.bf16 %v3944_v30 }
  0xe1   : > { %v3940_v29 = vunpack.i.l.bf16 %v3939_v5  ;;  %v3941_v37 = vunpack.i.h.bf16 %v3939_v5 }
  0xe3   : > { %v498_v25 = vsel %vm485_vm2, %v4580_v26, %v3940_v29  ;;  %v499_v26 = vsel %vm485_vm2, %v4626_v40, %v3941_v37 }
  0xe4   : > { %v523_v8 = vsel %vm510_vm3, %v498_v25, %v3945_v32  ;;  %v524_v2 = vsel %vm510_vm3, %v499_v26, %v3946_v41 }
  0xe5   : > { %v548_v39 = vsel %vm535_vm4, %v523_v8, %v3950_v36  ;;  %v549_v40 = vsel %vm535_vm4, %v524_v2, %v3951_v44 }
  0xe6   : > { %905 = vmatmul.f32.gmra.mxu2 %v570_v14  ;;  %727 = vmatmul.f32.gmra.mxu0 %v570_v14 }
  0xe7   : > { %v440_v11 = vpop.permute.xlu1 %439 }
  0xe8   : > { %3741 = vmatmul.msk.f32.gmra.mxu3 %vm628_vm1, %v434_v19  ;;  %3716 = vmatmul.msk.f32.gmra.mxu1 %vm628_vm1, %v434_v19  ;;  %v438_v38 = vpop.permute.xlu0 %437  ;;  %v574_v49 = vsel %vm560_vm5, %v549_v40, %v440_v11 }
  0xe9   : > { %v573_v42 = vsel %vm560_vm5, %v548_v39, %v438_v38 }
  0xee   : > { %908 = vmatmul.f32.gmra.mxu2 %v571_v24  ;;  %730 = vmatmul.f32.gmra.mxu0 %v571_v24  ;;  %v3954_v24 = vpop.permute.xlu2 %3953 }
  0xef   : > { %v3955_v30 = vunpack.i.l.bf16 %v3954_v24  ;;  %v3956_v52 = vunpack.i.h.bf16 %v3954_v24 }
  0xf0   : > { %3742 = vmatmul.msk.f32.gmra.mxu3 %vm628_vm1, %v436_v21  ;;  %3717 = vmatmul.msk.f32.gmra.mxu1 %vm628_vm1, %v436_v21 }
  0xf1   : > { %v500_v37 = vsel %vm485_vm2, %v4638_v43, %v3955_v30  ;;  %v4936_v43 = vpack.i.bf16 %v4855_v48, %v4852_v46 }
  0xf6   : > { %911 = vmatmul.f32.gmra.mxu2 %v572_v35  ;;  %733 = vmatmul.f32.gmra.mxu0 %v572_v35 }
  0xf7   : > { %v442_v41 = vpop.permute.xlu2 %441 }
  0xf8   : > { %3743 = vmatmul.msk.f32.gmra.mxu3 %vm628_vm1, %v438_v38  ;;  %3718 = vmatmul.msk.f32.gmra.mxu1 %vm628_vm1, %v438_v38 }
  0xfe   : > { %914 = vmatmul.f32.gmra.mxu2 %v573_v42  ;;  %736 = vmatmul.f32.gmra.mxu0 %v573_v42 }
 0x100   : > { %3744 = vmatmul.msk.f32.gmra.mxu3 %vm628_vm1, %v440_v11  ;;  %3719 = vmatmul.msk.f32.gmra.mxu1 %vm628_vm1, %v440_v11 }
 0x106   : > { %917 = vmatmul.f32.gmra.mxu2 %v574_v49  ;;  %739 = vmatmul.f32.gmra.mxu0 %v574_v49 }
 0x108   : > { %3745 = vmatmul.msk.f32.gmra.mxu3 %vm628_vm1, %v442_v41  ;;  %3720 = vmatmul.msk.f32.gmra.mxu1 %vm628_vm1, %v442_v41 }
 0x111   : > { %v3959_v32 = vpop.permute.xlu0 %3958 }
 0x112   : > { %v3960_v25 = vunpack.i.l.bf16 %v3959_v32 }
 0x114   : > { %v525_v26 = vsel %vm510_vm3, %v500_v37, %v3960_v25 }
 0x115   : > { %v4872_v4 = vpop.f32.mrf.mxu1  ;;  %v3964_v33 = vpop.permute.xlu1 %3963 }
 0x116   : > { %v3965_v35 = vunpack.i.l.bf16 %v3964_v33 }
 0x118   : > { %v550_v2 = vsel %vm535_vm4, %v525_v26, %v3965_v35 }
 0x119   : > { %v575_v49 = vsel %vm560_vm5, %v550_v2, %v442_v41  ;;  %v444_v3 = vpop.permute.xlu0 %443 }
 0x11a   : > { %920 = vmatmul.f32.gmra.mxu2 %v575_v49  ;;  %742 = vmatmul.f32.gmra.mxu0 %v575_v49 }
 0x11b   : > { %v4879_v55 = vpop.f32.mrf.mxu0  ;;  %v4881_v56 = vpop.f32.mrf.mxu3  ;;  %3746 = vmatmul.msk.f32.gmra.mxu3 %vm628_vm1, %v444_v3  ;;  %3721 = vmatmul.msk.f32.gmra.mxu1 %vm628_vm1, %v444_v3 }
 0x11d   : > { %v4883_v58 = vpop.f32.mrf.mxu1 }
 0x121   : > { %v4887_v60 = vpop.f32.mrf.mxu2  ;;  %v3979_v35 = vpop.permute.xlu0 %3978 }
 0x123   : > { %v4889_v13 = vpop.f32.mrf.mxu0  ;;  %v4891_v61 = vpop.f32.mrf.mxu3 }
 0x125   : > { %v796_v62 = vpop.f32.mrf.mxu1 }
 0x129   : > { %v4895_v63 = vpop.f32.mrf.mxu2 }
 0x12b   : > { %v707_v6 = vpop.f32.mrf.mxu0  ;;  %v974_v7 = vpop.f32.mrf.mxu3 }
 0x12c   : > { %v708_v15 = vadd.f32 %v707_v6, %v4900_v10  ;;  %v3966_v6 = vunpack.i.h.bf16 %v3964_v33 }
 0x12d   : > { %v799_v12 = vpop.f32.mrf.mxu1 }
 0x12e   : > { %v4906_v18 = vadd.f32 %v796_v62, %v708_v15  ;;  %v3961_v62 = vunpack.i.h.bf16 %v3959_v32 }
 0x131   : > { %v885_v9 = vpop.f32.mrf.mxu2 }
 0x132   : > { %v886_v14 = vadd.f32 %v885_v9, %v4902_v59  ;;  %v3969_v9 = vpop.permute.xlu1 %3968 }
 0x133   : > { %v710_v17 = vpop.f32.mrf.mxu0  ;;  %v977_v1 = vpop.f32.mrf.mxu3  ;;  %v3970_v30 = vunpack.i.l.bf16 %v3969_v9 }
 0x134   : > { %v4908_v19 = vadd.f32 %v974_v7, %v886_v14  ;;  %v711_v21 = vadd.f32 %v710_v17, %v4900_v10 }
 0x135   : > { %v802_v23 = vpop.f32.mrf.mxu1 }
 0x136   : > { %v3987_v20 = vpack.i.bf16 %v4908_v19, %v4906_v18  ;;  %v4915_v28 = vadd.f32 %v799_v12, %v711_v21  ;;  %v501_v12 = vsel %vm485_vm2, %v4643_v45, %v3956_v52  ;;  %v3974_v45 = vpop.permute.xlu2 %3973 }
 0x137   : > { %v3975_v25 = vunpack.i.l.bf16 %v3974_v45 }
 0x138   : > { %3988 = vrot.lane.b32.xlu1 %v3987_v20, %s4405_s6 }
 0x139   : > { %v888_v22 = vpop.f32.mrf.mxu2 }
 0x13a   : > { %v889_v16 = vadd.f32 %v888_v22, %v4902_v59 }
 0x13b   : > { %v713_v27 = vpop.f32.mrf.mxu0  ;;  %v980_v5 = vpop.f32.mrf.mxu3 }
 0x13c   : > { %v4917_v29 = vadd.f32 %v977_v1, %v889_v16  ;;  %v714_v36 = vadd.f32 %v713_v27, %v4900_v10  ;;  %v526_v1 = vsel %vm510_vm3, %v501_v12, %v3961_v62  ;;  %v169_v27 = vld [vmem:[%s4481_s25 + $0xd8] sm:$0xff]  ;;  %v3971_v62 = vunpack.i.h.bf16 %v3969_v9 }
 0x13d   : > { %v805_v39 = vpop.f32.mrf.mxu1  ;;  %v551_v22 = vsel %vm535_vm4, %v526_v1, %v3966_v6  ;;  %v702_v12 = vadd.f32 %v4879_v55, %v4900_v10 }
 0x13e   : > { %v3992_v31 = vpack.i.bf16 %v4917_v29, %v4915_v28  ;;  %v4930_v11 = vadd.f32 %v802_v23, %v714_v36  ;;  %v576_v24 = vsel %vm560_vm5, %v551_v22, %v444_v3  ;;  %v3980_v36 = vunpack.i.l.bf16 %v3979_v35  ;;  %v448_v9 = vpop.permute.xlu2 %447 }
 0x13f   : > { %923 = vmatmul.f32.gmra.mxu2 %v576_v24  ;;  %745 = vmatmul.f32.gmra.mxu0 %v576_v24 }
 0x140   : > { %3993 = vrot.lane.b32.xlu2 %v3992_v31, %s4405_s6  ;;  %v883_v31 = vadd.f32 %v4895_v63, %v4902_v59  ;;  %v502_v63 = vsel %vm485_vm2, %v4676_v54, %v3970_v30 }
 0x141   : > { %v891_v8 = vpop.f32.mrf.mxu2 }
 0x142   : > { %v892_v38 = vadd.f32 %v891_v8, %v4902_v59  ;;  %v880_v8 = vadd.f32 %v4887_v60, %v4902_v59  ;;  %v527_v60 = vsel %vm510_vm3, %v502_v63, %v3975_v25 }
 0x143   : > { %v716_v42 = vpop.f32.mrf.mxu0  ;;  %v983_v44 = vpop.f32.mrf.mxu3  ;;  %v552_v2 = vsel %vm535_vm4, %v527_v60, %v3980_v36  ;;  %v4047_v60 = vpack.i.bf16 %v4875_v53, %v4866_v50 }
 0x144   : > { %v4932_v40 = vadd.f32 %v980_v5, %v892_v38  ;;  %v717_v7 = vadd.f32 %v716_v42, %v4900_v10  ;;  %v4002_v5 = vpack.i.bf16 %v4852_v46, %v4799_v57  ;;  %v446_v38 = vpop.permute.xlu1 %445  ;;  %v4983_v49 = vadd.f32 %v4881_v56, %v880_v8 }
 0x145   : > { %v808_v17 = vpop.f32.mrf.mxu1  ;;  %3747 = vmatmul.msk.f32.gmra.mxu3 %vm628_vm1, %v446_v38  ;;  %3722 = vmatmul.msk.f32.gmra.mxu1 %vm628_vm1, %v446_v38  ;;  %v577_v52 = vsel %vm560_vm5, %v552_v2, %v446_v38 }
 0x146   : > { %v3997_v0 = vpack.i.bf16 %v4932_v40, %v4930_v11  ;;  %v4952_v16 = vadd.f32 %v805_v39, %v717_v7  ;;  %v4973_v39 = vadd.f32 %v4891_v61, %v883_v31  ;;  %v3976_v7 = vunpack.i.h.bf16 %v3974_v45 }
 0x147   : > { %926 = vmatmul.f32.gmra.mxu2 %v577_v52  ;;  %748 = vmatmul.f32.gmra.mxu0 %v577_v52  ;;  %v5052_v52 = vpop.permute.xlu0 %449 }
 0x148   : > { %4008 = vrot.lane.b32.xlu2 %v4936_v43, %s4402_s27  ;;  %3998 = vrot.lane.b32.xlu1 %v3997_v0, %s4405_s6  ;;  %v705_v0 = vadd.f32 %v4889_v13, %v4900_v10  ;;  %v4017_v6 = vpack.i.bf16 %v4973_v39, %v4983_v49 }
 0x149   : > { %v894_v15 = vpop.f32.mrf.mxu2 }
 0x14a   : > { %v895_v14 = vadd.f32 %v894_v15, %v4902_v59  ;;  %v3981_v15 = vunpack.i.h.bf16 %v3979_v35 }
 0x14b   : > { %v719_v20 = vpop.f32.mrf.mxu0  ;;  %v986_v21 = vpop.f32.mrf.mxu3 }
 0x14c   : > { %v4954_v23 = vadd.f32 %v983_v44, %v895_v14  ;;  %v720_v33 = vadd.f32 %v719_v20, %v4900_v10  ;;  %v503_v14 = vsel %vm485_vm2, %v4667_v51, %v3971_v62 }
 0x14d   : > { %v811_v61 = vpop.f32.mrf.mxu1  ;;  %v528_v55 = vsel %vm510_vm3, %v503_v14, %v3976_v7  ;;  %3748 = vmatmul.msk.f32.gmra.mxu3 %vm628_vm1, %v448_v9  ;;  %3723 = vmatmul.msk.f32.gmra.mxu1 %vm628_vm1, %v448_v9 }
 0x14e   : > { %v4012_v32 = vpack.i.bf16 %v4954_v23, %v4952_v16  ;;  %v4976_v26 = vadd.f32 %v808_v17, %v720_v33  ;;  %v5004_v17 = vadd.f32 %v4883_v58, %v705_v0  ;;  %v553_v24 = vsel %vm535_vm4, %v528_v55, %v3981_v15  ;;  %v5083_v55 = vpop.permute.xlu2 %453 }
 0x14f   : > { %v4037_v58 = vpack.i.bf16 %v4866_v50, %v4855_v48  ;;  %v5068_v15 = vpop.permute.xlu0 %451 }
 0x150   : > { %4013 = vrot.lane.b32.xlu0 %v4012_v32, %s4405_s6  ;;  %459 = vrot.lane.b32.xlu2 %v169_v27, %s4401_s26  ;;  %v578_v27 = vsel %vm560_vm5, %v553_v24, %v448_v9  ;;  %s136_s26 = scalar_lea.vmem [#allocation2], %s3702_s22 }
 0x151   : > { %4003 = vrot.lane.b32.xlu1 %v4002_v5, %s4404_s29  ;;  %v897_v37 = vpop.f32.mrf.mxu2  ;;  %929 = vmatmul.f32.gmra.mxu2 %v578_v27 }
 0x152   : > { %v898_v41 = vadd.f32 %v897_v37, %v4902_v59  ;;  %751 = vmatmul.f32.gmra.mxu0 %v578_v27 }
 0x153   : > { %v722_v42 = vpop.f32.mrf.mxu0  ;;  %v989_v44 = vpop.f32.mrf.mxu3 }
 0x154   : > { %v4985_v54 = vadd.f32 %v986_v21, %v898_v41  ;;  %v723_v56 = vadd.f32 %v722_v42, %v4900_v10 }
 0x155   : > { %v814_v45 = vpop.f32.mrf.mxu1  ;;  %3724 = vmatmul.msk.f32.gmra.mxu1 %vm628_vm1, %v5052_v52  ;;  %3749 = vmatmul.msk.f32.gmra.mxu3 %vm628_vm1, %v5052_v52 }
 0x156   : > { %v4032_v3 = vpack.i.bf16 %v4985_v54, %v4976_v26  ;;  %v5007_v20 = vadd.f32 %v811_v61, %v723_v56 }
 0x158   : > { %4018 = vrot.lane.b32.xlu0 %v4017_v6, %s4405_s6  ;;  %4033 = vrot.lane.b32.xlu2 %v4032_v3, %s4405_s6 }
 0x159   : > { %4028 = vrot.lane.b32.xlu1 %v4936_v43, %s4403_s28  ;;  %v900_v13 = vpop.f32.mrf.mxu2  ;;  %v5014_v43 = vadd.f32 %v4872_v4, %v702_v12 }
 0x15a   : > { %v901_v1 = vadd.f32 %v900_v13, %v4902_v59 }
 0x15b   : > { %v725_v21 = vpop.f32.mrf.mxu0  ;;  %v992_v22 = vpop.f32.mrf.mxu3  ;;  %v4022_v30 = vpack.i.bf16 %v5004_v17, %v5014_v43 }
 0x15c   : > { %v5016_v51 = vadd.f32 %v989_v44, %v901_v1  ;;  %v726_v4 = vadd.f32 %v725_v21, %v4900_v10 }
 0x15d   : > { %v817_v36 = vpop.f32.mrf.mxu1  ;;  %3725 = vmatmul.msk.f32.gmra.mxu1 %vm628_vm1, %v5068_v15  ;;  %3750 = vmatmul.msk.f32.gmra.mxu3 %vm628_vm1, %v5068_v15 }
 0x15e   : > { %v4042_v5 = vpack.i.bf16 %v5016_v51, %v5007_v20  ;;  %v5034_v35 = vadd.f32 %v814_v45, %v726_v4  ;;  %v5094_v45 = vpop.permute.xlu1 %455 }
 0x160   : > { %4038 = vrot.lane.b32.xlu2 %v4037_v58, %s4404_s29  ;;  %4023 = vrot.lane.b32.xlu0 %v4022_v30, %s4405_s6 }
 0x161   : > { %4043 = vrot.lane.b32.xlu1 %v4042_v5, %s4405_s6  ;;  %v903_v48 = vpop.f32.mrf.mxu2  ;;  %v5104_v5 = vpop.permute.xlu0 %3983 }
 0x162   : > { %v904_v31 = vadd.f32 %v903_v48, %v4902_v59  ;;  %v1983_v48 = vld [vmem:[%s8414_s1 + $0x220] sm:$0xff] }
 0x163   : > { %v728_v32 = vpop.f32.mrf.mxu0  ;;  %v5030_v33 = vpop.f32.mrf.mxu3  ;;  %2286 = vmatpush.msrb.mxu1 %v1983_v48  ;;  %v1955_v48 = vld [vmem:[%s8414_s1 + $0x140] sm:$0xff] }
 0x164   : > { %v5032_v25 = vadd.f32 %v992_v22, %v904_v31  ;;  %v729_v8 = vadd.f32 %v728_v32, %v4900_v10  ;;  %v1981_v31 = vld [vmem:[%s8414_s1 + $0x210] sm:$0xff]  ;;  %v1979_v32 = vld [vmem:[%s8414_s1 + $0x200] sm:$0xff] }
 0x165   : > { %v820_v42 = vpop.f32.mrf.mxu1  ;;  %3726 = vmatmul.msk.f32.gmra.mxu1 %vm628_vm1, %v5083_v55  ;;  %3751 = vmatmul.msk.f32.gmra.mxu3 %vm628_vm1, %v5083_v55 }
 0x166   : > { %v5043_v38 = vadd.f32 %v817_v36, %v729_v8  ;;  %2287 = vmatpush.msrb.mxu1 %v1981_v31  ;;  %v1977_v8 = vld [vmem:[%s8414_s1 + $0x1f0] sm:$0xff] }
 0x168   : > { %1122 = vrot.lane.b32.xlu2 %v5032_v25, %s4405_s6  ;;  %2288 = vmatpush.msrb.mxu1 %v1979_v32 }
 0x169   : > { %1120 = vrot.lane.b32.xlu1 %v5034_v35, %s4405_s6  ;;  %v5041_v37 = vpop.f32.mrf.mxu2  ;;  %v5106_v4 = vpop.permute.xlu0 %457 }
 0x16a   : > { %2289 = vmatpush.msrb.mxu1 %v1977_v8 }
 0x16b   : > { %v731_v63 = vpop.f32.mrf.mxu0  ;;  %v998_v41 = vpop.f32.mrf.mxu3 }
 0x16c   : > { %v732_v44 = vadd.f32 %v731_v63, %v4900_v10  ;;  %v1975_v63 = vld [vmem:[%s8414_s1 + $0x1e0] sm:$0xff] }
 0x16d   : > { %v823_v7 = vpop.f32.mrf.mxu1  ;;  %3727 = vmatmul.msk.f32.gmra.mxu1 %vm628_vm1, %v5094_v45  ;;  %3752 = vmatmul.msk.f32.gmra.mxu3 %vm628_vm1, %v5094_v45 }
 0x16e   : > { %v5060_v53 = vadd.f32 %v820_v42, %v732_v44  ;;  %2290 = vmatpush.msrb.mxu1 %v1975_v63  ;;  %v1971_v42 = vld [vmem:[%s8414_s1 + $0x1c0] sm:$0xff]  ;;  %v1953_v63 = vld [vmem:[%s8414_s1 + $0x130] sm:$0xff] }
 0x170   : > { %1124 = vrot.lane.b32.xlu2 %v5043_v38, %s4405_s6 }
 0x171   : > { %4048 = vrot.lane.b32.xlu1 %v4047_v60, %s4402_s27  ;;  %v909_v2 = vpop.f32.mrf.mxu2 }
 0x172   : > { %v910_v61 = vadd.f32 %v909_v2, %v4902_v59 }
 0x173   : > { %v734_v0 = vpop.f32.mrf.mxu0  ;;  %v1001_v62 = vpop.f32.mrf.mxu3 }
 0x174   : > { %v5058_v50 = vadd.f32 %v998_v41, %v910_v61  ;;  %v735_v3 = vadd.f32 %v734_v0, %v4900_v10  ;;  %v1973_v41 = vld [vmem:[%s8414_s1 + $0x1d0] sm:$0xff] }
 0x175   : > { %3728 = vmatmul.msk.f32.gmra.mxu1 %vm628_vm1, %v5106_v4  ;;  %3753 = vmatmul.msk.f32.gmra.mxu3 %vm628_vm1, %v5106_v4  ;;  %v1969_v0 = vld [vmem:[%s8414_s1 + $0x1b0] sm:$0xff] }
 0x176   : > { %v5076_v13 = vadd.f32 %v823_v7, %v735_v3  ;;  %2291 = vmatpush.msrb.mxu1 %v1973_v41  ;;  %v1965_v7 = vld [vmem:[%s8414_s1 + $0x190] sm:$0xff] }
 0x178   : > { %1130 = vrot.lane.b32.xlu2 %v5058_v50, %s4405_s6  ;;  %2292 = vmatpush.msrb.mxu1 %v1971_v42 }
 0x179   : > { %1128 = vrot.lane.b32.xlu1 %v5060_v53, %s4405_s6  ;;  %v912_v6 = vpop.f32.mrf.mxu2 }
 0x17a   : > { %v913_v56 = vadd.f32 %v912_v6, %v4902_v59  ;;  %2293 = vmatpush.msrb.mxu1 %v1969_v0  ;;  %v1967_v6 = vld [vmem:[%s8414_s1 + $0x1a0] sm:$0xff] }
 0x17b   : > { %v1004_v9 = vpop.f32.mrf.mxu3 }
 0x17c   : > { %v5074_v12 = vadd.f32 %v1001_v62, %v913_v56  ;;  %2294 = vmatpush.msrb.mxu1 %v1967_v6 }
 0x17e   : > { %2295 = vmatpush.msrb.mxu1 %v1965_v7 }
 0x180   : > { %1134 = vrot.lane.b32.xlu2 %v5074_v12, %s4405_s6 }
 0x181   : > { %1132 = vrot.lane.b32.xlu1 %v5076_v13, %s4405_s6  ;;  %v915_v14 = vpop.f32.mrf.mxu2 }
 0x182   : > { %v916_v1 = vadd.f32 %v915_v14, %v4902_v59 }
 0x183   : > { %v1007_v58 = vpop.f32.mrf.mxu3 }
 0x184   : > { %v5089_v21 = vadd.f32 %v1004_v9, %v916_v1  ;;  %v1961_v9 = vld [vmem:[%s8414_s1 + $0x170] sm:$0xff]  ;;  %v1959_v1 = vld [vmem:[%s8414_s1 + $0x160] sm:$0xff] }
 0x189   : > { %1138 = vrot.lane.b32.xlu1 %v5089_v21, %s4405_s6  ;;  %v918_v22 = vpop.f32.mrf.mxu2 }
 0x18a   : > { %v919_v24 = vadd.f32 %v918_v22, %v4902_v59 }
 0x18c   : > { %v5100_v27 = vadd.f32 %v1007_v58, %v919_v24  ;;  %v1957_v24 = vld [vmem:[%s8414_s1 + $0x150] sm:$0xff] }
 0x191   : > { %1142 = vrot.lane.b32.xlu1 %v5100_v27, %s4405_s6 }
 0x19a   : > { %v3994_v30 = vpop.permute.xlu2 %3993 }
 0x19b   : > { %v3996_v60 = vunpack.i.h.bf16 %v3994_v30  ;;  %v3995_v14 = vunpack.i.l.bf16 %v3994_v30 }
 0x19d   : > { %v5145_v62 = vmax.f32 %v4917_v29, %v3996_v60  ;;  %v1963_v29 = vld [vmem:[%s8414_s1 + $0x180] sm:$0xff]  ;;  %v1188_v58 = vsel %vm1184_vm6, %v3995_v14, %v3996_v60 }
 0x19e   : > { %2296 = vmatpush.msrb.mxu1 %v1963_v29  ;;  %v1263_v41 = vmax.f32 %v4915_v28, %v1188_v58  ;;  %v3986_v29 = vunpack.i.h.bf16 %v5104_v5 }
 0x1a0   : > { %2297 = vmatpush.msrb.mxu1 %v1961_v9 }
 0x1a2   : > { %v5121_v36 = vpop.permute.xlu2 %4008  ;;  %2298 = vmatpush.msrb.mxu1 %v1959_v1 }
 0x1a3   : > { %v4010_v1 = vunpack.i.l.bf16 %v5121_v36 }
 0x1a4   : > { %2299 = vmatpush.msrb.mxu1 %v1957_v24 }
 0x1a6   : > { %2300 = vmatpush.msrb.mxu1 %v1955_v48 }
 0x1a8   : > { %2301 = vmatpush.msrb.mxu1 %v1953_v63 }
 0x1aa   : > { %v5135_v44 = vpop.permute.xlu2 %459  ;;  %v3989_v2 = vpop.permute.xlu1 %3988 }
 0x1ab   : > { %v3991_v61 = vunpack.i.h.bf16 %v3989_v2  ;;  %3729 = vmatmul.msk.f32.gmra.mxu1 %vm628_vm1, %v5135_v44  ;;  %3754 = vmatmul.msk.f32.gmra.mxu3 %vm628_vm1, %v5135_v44 }
 0x1ad   : > { %v5148_v3 = vmax.f32 %v4908_v19, %v3991_v61  ;;  %v3990_v19 = vunpack.i.l.bf16 %v3989_v2  ;;  %v3985_v2 = vunpack.i.l.bf16 %v5104_v5 }
 0x1af   : > { %v1310_v56 = vmax.f32 %v5148_v3, %v5145_v62  ;;  %v1187_v22 = vsel %vm1184_vm6, %v3990_v19, %v3991_v61 }
 0x1b0   : > { %v5176_v30 = vmax.f32 %v4906_v18, %v1187_v22 }
 0x1b2   : > { %v4034_v18 = vpop.permute.xlu2 %4033  ;;  %v1309_v0 = vmax.f32 %v5176_v30, %v1263_v41 }
 0x1b3   : > { %v4036_v28 = vunpack.i.h.bf16 %v4034_v18 }
 0x1b4   : > { %v5194_v9 = vmax.f32 %v1309_v0, 0.0 }
 0x1b6   : > { %8553 = vst [vmem:[#allocation5_spill] sm:$0xff] %v5194_v9 }
 0x1ba   : > { %v3999_v31 = vpop.permute.xlu1 %3998  ;;  %v5221_v0 = vpop.permute.xlu2 %4038 }
 0x1bb   : > { %v4001_v32 = vunpack.i.h.bf16 %v3999_v31  ;;  %v4000_v8 = vunpack.i.l.bf16 %v3999_v31 }
 0x1bd   : > { %v5183_v60 = vmax.f32 %v4932_v40, %v4001_v32  ;;  %v1189_v42 = vsel %vm1184_vm6, %v4000_v8, %v4001_v32  ;;  %v504_v40 = vsel %vm485_vm2, %v4772_v34, %v3985_v2  ;;  %v505_v32 = vsel %vm485_vm2, %v4786_v47, %v3986_v29 }
 0x1be   : > { %v1265_v61 = vmax.f32 %v4930_v11, %v1189_v42  ;;  %v4035_v11 = vunpack.i.l.bf16 %v4034_v18  ;;  %v5204_v34 = vmax.f32 %v4985_v54, %v4036_v28  ;;  %v907_v18 = vadd.f32 %v5041_v37, %v4902_v59 }
 0x1bf   : > { %v1312_v6 = vmax.f32 %v5145_v62, %v5183_v60 }
 0x1c0   : > { %v1311_v7 = vmax.f32 %v1263_v41, %v1265_v61  ;;  %v4011_v41 = vunpack.i.h.bf16 %v5121_v36  ;;  %v1191_v2 = vsel %vm1184_vm6, %v4035_v11, %v4036_v28 }
 0x1c1   : > { %v1269_v28 = vmax.f32 %v4976_v26, %v1191_v2 }
 0x1c2   : > { %v4014_v19 = vpop.permute.xlu0 %4013  ;;  %v5196_v14 = vmax.f32 %v1311_v7, 0.0 }
 0x1c3   : > { %v4016_v22 = vunpack.i.h.bf16 %v4014_v19  ;;  %v4015_v24 = vunpack.i.l.bf16 %v4014_v19  ;;  %v4004_v58 = vpop.permute.xlu1 %4003 }
 0x1c4   : > { %8554 = vst [vmem:[#allocation6_spill] sm:$0xff] %v5196_v14  ;;  %v4006_v48 = vunpack.i.h.bf16 %v4004_v58  ;;  %v4005_v31 = vunpack.i.l.bf16 %v4004_v58  ;;  %v4052_v5 = vpack.i.bf16 %v5196_v14, %v5194_v9  ;;  %v737_v58 = vpop.f32.mrf.mxu0 }
 0x1c5   : > { %v5207_v8 = vmax.f32 %v4954_v23, %v4016_v22  ;;  %v1190_v63 = vsel %vm1184_vm6, %v4015_v24, %v4016_v22  ;;  %v5232_v22 = vadd.f32 %v5030_v33, %v907_v18 }
 0x1c6   : > { %4053 = vrot.lane.b32.xlu0 %v4052_v5, %s4406_s16  ;;  %v529_v42 = vsel %vm510_vm3, %v504_v40, %v4005_v31  ;;  %v1267_v36 = vmax.f32 %v4952_v16, %v1190_v63  ;;  %v530_v29 = vsel %vm510_vm3, %v505_v32, %v4006_v48 }
 0x1c7   : > { %v554_v23 = vsel %vm535_vm4, %v529_v42, %v4010_v1  ;;  %v555_v37 = vsel %vm535_vm4, %v530_v29, %v4011_v41  ;;  %v738_v29 = vadd.f32 %v737_v58, %v4900_v10 }
 0x1c8   : > { %v579_v7 = vsel %vm560_vm5, %v554_v23, %v5052_v52  ;;  %v1313_v16 = vmax.f32 %v1265_v61, %v1267_v36  ;;  %v1315_v24 = vmax.f32 %v1267_v36, %v1269_v28  ;;  %v580_v26 = vsel %vm560_vm5, %v555_v37, %v5068_v15 }
 0x1c9   : > { %754 = vmatmul.f32.gmra.mxu0 %v579_v7  ;;  %932 = vmatmul.f32.gmra.mxu2 %v579_v7 }
 0x1ca   : > { %v4019_v40 = vpop.permute.xlu0 %4018  ;;  %v5248_v61 = vmax.f32 %v1313_v16, 0.0  ;;  %v5250_v5 = vmax.f32 %v1315_v24, 0.0 }
 0x1cb   : > { %v4021_v19 = vunpack.i.h.bf16 %v4019_v40  ;;  %v4020_v11 = vunpack.i.l.bf16 %v4019_v40  ;;  %v5228_v1 = vpop.permute.xlu1 %4028 }
 0x1cc   : > { %8555 = vst [vmem:[#allocation7_spill] sm:$0xff] %v5248_v61  ;;  %v4057_v23 = vpack.i.bf16 %v5250_v5, %v5248_v61 }
 0x1cd   : > { %v5235_v52 = vmax.f32 %v4973_v39, %v4021_v19  ;;  %v5238_v48 = vmax.f32 %v4983_v49, %v4020_v11  ;;  %8556 = vst [vmem:[#allocation8_spill] sm:$0xff] %v5250_v5  ;;  %v826_v39 = vpop.f32.mrf.mxu1  ;;  %v1123_v49 = vpop.permute.xlu2 %1122 }
 0x1ce   : > { %1126 = vrot.lane.b32.xlu0 %v5232_v22, %s4405_s6  ;;  %v5255_v18 = vmax.f32 %v5032_v25, %v1123_v49  ;;  %v5274_v58 = vadd.f32 %v826_v39, %v738_v29  ;;  %v1010_v29 = vpop.f32.mrf.mxu3 }
 0x1cf   : > { %v1306_v31 = vmax.f32 %v5238_v48, %v5235_v52  ;;  %v1308_v33 = vmax.f32 %v5235_v52, %v5148_v3 }
 0x1d1   : > { %757 = vmatmul.f32.gmra.mxu0 %v580_v26  ;;  %935 = vmatmul.f32.gmra.mxu2 %v580_v26  ;;  %v740_v26 = vpop.f32.mrf.mxu0 }
 0x1d2   : > { %v4024_v32 = vpop.permute.xlu0 %4023 }
 0x1d3   : > { %v4044_v63 = vpop.permute.xlu1 %4043  ;;  %v4026_v41 = vunpack.i.h.bf16 %v4024_v32  ;;  %v4025_v42 = vunpack.i.l.bf16 %v4024_v32 }
 0x1d4   : > { %v4046_v2 = vunpack.i.h.bf16 %v4044_v63  ;;  %v4045_v15 = vunpack.i.l.bf16 %v4044_v63 }
 0x1d5   : > { %v1186_v36 = vsel %vm1184_vm6, %v4026_v41, %v4021_v19  ;;  %v1185_v7 = vsel %vm1184_vm6, %v4025_v42, %v4020_v11  ;;  %v921_v42 = vpop.f32.mrf.mxu2 }
 0x1d6   : > { %v5261_v40 = vmax.f32 %v5016_v51, %v4046_v2  ;;  %v1192_v37 = vsel %vm1184_vm6, %v4045_v15, %v4046_v2  ;;  %v1259_v16 = vmax.f32 %v5004_v17, %v1186_v36  ;;  %v1257_v24 = vmax.f32 %v5014_v43, %v1185_v7  ;;  %4058 = vrot.lane.b32.xlu0 %v4057_v23, %s4406_s16  ;;  %v829_v17 = vpop.f32.mrf.mxu1 }
 0x1d7   : > { %v1271_v51 = vmax.f32 %v5007_v20, %v1192_v37  ;;  %v4030_v43 = vunpack.i.l.bf16 %v5228_v1  ;;  %v741_v20 = vadd.f32 %v740_v26, %v4900_v10  ;;  %v4040_v23 = vunpack.i.l.bf16 %v5221_v0 }
 0x1d8   : > { %v5271_v11 = vmax.f32 %v1257_v24, %v1259_v16  ;;  %v1307_v39 = vmax.f32 %v1259_v16, %v5176_v30 }
 0x1d9   : > { %v1317_v15 = vmax.f32 %v1269_v28, %v1271_v51  ;;  %v743_v7 = vpop.f32.mrf.mxu0  ;;  %v4031_v28 = vunpack.i.h.bf16 %v5228_v1  ;;  %v5297_v24 = vadd.f32 %v829_v17, %v741_v20 }
 0x1da   : > { %8557 = vst [vmem:[#allocation9_spill] sm:$0xff] %v5271_v11  ;;  %v8416_v32 = vmax.f32 %v5271_v11, 0.0  ;;  %v5299_v26 = vmax.f32 %v1307_v39, 0.0  ;;  %v744_v1 = vadd.f32 %v743_v7, %v4900_v10  ;;  %v1013_v7 = vpop.f32.mrf.mxu3 }
 0x1db   : > { %v1121_v63 = vpop.permute.xlu1 %1120  ;;  %v5292_v37 = vmax.f32 %v1317_v15, 0.0  ;;  %v507_v17 = vsel %vm485_vm2, %v4852_v46, %v4031_v28  ;;  %v922_v15 = vadd.f32 %v921_v42, %v4902_v59 }
 0x1dc   : > { %v1193_v41 = vsel %vm1184_vm6, %v1121_v63, %v1123_v49  ;;  %2302 = vmatmul.f32.vlgmr.msrb.gmra.mxu1 %v8416_v32  ;;  %v506_v49 = vsel %vm485_vm2, %v4799_v57, %v4030_v43  ;;  %8560 = vst [vmem:[#allocation12_spill] sm:$0xff] %v5299_v26  ;;  %v4041_v43 = vunpack.i.h.bf16 %v5221_v0 }
 0x1dd   : > { %v5282_v2 = vmax.f32 %v5034_v35, %v1193_v41  ;;  %8558 = vst [vmem:[#allocation10_spill] sm:$0xff] %v5292_v37  ;;  %v924_v20 = vpop.f32.mrf.mxu2 }
 0x1de   : > { %1136 = vrot.lane.b32.xlu0 %v5274_v58, %s4405_s6  ;;  %v832_v63 = vpop.f32.mrf.mxu1  ;;  %v925_v42 = vadd.f32 %v924_v20, %v4902_v59 }
 0x1df   : > { %v1319_v36 = vmax.f32 %v1271_v51, %v5282_v2  ;;  %v531_v51 = vsel %vm510_vm3, %v506_v49, %v4040_v23  ;;  %v5319_v23 = vadd.f32 %v832_v63, %v744_v1  ;;  %v5322_v49 = vadd.f32 %v1010_v29, %v922_v15  ;;  %v2015_v1 = vld [vmem:[%s8414_s1 + $0x320] sm:$0xff]  ;;  %v2009_v15 = vld [vmem:[%s8414_s1 + $0x2f0] sm:$0xff] }
 0x1e0   : > { %v5336_v63 = vadd.f32 %v1013_v7, %v925_v42  ;;  %2341 = vmatpush.msrb.mxu3 %v2015_v1  ;;  %v1991_v1 = vld [vmem:[%s8414_s1 + $0x260] sm:$0xff] }
 0x1e1   : > { %v5294_v35 = vmax.f32 %v1319_v36, 0.0  ;;  %v532_v36 = vsel %vm510_vm3, %v507_v17, %v4041_v43  ;;  %v746_v46 = vpop.f32.mrf.mxu0  ;;  %v2013_v17 = vld [vmem:[%s8414_s1 + $0x310] sm:$0xff] }
 0x1e2   : > { %v1016_v43 = vpop.f32.mrf.mxu3  ;;  %2342 = vmatpush.msrb.mxu3 %v2013_v17 }
 0x1e3   : > { %8559 = vst [vmem:[#allocation11_spill] sm:$0xff] %v5294_v35  ;;  %v4049_v30 = vpop.permute.xlu1 %4048  ;;  %v5303_v16 = vpack.i.bf16 %v5294_v35, %v5292_v37 }
 0x1e4   : > { %v4050_v57 = vunpack.i.l.bf16 %v4049_v30  ;;  %2305 = vmatmul.f32.gmra.mxu1 %v5299_v26  ;;  %v4051_v0 = vunpack.i.h.bf16 %v4049_v30 }
 0x1e5   : > { %4063 = vrot.lane.b32.xlu2 %v5303_v16, %s4406_s16 }
 0x1e6   : > { %1140 = vrot.lane.b32.xlu0 %v5297_v24, %s4405_s6  ;;  %v556_v41 = vsel %vm535_vm4, %v531_v51, %v4050_v57  ;;  %v557_v28 = vsel %vm535_vm4, %v532_v36, %v4051_v0  ;;  %v835_v30 = vpop.f32.mrf.mxu1  ;;  %v927_v51 = vpop.f32.mrf.mxu2  ;;  %v2007_v0 = vld [vmem:[%s8414_s1 + $0x2e0] sm:$0xff]  ;;  %v2005_v36 = vld [vmem:[%s8414_s1 + $0x2d0] sm:$0xff] }
 0x1e7   : > { %v581_v39 = vsel %vm560_vm5, %v556_v41, %v5083_v55  ;;  %v747_v55 = vadd.f32 %v746_v46, %v4900_v10  ;;  %v582_v29 = vsel %vm560_vm5, %v557_v28, %v5094_v45  ;;  %v928_v45 = vadd.f32 %v927_v51, %v4902_v59  ;;  %v2011_v41 = vld [vmem:[%s8414_s1 + $0x300] sm:$0xff] }
 0x1e8   : > { %760 = vmatmul.f32.gmra.mxu0 %v581_v39  ;;  %938 = vmatmul.f32.gmra.mxu2 %v581_v39  ;;  %v2003_v28 = vld [vmem:[%s8414_s1 + $0x2c0] sm:$0xff] }
 0x1e9   : > { %v5334_v57 = vadd.f32 %v835_v30, %v747_v55  ;;  %v5356_v20 = vadd.f32 %v1016_v43, %v928_v45  ;;  %2343 = vmatpush.msrb.mxu3 %v2011_v41  ;;  %v2001_v55 = vld [vmem:[%s8414_s1 + $0x2b0] sm:$0xff]  ;;  %v1999_v30 = vld [vmem:[%s8414_s1 + $0x2a0] sm:$0xff] }
 0x1ea   : > { %v1019_v7 = vpop.f32.mrf.mxu3  ;;  %v1995_v51 = vld [vmem:[%s8414_s1 + $0x280] sm:$0xff]  ;;  %v1993_v43 = vld [vmem:[%s8414_s1 + $0x270] sm:$0xff] }
 0x1eb   : > { %2344 = vmatpush.msrb.mxu3 %v2009_v15  ;;  %v1989_v45 = vld [vmem:[%s8414_s1 + $0x250] sm:$0xff]  ;;  %v1987_v15 = vld [vmem:[%s8414_s1 + $0x240] sm:$0xff] }
 0x1ec   : > { %2307 = vmatmul.f32.gmra.mxu1 %v5194_v9 }
 0x1ed   : > { %1144 = vrot.lane.b32.xlu2 %v5319_v23, %s4405_s6  ;;  %2345 = vmatpush.msrb.mxu3 %v2007_v0 }
 0x1ee   : > { %1146 = vrot.lane.b32.xlu0 %v5322_v49, %s4405_s6  ;;  %v930_v39 = vpop.f32.mrf.mxu2  ;;  %v838_v17 = vpop.f32.mrf.mxu1 }
 0x1ef   : > { %v931_v46 = vadd.f32 %v930_v39, %v4902_v59  ;;  %2346 = vmatpush.msrb.mxu3 %v2005_v36  ;;  %v1985_v39 = vld [vmem:[%s8414_s1 + $0x230] sm:$0xff] }
 0x1f0   : > { %763 = vmatmul.f32.gmra.mxu0 %v582_v29  ;;  %941 = vmatmul.f32.gmra.mxu2 %v582_v29  ;;  %v1997_v29 = vld [vmem:[%s8414_s1 + $0x290] sm:$0xff] }
 0x1f1   : > { %v5374_v42 = vadd.f32 %v1019_v7, %v931_v46  ;;  %2347 = vmatpush.msrb.mxu3 %v2003_v28  ;;  %v1125_v7 = vpop.permute.xlu2 %1124 }
 0x1f3   : > { %2348 = vmatpush.msrb.mxu3 %v2001_v55  ;;  %v1352_v55 = vmax.f32 %v1306_v31, 0.0 }
 0x1f4   : > { %2310 = vmatmul.f32.gmra.mxu1 %v5196_v14 }
 0x1f5   : > { %1148 = vrot.lane.b32.xlu2 %v5334_v57, %s4405_s6  ;;  %2349 = vmatpush.msrb.mxu3 %v1999_v30 }
 0x1f6   : > { %1150 = vrot.lane.b32.xlu0 %v5336_v63, %s4405_s6  ;;  %v5399_v41 = vpop.f32.mrf.mxu1 }
 0x1f7   : > { %2350 = vmatpush.msrb.mxu3 %v1997_v29 }
 0x1f9   : > { %2351 = vmatpush.msrb.mxu3 %v1995_v51  ;;  %v1129_v51 = vpop.permute.xlu1 %1128 }
 0x1fb   : > { %2352 = vmatpush.msrb.mxu3 %v1993_v43 }
 0x1fc   : > { %2312 = vmatmul.f32.gmra.mxu1 %v5248_v61 }
 0x1fd   : > { %1154 = vrot.lane.b32.xlu2 %v5356_v20, %s4405_s6  ;;  %2353 = vmatpush.msrb.mxu3 %v1991_v1  ;;  %v1131_v1 = vpop.permute.xlu2 %1130 }
 0x1fe   : > { %v5407_v0 = vpop.f32.mrf.mxu1  ;;  %v5430_v48 = vmax.f32 %v5058_v50, %v1131_v1 }
 0x1ff   : > { %2354 = vmatpush.msrb.mxu3 %v1989_v45  ;;  %v1195_v45 = vsel %vm1184_vm6, %v1129_v51, %v1131_v1 }
 0x201   : > { %2355 = vmatpush.msrb.mxu3 %v1987_v15 }
 0x203   : > { %2356 = vmatpush.msrb.mxu3 %v1985_v39 }
 0x204   : > { %2315 = vmatmul.f32.gmra.mxu1 %v5250_v5 }
 0x205   : > { %1158 = vrot.lane.b32.xlu2 %v5374_v42, %s4405_s6 }
 0x206   : > { %v5409_v36 = vpop.f32.mrf.mxu1 }
 0x20c   : > { %2317 = vmatmul.f32.gmra.mxu1 %v5292_v37 }
 0x20e   : > { %v5411_v46 = vpop.f32.mrf.mxu1 }
 0x214   : > { %2320 = vmatmul.f32.gmra.mxu1 %v5294_v35 }
 0x216   : > { %v5425_v43 = vpop.f32.mrf.mxu1 }
 0x21e   : > { %v5452_v52 = vpop.f32.mrf.mxu1 }
 0x21f   : > { %8563 = vst [vmem:[#allocation15_spill] sm:$0xff] %v5452_v52  ;;  %v2111_v52 = vld [vmem:[%s8414_s1 + $0x620] sm:$0xff] }
 0x220   : > { %2506 = vmatpush.msra.mxu1 %v2111_v52 }
 0x228   : > { %v5487_v51 = vpop.f32.mrf.mxu1 }
 0x229   : > { %8565 = vst [vmem:[#allocation17_spill] sm:$0xff] %v5487_v51 }
 0x238   : > { %v5413_v28 = vpop.permute.xlu0 %4053 }
 0x239   : > { %v8417_v30 = vunpack.i.l.bf16 %v5413_v28  ;;  %v8418_v15 = vunpack.i.h.bf16 %v5413_v28 }
 0x23b   : > { %v5422_v29 = vsel %vm1487_vm7, %v1352_v55, %v8417_v30  ;;  %v1354_v55 = vmax.f32 %v1308_v33, 0.0  ;;  %v1277_v30 = vmax.f32 %v5060_v53, %v1195_v45  ;;  %v1133_v53 = vpop.permute.xlu1 %1132  ;;  %v749_v45 = vpop.f32.mrf.mxu0 }
 0x23c   : > { %8561 = vst [vmem:[#allocation13_spill] sm:$0xff] %v5422_v29  ;;  %2357 = vmatmul.f32.vlgmr.msrb.gmra.mxu3 %v5422_v29 }
 0x240   : > { %v1127_v39 = vpop.permute.xlu0 %1126 }
 0x241   : > { %v1194_v31 = vsel %vm1184_vm6, %v1125_v7, %v1127_v39  ;;  %v5434_v32 = vmax.f32 %v5232_v22, %v1127_v39  ;;  %v5448_v7 = vsel %vm1487_vm7, %v1354_v55, %v8418_v15  ;;  %v5471_v55 = vpop.permute.xlu2 %1134  ;;  %v750_v15 = vadd.f32 %v749_v45, %v4900_v10 }
 0x242   : > { %v1275_v19 = vmax.f32 %v5043_v38, %v1194_v31  ;;  %8562 = vst [vmem:[#allocation14_spill] sm:$0xff] %v5448_v7  ;;  %v5499_v45 = vmax.f32 %v1312_v6, 0.0 }
 0x243   : > { %v5489_v50 = vpop.permute.xlu1 %1138  ;;  %v5491_v25 = vadd.f32 %v838_v17, %v750_v15  ;;  %v752_v54 = vpop.f32.mrf.mxu0 }
 0x244   : > { %v1321_v22 = vmax.f32 %v5282_v2, %v1275_v19  ;;  %v1323_v1 = vmax.f32 %v1275_v19, %v1277_v30  ;;  %2360 = vmatmul.f32.gmra.mxu3 %v5448_v7  ;;  %v5469_v2 = vmax.f32 %v1310_v56, 0.0  ;;  %v753_v15 = vadd.f32 %v752_v54, %v4900_v10 }
 0x245   : > { %v8570_v7 = vmax.f32 %v5207_v8, %v5204_v34 }
 0x246   : > { %v5454_v38 = vmax.f32 %v1321_v22, 0.0  ;;  %v5456_v33 = vmax.f32 %v1323_v1, 0.0  ;;  %v1196_v22 = vsel %vm1184_vm6, %v1133_v53, %v5471_v55 }
 0x247   : > { %v1279_v3 = vmax.f32 %v5076_v13, %v1196_v22 }
 0x248   : > { %v5458_v39 = vpop.permute.xlu0 %4058  ;;  %2322 = vmatmul.f32.gmra.mxu1 %v5454_v38  ;;  %v5463_v31 = vpack.i.bf16 %v5456_v33, %v5454_v38 }
 0x249   : > { %v8419_v19 = vunpack.i.l.bf16 %v5458_v39  ;;  %v8420_v56 = vunpack.i.h.bf16 %v5458_v39  ;;  %v1325_v13 = vmax.f32 %v1277_v30, %v1279_v3  ;;  %v5520_v30 = vadd.f32 %v5399_v41, %v753_v15 }
 0x24a   : > { %4068 = vrot.lane.b32.xlu1 %v5463_v31, %s4406_s16 }
 0x24b   : > { %v5481_v1 = vsel %vm1487_vm7, %v5469_v2, %v8419_v19  ;;  %v5508_v17 = vsel %vm1487_vm7, %v5499_v45, %v8420_v56  ;;  %v5514_v62 = vmax.f32 %v1325_v13, 0.0 }
 0x24c   : > { %8564 = vst [vmem:[#allocation16_spill] sm:$0xff] %v5481_v1  ;;  %2362 = vmatmul.f32.gmra.mxu3 %v5481_v1 }
 0x24d   : > { %8566 = vst [vmem:[#allocation18_spill] sm:$0xff] %v5508_v17 }
 0x250   : > { %v1137_v53 = vpop.permute.xlu0 %1136  ;;  %2325 = vmatmul.f32.gmra.mxu1 %v5456_v33 }
 0x251   : > { %v1197_v19 = vsel %vm1184_vm6, %v1137_v53, %v5489_v50  ;;  %v5511_v53 = vpop.permute.xlu2 %4063 }
 0x252   : > { %v1281_v22 = vmax.f32 %v5274_v58, %v1197_v19  ;;  %1152 = vrot.lane.b32.xlu1 %v5491_v25, %s4405_s6  ;;  %v8424_v58 = vunpack.i.l.bf16 %v5511_v53 }
 0x254   : > { %v1327_v47 = vmax.f32 %v1279_v3, %v1281_v22  ;;  %2365 = vmatmul.f32.gmra.mxu3 %v5508_v17  ;;  %v8568_v3 = vmax.f32 %v5183_v60, %v5207_v8 }
 0x256   : > { %v5516_v6 = vmax.f32 %v1327_v47, 0.0  ;;  %v5530_v13 = vmax.f32 %v8568_v3, 0.0  ;;  %v5532_v47 = vpop.permute.xlu1 %1142  ;;  %v8428_v3 = vunpack.i.h.bf16 %v5511_v53 }
 0x258   : > { %v1141_v19 = vpop.permute.xlu0 %1140  ;;  %2327 = vmatmul.f32.gmra.mxu1 %v5514_v62  ;;  %v4072_v54 = vpack.i.bf16 %v5516_v6, %v5514_v62  ;;  %v5543_v15 = vsel %vm1487_vm7, %v5530_v13, %v8424_v58  ;;  %v1362_v58 = vmax.f32 %v8570_v7, 0.0 }
 0x259   : > { %v5525_v56 = vpop.f32.mrf.mxu1  ;;  %v1198_v41 = vsel %vm1184_vm6, %v1141_v19, %v5532_v47  ;;  %8569 = vst [vmem:[#allocation20_spill] sm:$0xff] %v5543_v15 }
 0x25a   : > { %8567 = vst [vmem:[#allocation19_spill] sm:$0xff] %v5525_v56  ;;  %1156 = vrot.lane.b32.xlu1 %v5520_v30, %s4405_s6  ;;  %4073 = vrot.lane.b32.xlu0 %v4072_v54, %s4406_s16  ;;  %v1283_v60 = vmax.f32 %v5297_v24, %v1198_v41  ;;  %v1145_v56 = vpop.permute.xlu2 %1144  ;;  %v5560_v41 = vsel %vm1487_vm7, %v1362_v58, %v8428_v3 }
 0x25b   : > { %8571 = vst [vmem:[#allocation21_spill] sm:$0xff] %v5560_v41 }
 0x25c   : > { %2367 = vmatmul.f32.gmra.mxu3 %v5543_v15  ;;  %v1329_v29 = vmax.f32 %v1281_v22, %v1283_v60 }
 0x25e   : > { %v5563_v14 = vmax.f32 %v1329_v29, 0.0 }
 0x260   : > { %v5548_v17 = vpop.permute.xlu0 %1146  ;;  %2330 = vmatmul.f32.gmra.mxu1 %v5516_v6 }
 0x261   : > { %v1199_v19 = vsel %vm1184_vm6, %v1145_v56, %v5548_v17  ;;  %v2306_v1 = vpop.f32.mrf.mxu1 }
 0x262   : > { %v1285_v24 = vmax.f32 %v5319_v23, %v1199_v19  ;;  %v1149_v7 = vpop.permute.xlu2 %1148 }
 0x264   : > { %v1331_v15 = vmax.f32 %v1283_v60, %v1285_v24  ;;  %2370 = vmatmul.f32.gmra.mxu3 %v5560_v41  ;;  %v4333_v60 = vld [vmem:[%s4481_s25 + $0xc0] sm:$0xff] }
 0x266   : > { %v5565_v1 = vmax.f32 %v1331_v15, 0.0  ;;  %v5581_v15 = vld [vmem:[%s4481_s25 + $0xc8] sm:$0xff] }
 0x267   : > { %v4087_v19 = vpack.i.bf16 %v5581_v15, %v4333_v60 }
 0x268   : > { %8572 = vst [vmem:[#allocation22_spill] sm:$0xff] %v5565_v1  ;;  %v5567_v56 = vpop.permute.xlu0 %1150  ;;  %2332 = vmatmul.f32.gmra.mxu1 %v5563_v14  ;;  %v4077_v8 = vpack.i.bf16 %v5565_v1, %v5563_v14 }
 0x269   : > { %v5572_v23 = vpop.f32.mrf.mxu1  ;;  %v1200_v22 = vsel %vm1184_vm6, %v1149_v7, %v5567_v56 }
 0x26a   : > { %8573 = vst [vmem:[#allocation23_spill] sm:$0xff] %v5572_v23  ;;  %4078 = vrot.lane.b32.xlu0 %v4077_v8, %s4406_s16  ;;  %v5578_v29 = vmax.f32 %v5334_v57, %v1200_v22  ;;  %v4107_v57 = vpack.i.bf16 %v5530_v13, %v5248_v61  ;;  %v4122_v22 = vpack.i.bf16 %v1362_v58, %v5250_v5 }
 0x26c   : > { %v1333_v41 = vmax.f32 %v1285_v24, %v5578_v29 }
 0x26e   : > { %v5588_v23 = vmax.f32 %v1333_v41, 0.0  ;;  %v5603_v41 = vpop.f32.mrf.mxu3 }
 0x270   : > { %2335 = vmatmul.f32.gmra.mxu1 %v5565_v1 }
 0x271   : > { %v2311_v3 = vpop.f32.mrf.mxu1 }
 0x272   : > { %4088 = vrot.lane.b32.xlu0 %v4087_v19, %s4404_s29  ;;  %v8575_v3 = vmax.f32 %v5204_v34, %v5261_v40  ;;  %s4408_s29 = smov 50   ;;  %v5613_v34 = vpop.f32.mrf.mxu2 }
 0x274   : > { %v5601_v24 = vmax.f32 %v8575_v3, 0.0 }
 0x276   : > { %v4137_v19 = vpack.i.bf16 %v5601_v24, %v1362_v58 }
 0x278   : > { %2337 = vmatmul.f32.gmra.mxu1 %v5588_v23 }
 0x279   : > { %v5593_v7 = vpop.f32.mrf.mxu1 }
 0x27a   : > { %8574 = vst [vmem:[#allocation24_spill] sm:$0xff] %v5593_v7  ;;  %4108 = vrot.lane.b32.xlu0 %v4107_v57, %s4407_s3  ;;  %v5609_v7 = vpop.f32.mrf.mxu3 }
 0x281   : > { %v2316_v9 = vpop.f32.mrf.mxu1 }
 0x282   : > { %4123 = vrot.lane.b32.xlu0 %v4122_v22, %s4407_s3  ;;  %v755_v9 = vpop.f32.mrf.mxu0  ;;  %v1028_v58 = vpop.f32.mrf.mxu3 }
 0x283   : > { %v756_v22 = vadd.f32 %v755_v9, %v4900_v10 }
 0x285   : > { %v5616_v3 = vadd.f32 %v5407_v0, %v756_v22  ;;  %v8577_v0 = vmax.f32 %v5434_v32, %v5430_v48 }
 0x287   : > { %v5634_v22 = vmax.f32 %v8577_v0, 0.0 }
 0x289   : > { %v5606_v61 = vpop.f32.mrf.mxu1 }
 0x28a   : > { %8576 = vst [vmem:[#allocation25_spill] sm:$0xff] %v5606_v61  ;;  %4138 = vrot.lane.b32.xlu0 %v4137_v19, %s4406_s16  ;;  %v5620_v19 = vpop.f32.mrf.mxu0  ;;  %v5636_v61 = vpop.f32.mrf.mxu3 }
 0x291   : > { %v2321_v57 = vpop.f32.mrf.mxu1 }
 0x292   : > { %4153 = vrot.lane.b32.xlu0 %v4072_v54, %s4408_s29  ;;  %v5624_v57 = vmax.f32 %v5074_v12, %v5471_v55  ;;  %v5626_v54 = vpop.f32.mrf.mxu2  ;;  %v5640_v26 = vpop.f32.mrf.mxu0 }
 0x293   : > { %v5649_v11 = vpop.f32.mrf.mxu3 }
 0x294   : > { %v1326_v9 = vmax.f32 %v5430_v48, %v5624_v57  ;;  %8579 = vst [vmem:[#allocation27_spill] sm:$0xff] %v5649_v11  ;;  %v5652_v48 = vld [vmem:[%s4481_s25 + $0xb8] sm:$0xff] }
 0x295   : > { %v4082_v0 = vpack.i.bf16 %v4333_v60, %v5652_v48  ;;  %v1286_v60 = vmax.f32 %v5322_v49, %v5548_v17  ;;  %v2103_v17 = vld [vmem:[%s8414_s1 + $0x5e0] sm:$0xff] }
 0x296   : > { %v5638_v5 = vmax.f32 %v1326_v9, 0.0 }
 0x297   : > { %4083 = vrot.lane.b32.xlu2 %v4082_v0, %s4403_s28 }
 0x298   : > { %v5644_v12 = vpack.i.bf16 %v5638_v5, %v5634_v22 }
 0x29a   : > { %1160 = vrot.lane.b32.xlu0 %v5616_v3, %s4405_s6  ;;  %8578 = vst [vmem:[#allocation26_spill] sm:$0xff] %v5644_v12  ;;  %v939_v55 = vpop.f32.mrf.mxu2  ;;  %v764_v51 = vpop.f32.mrf.mxu0 }
 0x29b   : > { %v765_v0 = vadd.f32 %v764_v51, %v4900_v10  ;;  %v5676_v52 = vpop.f32.mrf.mxu3 }
 0x29c   : > { %8581 = vst [vmem:[#allocation29_spill] sm:$0xff] %v5676_v52 }
 0x29d   : > { %v5683_v51 = vadd.f32 %v5425_v43, %v765_v0  ;;  %v2099_v0 = vld [vmem:[%s8414_s1 + $0x5c0] sm:$0xff] }
 0x29f   : > { %8582 = vst [vmem:[#allocation30_spill] sm:$0xff] %v5683_v51 }
 0x2a2   : > { %4173 = vrot.lane.b32.xlu0 %v4077_v8, %s4408_s29  ;;  %v940_v8 = vadd.f32 %v939_v55, %v4902_v59  ;;  %v2109_v55 = vld [vmem:[%s8414_s1 + $0x610] sm:$0xff] }
 0x2a3   : > { %2507 = vmatpush.msra.mxu1 %v2109_v55  ;;  %v5697_v55 = vmax.f32 %v5336_v63, %v5567_v56  ;;  %v2097_v63 = vld [vmem:[%s8414_s1 + $0x5b0] sm:$0xff] }
 0x2a4   : > { %v5656_v9 = vadd.f32 %v1028_v58, %v940_v8  ;;  %v2107_v58 = vld [vmem:[%s8414_s1 + $0x600] sm:$0xff]  ;;  %v5674_v8 = vmax.f32 %v5100_v27, %v5532_v47  ;;  %v2101_v27 = vld [vmem:[%s8414_s1 + $0x5d0] sm:$0xff] }
 0x2a5   : > { %2508 = vmatpush.msra.mxu1 %v2107_v58  ;;  %v1334_v56 = vmax.f32 %v1286_v60, %v5697_v55 }
 0x2a6   : > { %8580 = vst [vmem:[#allocation28_spill] sm:$0xff] %v5656_v9  ;;  %v1332_v49 = vmax.f32 %v5674_v8, %v1286_v60 }
 0x2a8   : > { %v5693_v47 = vmax.f32 %v1332_v49, 0.0 }
 0x2aa   : > { %4178 = vrot.lane.b32.xlu0 %v5644_v12, %s4406_s16  ;;  %v2083_v12 = vld [vmem:[%s8414_s1 + $0x540] sm:$0xff] }
 0x2b2   : > { %1170 = vrot.lane.b32.xlu0 %v5656_v9, %s4405_s6  ;;  %v2105_v9 = vld [vmem:[%s8414_s1 + $0x5f0] sm:$0xff] }
 0x2b3   : > { %2509 = vmatpush.msra.mxu1 %v2105_v9 }
 0x2b5   : > { %2510 = vmatpush.msra.mxu1 %v2103_v17  ;;  %v4202_v17 = vpack.i.bf16 %v5693_v47, %v5565_v1 }
 0x2b7   : > { %2511 = vmatpush.msra.mxu1 %v2101_v27  ;;  %v2095_v27 = vld [vmem:[%s8414_s1 + $0x5a0] sm:$0xff] }
 0x2b9   : > { %2512 = vmatpush.msra.mxu1 %v2099_v0  ;;  %v5723_v0 = vpop.permute.xlu2 %1154 }
 0x2ba   : > { %1172 = vrot.lane.b32.xlu0 %v5683_v51, %s4405_s6 }
 0x2bb   : > { %2513 = vmatpush.msra.mxu1 %v2097_v63  ;;  %v8585_v63 = vmax.f32 %v5261_v40, %v5255_v18 }
 0x2bc   : > { %v5699_v43 = vpop.permute.xlu1 %4068 }
 0x2bd   : > { %v8436_v9 = vunpack.i.l.bf16 %v5699_v43  ;;  %2514 = vmatpush.msra.mxu1 %v2095_v27  ;;  %v8440_v60 = vunpack.i.h.bf16 %v5699_v43  ;;  %v5735_v52 = vmax.f32 %v8585_v63, 0.0 }
 0x2bf   : > { %v5705_v58 = vpop.f32.mrf.mxu3  ;;  %v5711_v49 = vsel %vm1487_vm7, %v5601_v24, %v8436_v9  ;;  %v2093_v9 = vld [vmem:[%s8414_s1 + $0x590] sm:$0xff]  ;;  %v5749_v40 = vsel %vm1487_vm7, %v5735_v52, %v8440_v60 }
 0x2c0   : > { %8583 = vst [vmem:[#allocation31_spill] sm:$0xff] %v5705_v58  ;;  %2372 = vmatmul.f32.gmra.mxu3 %v5711_v49  ;;  %v5730_v58 = vmax.f32 %v1334_v56, 0.0  ;;  %2515 = vmatpush.msra.mxu1 %v2093_v9  ;;  %v2089_v9 = vld [vmem:[%s8414_s1 + $0x570] sm:$0xff] }
 0x2c1   : > { %8584 = vst [vmem:[#allocation32_spill] sm:$0xff] %v5711_v49 }
 0x2c2   : > { %4203 = vrot.lane.b32.xlu0 %v4202_v17, %s4407_s3  ;;  %v2091_v17 = vld [vmem:[%s8414_s1 + $0x580] sm:$0xff]  ;;  %8587 = vst [vmem:[#allocation34_spill] sm:$0xff] %v5749_v40  ;;  %v5758_v63 = vpack.i.bf16 %v5730_v58, %v5693_v47 }
 0x2c3   : > { %2516 = vmatpush.msra.mxu1 %v2091_v17 }
 0x2c4   : > { %v1153_v49 = vpop.permute.xlu1 %1152  ;;  %8588 = vst [vmem:[#allocation35_spill] sm:$0xff] %v5758_v63 }
 0x2c5   : > { %v1201_v11 = vsel %vm1184_vm6, %v1153_v49, %v5723_v0  ;;  %v5739_v1 = vpop.f32.mrf.mxu1  ;;  %2517 = vmatpush.msra.mxu1 %v2089_v9 }
 0x2c6   : > { %8586 = vst [vmem:[#allocation33_spill] sm:$0xff] %v5739_v1  ;;  %v1289_v27 = vmax.f32 %v5491_v25, %v1201_v11  ;;  %v2087_v25 = vld [vmem:[%s8414_s1 + $0x560] sm:$0xff]  ;;  %v2085_v11 = vld [vmem:[%s8414_s1 + $0x550] sm:$0xff]  ;;  %v8589_v1 = vmax.f32 %v5255_v18, %v5434_v32 }
 0x2c7   : > { %v2361_v56 = vpop.f32.mrf.mxu3  ;;  %2518 = vmatpush.msra.mxu1 %v2087_v25  ;;  %v2081_v18 = vld [vmem:[%s8414_s1 + $0x530] sm:$0xff] }
 0x2c8   : > { %v1335_v49 = vmax.f32 %v5578_v29, %v1289_v27  ;;  %2375 = vmatmul.f32.gmra.mxu3 %v5749_v40  ;;  %v5770_v29 = vpop.permute.xlu2 %1158 }
 0x2c9   : > { %2519 = vmatpush.msra.mxu1 %v2085_v11 }
 0x2ca   : > { %v5766_v17 = vmax.f32 %v1335_v49, 0.0  ;;  %4218 = vrot.lane.b32.xlu0 %v5758_v63, %s4406_s16  ;;  %v5781_v49 = vmax.f32 %v8589_v1, 0.0 }
 0x2cb   : > { %2520 = vmatpush.msra.mxu1 %v2083_v12 }
 0x2cc   : > { %v1157_v56 = vpop.permute.xlu1 %1156  ;;  %v5772_v60 = vpop.permute.xlu0 %4073  ;;  %v5776_v9 = vpack.i.bf16 %v5766_v17, %v5588_v23 }
 0x2cd   : > { %v1202_v40 = vsel %vm1184_vm6, %v1157_v56, %v5770_v29  ;;  %v8448_v25 = vunpack.i.l.bf16 %v5772_v60  ;;  %v2326_v63 = vpop.f32.mrf.mxu1  ;;  %2521 = vmatpush.msra.mxu1 %v2081_v18  ;;  %v8446_v11 = vunpack.i.h.bf16 %v5772_v60 }
 0x2ce   : > { %v5790_v51 = vmax.f32 %v5520_v30, %v1202_v40  ;;  %4093 = vrot.lane.b32.xlu1 %v5776_v9, %s4406_s16  ;;  %v4335_v30 = vld [vmem:[%s4481_s25 + $0xd0] sm:$0xff] }
 0x2cf   : > { %v5797_v32 = vpop.f32.mrf.mxu3  ;;  %v5803_v1 = vsel %vm1487_vm7, %v5781_v49, %v8448_v25  ;;  %v4097_v12 = vpack.i.bf16 %v4335_v30, %v5581_v15  ;;  %v5822_v18 = vsel %vm1487_vm7, %v5634_v22, %v8446_v11  ;;  %v4142_v11 = vpack.i.bf16 %v5735_v52, %v5294_v35 }
 0x2d0   : > { %8590 = vst [vmem:[#allocation36_spill] sm:$0xff] %v5797_v32  ;;  %v1337_v63 = vmax.f32 %v1289_v27, %v5790_v51  ;;  %2377 = vmatmul.f32.gmra.mxu3 %v5803_v1 }
 0x2d1   : > { %8591 = vst [vmem:[#allocation37_spill] sm:$0xff] %v5803_v1 }
 0x2d2   : > { %v5809_v40 = vmax.f32 %v1337_v63, 0.0  ;;  %8593 = vst [vmem:[#allocation39_spill] sm:$0xff] %v5822_v18  ;;  %v5831_v63 = vmax.f32 %v5089_v21, %v5489_v50 }
 0x2d4   : > { %v4102_v56 = vpack.i.bf16 %v5469_v2, %v5809_v40  ;;  %v4117_v2 = vpack.i.bf16 %v5530_v13, %v5499_v45  ;;  %v1328_v21 = vmax.f32 %v5624_v57, %v5831_v63 }
 0x2d5   : > { %v5814_v32 = vpop.f32.mrf.mxu1 }
 0x2d6   : > { %8592 = vst [vmem:[#allocation38_spill] sm:$0xff] %v5814_v32  ;;  %4103 = vrot.lane.b32.xlu2 %v4102_v56, %s4406_s16  ;;  %4098 = vrot.lane.b32.xlu1 %v4097_v12, %s4402_s27  ;;  %v5853_v13 = vmax.f32 %v1328_v21, 0.0  ;;  %v4147_v21 = vpack.i.bf16 %v5781_v49, %v5454_v38  ;;  %v4162_v32 = vpack.i.bf16 %v5634_v22, %v5456_v33 }
 0x2d7   : > { %v2366_v27 = vpop.f32.mrf.mxu3 }
 0x2d8   : > { %2380 = vmatmul.f32.gmra.mxu3 %v5822_v18 }
 0x2dc   : > { %v5825_v15 = vpop.permute.xlu0 %4078 }
 0x2dd   : > { %v8445_v30 = vunpack.i.l.bf16 %v5825_v15  ;;  %v2331_v12 = vpop.f32.mrf.mxu1  ;;  %v8447_v50 = vunpack.i.h.bf16 %v5825_v15 }
 0x2de   : > { %4118 = vrot.lane.b32.xlu2 %v4117_v2, %s4406_s16  ;;  %4113 = vrot.lane.b32.xlu1 %v5303_v16, %s4408_s29  ;;  %v4127_v16 = vpack.i.bf16 %v5601_v24, %v5292_v37 }
 0x2df   : > { %v5837_v56 = vpop.f32.mrf.mxu3  ;;  %v5843_v27 = vsel %vm1487_vm7, %v5638_v5, %v8445_v30  ;;  %v5864_v57 = vsel %vm1487_vm7, %v5853_v13, %v8447_v50 }
 0x2e0   : > { %8594 = vst [vmem:[#allocation40_spill] sm:$0xff] %v5837_v56  ;;  %2382 = vmatmul.f32.gmra.mxu3 %v5843_v27 }
 0x2e1   : > { %8595 = vst [vmem:[#allocation41_spill] sm:$0xff] %v5843_v27 }
 0x2e2   : > { %8597 = vst [vmem:[#allocation43_spill] sm:$0xff] %v5864_v57 }
 0x2e4   : > { %v5849_v45 = vpop.permute.xlu0 %4088 }
 0x2e5   : > { %v5855_v2 = vpop.f32.mrf.mxu1 }
 0x2e6   : > { %8596 = vst [vmem:[#allocation42_spill] sm:$0xff] %v5855_v2  ;;  %4133 = vrot.lane.b32.xlu2 %v5463_v31, %s4408_s29  ;;  %4128 = vrot.lane.b32.xlu1 %v4127_v16, %s4407_s3 }
 0x2e7   : > { %v2371_v12 = vpop.f32.mrf.mxu3 }
 0x2e8   : > { %2385 = vmatmul.f32.gmra.mxu3 %v5864_v57 }
 0x2ec   : > { %v5867_v30 = vpop.permute.xlu0 %4108 }
 0x2ed   : > { %v8450_v31 = vunpack.i.h.bf16 %v5867_v30  ;;  %v8449_v16 = vunpack.i.l.bf16 %v5867_v30  ;;  %v2336_v12 = vpop.f32.mrf.mxu1 }
 0x2ee   : > { %4148 = vrot.lane.b32.xlu2 %v4147_v21, %s4407_s3  ;;  %4143 = vrot.lane.b32.xlu1 %v4142_v11, %s4407_s3  ;;  %v5891_v12 = vpack.i.bf16 %v5781_v49, %v5735_v52  ;;  %v934_v52 = vadd.f32 %v5613_v34, %v4902_v59  ;;  %v759_v34 = vadd.f32 %v5620_v19, %v4900_v10 }
 0x2ef   : > { %v5882_v50 = vsel %vm1612_vm8, %v8449_v16, %v8450_v31  ;;  %v762_v19 = vadd.f32 %v5640_v26, %v4900_v10  ;;  %v2045_v26 = vld [vmem:[%s8414_s1 + $0x410] sm:$0xff] }
 0x2f0   : > { %8598 = vst [vmem:[#allocation44_spill] sm:$0xff] %v5882_v50  ;;  %2522 = vmatmul.f32.vlgmr.msra.gmra.mxu1 %v5882_v50  ;;  %v5909_v31 = vadd.f32 %v5603_v41, %v934_v52  ;;  %v937_v41 = vadd.f32 %v5626_v54, %v4902_v59  ;;  %v5924_v52 = vadd.f32 %v5409_v36, %v759_v34 }
 0x2f1   : > { %v5939_v36 = vadd.f32 %v5411_v46, %v762_v19  ;;  %v1330_v54 = vmax.f32 %v5831_v63, %v5674_v8  ;;  %v942_v63 = vpop.f32.mrf.mxu2 }
 0x2f2   : > { %v943_v34 = vadd.f32 %v942_v63, %v4902_v59  ;;  %v2041_v63 = vld [vmem:[%s8414_s1 + $0x3f0] sm:$0xff] }
 0x2f3   : > { %v5954_v46 = vmax.f32 %v1330_v54, 0.0  ;;  %v2139_v54 = vld [vmem:[%s8414_s1 + $0x700] sm:$0xff] }
 0x2f4   : > { %v5885_v25 = vpop.permute.xlu0 %4123 }
 0x2f5   : > { %v8452_v11 = vunpack.i.h.bf16 %v5885_v25  ;;  %v8451_v21 = vunpack.i.l.bf16 %v5885_v25  ;;  %v4187_v8 = vpack.i.bf16 %v5954_v46, %v5563_v14  ;;  %v5970_v19 = vpack.i.bf16 %v5954_v46, %v5853_v13  ;;  %v6249_v37 = vpop.f32.mrf.mxu1 }
 0x2f6   : > { %4163 = vrot.lane.b32.xlu2 %v4162_v32, %s4407_s3  ;;  %4158 = vrot.lane.b32.xlu1 %v5891_v12, %s4406_s16  ;;  %v4167_v32 = vpack.i.bf16 %v5638_v5, %v5514_v62  ;;  %8620 = vst [vmem:[#allocation60_spill] sm:$0xff] %v6249_v37 }
 0x2f7   : > { %v5903_v16 = vsel %vm1612_vm8, %v8451_v21, %v8452_v11  ;;  %v2079_v21 = vld [vmem:[%s8414_s1 + $0x520] sm:$0xff]  ;;  %v5927_v11 = vadd.f32 %v5609_v7, %v937_v41  ;;  %v4182_v7 = vpack.i.bf16 %v5853_v13, %v5516_v6 }
 0x2f8   : > { %8599 = vst [vmem:[#allocation45_spill] sm:$0xff] %v5903_v16  ;;  %2525 = vmatmul.f32.gmra.mxu1 %v5903_v16  ;;  %2451 = vmatpush.msrb.mxu2 %v2079_v21  ;;  %v2047_v21 = vld [vmem:[%s8414_s1 + $0x420] sm:$0xff] }
 0x2f9   : > { %2396 = vmatpush.msrb.mxu0 %v2047_v21  ;;  %v2075_v41 = vld [vmem:[%s8414_s1 + $0x500] sm:$0xff]  ;;  %v5966_v21 = vadd.f32 %v5636_v61, %v943_v34  ;;  %v2141_v61 = vld [vmem:[%s8414_s1 + $0x710] sm:$0xff] }
 0x2fa   : > { %v2073_v34 = vld [vmem:[%s8414_s1 + $0x4f0] sm:$0xff] }
 0x2fb   : > { %2397 = vmatpush.msrb.mxu0 %v2045_v26  ;;  %v1290_v26 = vmax.f32 %v5356_v20, %v5723_v0  ;;  %v2039_v20 = vld [vmem:[%s8414_s1 + $0x3e0] sm:$0xff] }
 0x2fc   : > { %v2071_v0 = vld [vmem:[%s8414_s1 + $0x4e0] sm:$0xff] }
 0x2fe   : > { %4168 = vrot.lane.b32.xlu2 %v4167_v32, %s4407_s3  ;;  %1162 = vrot.lane.b32.xlu1 %v5909_v31, %s4405_s6  ;;  %v2077_v32 = vld [vmem:[%s8414_s1 + $0x510] sm:$0xff] }
 0x2ff   : > { %2452 = vmatpush.msrb.mxu2 %v2077_v32  ;;  %v2137_v32 = vld [vmem:[%s8414_s1 + $0x6f0] sm:$0xff] }
 0x301   : > { %2453 = vmatpush.msrb.mxu2 %v2075_v41  ;;  %v2135_v41 = vld [vmem:[%s8414_s1 + $0x6e0] sm:$0xff] }
 0x303   : > { %2454 = vmatpush.msrb.mxu2 %v2073_v34  ;;  %v6034_v34 = vmax.f32 %v5374_v42, %v5770_v29  ;;  %v2065_v42 = vld [vmem:[%s8414_s1 + $0x4b0] sm:$0xff]  ;;  %v2127_v29 = vld [vmem:[%s8414_s1 + $0x6a0] sm:$0xff] }
 0x305   : > { %2455 = vmatpush.msrb.mxu2 %v2071_v0 }
 0x306   : > { %1166 = vrot.lane.b32.xlu2 %v5927_v11, %s4405_s6  ;;  %1164 = vrot.lane.b32.xlu1 %v5924_v52, %s4405_s6 }
 0x30e   : > { %1168 = vrot.lane.b32.xlu2 %v5939_v36, %s4405_s6  ;;  %4183 = vrot.lane.b32.xlu1 %v4182_v7, %s4407_s3  ;;  %v2043_v7 = vld [vmem:[%s8414_s1 + $0x400] sm:$0xff] }
 0x30f   : > { %2398 = vmatpush.msrb.mxu0 %v2043_v7  ;;  %v6012_v7 = vpop.permute.xlu2 %4083 }
 0x310   : > { %v4086_v57 = vunpack.i.h.bf16 %v6012_v7 }
 0x311   : > { %2399 = vmatpush.msrb.mxu0 %v2041_v63  ;;  %v2067_v63 = vld [vmem:[%s8414_s1 + $0x4c0] sm:$0xff] }
 0x312   : > { %v509_v16 = vsel %vm485_vm2, %v5652_v48, %v4086_v57 }
 0x313   : > { %2400 = vmatpush.msrb.mxu0 %v2039_v20  ;;  %v2129_v20 = vld [vmem:[%s8414_s1 + $0x6b0] sm:$0xff] }
 0x316   : > { %4193 = vrot.lane.b32.xlu2 %v5776_v9, %s4408_s29  ;;  %4188 = vrot.lane.b32.xlu1 %v4187_v8, %s4407_s3  ;;  %v2143_v9 = vld [vmem:[%s8414_s1 + $0x720] sm:$0xff]  ;;  %v4207_v8 = vpack.i.bf16 %v5730_v58, %v5588_v23 }
 0x317   : > { %2561 = vmatpush.msra.mxu3 %v2143_v9  ;;  %v1336_v9 = vmax.f32 %v5697_v55, %v1290_v26  ;;  %v2131_v55 = vld [vmem:[%s8414_s1 + $0x6c0] sm:$0xff] }
 0x319   : > { %2562 = vmatpush.msra.mxu3 %v2141_v61  ;;  %v2133_v61 = vld [vmem:[%s8414_s1 + $0x6d0] sm:$0xff] }
 0x31b   : > { %2563 = vmatpush.msra.mxu3 %v2139_v54  ;;  %v2037_v54 = vld [vmem:[%s8414_s1 + $0x3d0] sm:$0xff] }
 0x31c   : > { %2401 = vmatpush.msrb.mxu0 %v2037_v54  ;;  %v2063_v54 = vld [vmem:[%s8414_s1 + $0x4a0] sm:$0xff] }
 0x31d   : > { %2564 = vmatpush.msra.mxu3 %v2137_v32  ;;  %v2069_v32 = vld [vmem:[%s8414_s1 + $0x4d0] sm:$0xff] }
 0x31e   : > { %4198 = vrot.lane.b32.xlu2 %v5970_v19, %s4406_s16  ;;  %1174 = vrot.lane.b32.xlu1 %v5966_v21, %s4405_s6 }
 0x31f   : > { %2565 = vmatpush.msra.mxu3 %v2135_v41  ;;  %v6036_v41 = vmax.f32 %v1336_v9, 0.0  ;;  %2456 = vmatpush.msrb.mxu2 %v2069_v32  ;;  %v2031_v9 = vld [vmem:[%s8414_s1 + $0x3a0] sm:$0xff]  ;;  %v1338_v32 = vmax.f32 %v1290_v26, %v6034_v34 }
 0x320   : > { %v2123_v26 = vld [vmem:[%s8414_s1 + $0x680] sm:$0xff] }
 0x321   : > { %2566 = vmatpush.msra.mxu3 %v2133_v61  ;;  %v4222_v0 = vpack.i.bf16 %v6036_v41, %v5766_v17  ;;  %2457 = vmatpush.msrb.mxu2 %v2067_v63  ;;  %v2033_v61 = vld [vmem:[%s8414_s1 + $0x3b0] sm:$0xff] }
 0x322   : > { %v2061_v63 = vld [vmem:[%s8414_s1 + $0x490] sm:$0xff] }
 0x323   : > { %2567 = vmatpush.msra.mxu3 %v2131_v55  ;;  %2458 = vmatpush.msrb.mxu2 %v2065_v42  ;;  %v2125_v55 = vld [vmem:[%s8414_s1 + $0x690] sm:$0xff]  ;;  %v6080_v42 = vmax.f32 %v1338_v32, 0.0 }
 0x324   : > { %v2057_v32 = vld [vmem:[%s8414_s1 + $0x470] sm:$0xff] }
 0x325   : > { %2568 = vmatpush.msra.mxu3 %v2129_v20  ;;  %2459 = vmatpush.msrb.mxu2 %v2063_v54  ;;  %v2025_v54 = vld [vmem:[%s8414_s1 + $0x370] sm:$0xff] }
 0x326   : > { %4208 = vrot.lane.b32.xlu1 %v4207_v8, %s4407_s3  ;;  %v2035_v8 = vld [vmem:[%s8414_s1 + $0x3c0] sm:$0xff] }
 0x327   : > { %2402 = vmatpush.msrb.mxu0 %v2035_v8  ;;  %v2029_v8 = vld [vmem:[%s8414_s1 + $0x390] sm:$0xff]  ;;  %2569 = vmatpush.msra.mxu3 %v2127_v29 }
 0x328   : > { %2460 = vmatpush.msrb.mxu2 %v2061_v63  ;;  %v2121_v29 = vld [vmem:[%s8414_s1 + $0x670] sm:$0xff]  ;;  %v2055_v63 = vld [vmem:[%s8414_s1 + $0x460] sm:$0xff] }
 0x329   : > { %2403 = vmatpush.msrb.mxu0 %v2033_v61  ;;  %2570 = vmatpush.msra.mxu3 %v2125_v55  ;;  %v2059_v61 = vld [vmem:[%s8414_s1 + $0x480] sm:$0xff] }
 0x32a   : > { %2461 = vmatpush.msrb.mxu2 %v2059_v61  ;;  %v2119_v55 = vld [vmem:[%s8414_s1 + $0x660] sm:$0xff]  ;;  %v2053_v61 = vld [vmem:[%s8414_s1 + $0x450] sm:$0xff] }
 0x32b   : > { %2404 = vmatpush.msrb.mxu0 %v2031_v9  ;;  %2571 = vmatpush.msra.mxu3 %v2123_v26  ;;  %v6087_v9 = vpack.i.bf16 %v6080_v42, %v6036_v41  ;;  %v2117_v26 = vld [vmem:[%s8414_s1 + $0x650] sm:$0xff] }
 0x32c   : > { %2462 = vmatpush.msrb.mxu2 %v2057_v32  ;;  %v2019_v32 = vld [vmem:[%s8414_s1 + $0x340] sm:$0xff] }
 0x32d   : > { %2405 = vmatpush.msrb.mxu0 %v2029_v8  ;;  %2572 = vmatpush.msra.mxu3 %v2121_v29  ;;  %v2023_v8 = vld [vmem:[%s8414_s1 + $0x360] sm:$0xff] }
 0x32e   : > { %4223 = vrot.lane.b32.xlu1 %v4222_v0, %s4407_s3  ;;  %v2027_v0 = vld [vmem:[%s8414_s1 + $0x380] sm:$0xff]  ;;  %2463 = vmatpush.msrb.mxu2 %v2055_v63  ;;  %v2017_v63 = vld [vmem:[%s8414_s1 + $0x330] sm:$0xff] }
 0x32f   : > { %2406 = vmatpush.msrb.mxu0 %v2027_v0  ;;  %v2021_v0 = vld [vmem:[%s8414_s1 + $0x350] sm:$0xff]  ;;  %2573 = vmatpush.msra.mxu3 %v2119_v55  ;;  %v2051_v55 = vld [vmem:[%s8414_s1 + $0x440] sm:$0xff] }
 0x330   : > { %v6069_v20 = vpop.permute.xlu2 %4103  ;;  %2464 = vmatpush.msrb.mxu2 %v2053_v61  ;;  %v4085_v61 = vunpack.i.l.bf16 %v6012_v7 }
 0x331   : > { %2407 = vmatpush.msrb.mxu0 %v2025_v54  ;;  %2574 = vmatpush.msra.mxu3 %v2117_v26  ;;  %v2115_v54 = vld [vmem:[%s8414_s1 + $0x640] sm:$0xff]  ;;  %v2049_v26 = vld [vmem:[%s8414_s1 + $0x430] sm:$0xff]  ;;  %v8461_v57 = vunpack.i.l.bf16 %v6069_v20 }
 0x332   : > { %2465 = vmatpush.msrb.mxu2 %v2051_v55  ;;  %v4090_v55 = vunpack.i.l.bf16 %v5849_v45 }
 0x333   : > { %2408 = vmatpush.msrb.mxu0 %v2023_v8  ;;  %2575 = vmatpush.msra.mxu3 %v2115_v54  ;;  %v2113_v8 = vld [vmem:[%s8414_s1 + $0x630] sm:$0xff] }
 0x334   : > { %2466 = vmatpush.msrb.mxu2 %v2049_v26 }
 0x335   : > { %2409 = vmatpush.msrb.mxu0 %v2021_v0  ;;  %2576 = vmatpush.msra.mxu3 %v2113_v8  ;;  %v6150_v8 = vpop.permute.xlu0 %4138 }
 0x336   : > { %4238 = vrot.lane.b32.xlu1 %v6087_v9, %s4406_s16  ;;  %s4357_s16 = scalar_lea.hbm %s8415_s2, 16 }
 0x337   : > { %2410 = vmatpush.msrb.mxu0 %v2019_v32 }
 0x338   : > { %v6115_v29 = vpop.permute.xlu2 %4118 }
 0x339   : > { %2411 = vmatpush.msrb.mxu0 %v2017_v63  ;;  %v4336_v63 = vld [vmem:[%s4481_s25 + $0xb0] sm:$0xff]  ;;  %s4409_s25 = smov 24  }
 0x33a   : > { %v508_v26 = vsel %vm485_vm2, %v4336_v63, %v4085_v61 }
 0x33b   : > { %v533_v18 = vsel %vm510_vm3, %v508_v26, %v4090_v55 }
 0x33d   : > { %v6173_v48 = vpop.permute.xlu0 %4153 }
 0x340   : > { %v6135_v0 = vpop.permute.xlu1 %4093  ;;  %v6139_v32 = vpop.permute.xlu2 %4133 }
 0x341   : > { %v8457_v54 = vunpack.i.l.bf16 %v6135_v0  ;;  %v8462_v27 = vunpack.i.h.bf16 %v6135_v0 }
 0x343   : > { %v6141_v56 = vpop.f32.mrf.mxu3  ;;  %v6147_v2 = vsel %vm1487_vm7, %v5954_v46, %v8457_v54  ;;  %v4091_v54 = vunpack.i.h.bf16 %v5849_v45 }
 0x344   : > { %8600 = vst [vmem:[#allocation46_spill] sm:$0xff] %v6141_v56  ;;  %2387 = vmatmul.f32.gmra.mxu3 %v6147_v2 }
 0x345   : > { %8601 = vst [vmem:[#allocation47_spill] sm:$0xff] %v6147_v2  ;;  %v6165_v2 = vsel %vm1487_vm7, %v5693_v47, %v8462_v27  ;;  %v1161_v26 = vpop.permute.xlu0 %1160 }
 0x346   : > { %8602 = vst [vmem:[#allocation48_spill] sm:$0xff] %v6165_v2 }
 0x348   : > { %v4099_v56 = vpop.permute.xlu1 %4098  ;;  %v6168_v61 = vpop.permute.xlu2 %4148 }
 0x349   : > { %v4100_v1 = vunpack.i.l.bf16 %v4099_v56  ;;  %v4101_v45 = vunpack.i.h.bf16 %v4099_v56 }
 0x34b   : > { %v2376_v50 = vpop.f32.mrf.mxu3  ;;  %v558_v7 = vsel %vm535_vm4, %v533_v18, %v4100_v1 }
 0x34c   : > { %2390 = vmatmul.f32.gmra.mxu3 %v6165_v2  ;;  %v583_v55 = vsel %vm560_vm5, %v558_v7, %v5106_v4  ;;  %v534_v50 = vsel %vm510_vm3, %v509_v16, %v4091_v54  ;;  %v6186_v4 = vsel %vm1487_vm7, %v5730_v58, %v8461_v57  ;;  %v4106_v7 = vunpack.i.h.bf16 %v6069_v20 }
 0x34d   : > { %766 = vmatmul.f32.gmra.mxu0 %v583_v55  ;;  %944 = vmatmul.f32.gmra.mxu2 %v583_v55  ;;  %v559_v1 = vsel %vm535_vm4, %v534_v50, %v4101_v45  ;;  %8604 = vst [vmem:[#allocation50_spill] sm:$0xff] %v6186_v4 }
 0x34e   : > { %v584_v56 = vsel %vm560_vm5, %v559_v1, %v5135_v44  ;;  %v8606_v44 = vunpack.i.h.bf16 %v5867_v30 }
 0x350   : > { %v6177_v63 = vpop.permute.xlu1 %4113  ;;  %v6191_v16 = vpop.permute.xlu2 %4163 }
 0x351   : > { %v8463_v54 = vunpack.i.l.bf16 %v6177_v63 }
 0x353   : > { %v6180_v18 = vpop.f32.mrf.mxu3  ;;  %v6203_v1 = vsel %vm1737_vm9, %v8606_v44, %v8463_v54  ;;  %v8472_v44 = vunpack.i.h.bf16 %v6177_v63  ;;  %v4120_v54 = vunpack.i.l.bf16 %v6115_v29 }
 0x354   : > { %8603 = vst [vmem:[#allocation49_spill] sm:$0xff] %v6180_v18  ;;  %2392 = vmatmul.f32.gmra.mxu3 %v6186_v4 }
 0x355   : > { %769 = vmatmul.f32.gmra.mxu0 %v584_v56  ;;  %947 = vmatmul.f32.gmra.mxu2 %v584_v56  ;;  %8607 = vst [vmem:[#allocation52_spill] sm:$0xff] %v6203_v1  ;;  %v8608_v56 = vunpack.i.l.bf16 %v5413_v28 }
 0x358   : > { %v4129_v55 = vpop.permute.xlu1 %4128  ;;  %v6221_v4 = vpop.permute.xlu2 %4168 }
 0x359   : > { %v4131_v45 = vunpack.i.h.bf16 %v4129_v55  ;;  %v4130_v50 = vunpack.i.l.bf16 %v4129_v55  ;;  %v6210_v55 = vsel %vm1487_vm7, %v8608_v56, %v4106_v7  ;;  %v6223_v56 = vpop.permute.xlu0 %4173 }
 0x35a   : > { %8609 = vst [vmem:[#allocation53_spill] sm:$0xff] %v6210_v55 }
 0x35b   : > { %v2381_v57 = vpop.f32.mrf.mxu3  ;;  %v6196_v27 = vsel %vm1612_vm8, %v4130_v50, %v4131_v45 }
 0x35c   : > { %8605 = vst [vmem:[#allocation51_spill] sm:$0xff] %v6196_v27  ;;  %2527 = vmatmul.f32.gmra.mxu1 %v6196_v27  ;;  %2577 = vmatmul.f32.vlgmr.msra.gmra.mxu3 %v6203_v1  ;;  %v8610_v57 = vunpack.i.l.bf16 %v5867_v30 }
 0x35d   : > { %2412 = vmatmul.f32.vlgmr.msrb.gmra.mxu0 %v6210_v55 }
 0x35e   : > { %v6215_v18 = vsel %vm1612_vm8, %v4106_v7, %v8610_v57  ;;  %v8614_v7 = vunpack.i.h.bf16 %v5885_v25 }
 0x35f   : > { %8611 = vst [vmem:[#allocation54_spill] sm:$0xff] %v6215_v18  ;;  %2467 = vmatmul.f32.vlgmr.msrb.gmra.mxu2 %v6215_v18 }
 0x360   : > { %v4144_v1 = vpop.permute.xlu1 %4143  ;;  %v6235_v57 = vsel %vm1737_vm9, %v8614_v7, %v8472_v44  ;;  %v4151_v7 = vunpack.i.h.bf16 %v6168_v61  ;;  %v4150_v44 = vunpack.i.l.bf16 %v6168_v61 }
 0x361   : > { %v4146_v2 = vunpack.i.h.bf16 %v4144_v1  ;;  %v4145_v27 = vunpack.i.l.bf16 %v4144_v1  ;;  %8615 = vst [vmem:[#allocation57_spill] sm:$0xff] %v6235_v57  ;;  %v8616_v1 = vunpack.i.h.bf16 %v5413_v28  ;;  %v4121_v28 = vunpack.i.h.bf16 %v6115_v29  ;;  %v6267_v37 = vpop.permute.xlu0 %4178 }
 0x362   : > { %v8623_v29 = vunpack.i.l.bf16 %v5458_v39 }
 0x363   : > { %v6225_v35 = vpop.f32.mrf.mxu3  ;;  %v6228_v30 = vsel %vm1612_vm8, %v4145_v27, %v4146_v2  ;;  %v6242_v18 = vsel %vm1487_vm7, %v8616_v1, %v4120_v54  ;;  %v8475_v1 = vunpack.i.l.bf16 %v6139_v32 }
 0x364   : > { %8612 = vst [vmem:[#allocation55_spill] sm:$0xff] %v6225_v35  ;;  %2530 = vmatmul.f32.gmra.mxu1 %v6228_v30  ;;  %2580 = vmatmul.f32.gmra.mxu3 %v6235_v57  ;;  %v8618_v35 = vunpack.i.l.bf16 %v5885_v25  ;;  %v1167_v25 = vpop.permute.xlu2 %1166  ;;  %v6274_v61 = vsel %vm1487_vm7, %v8623_v29, %v4121_v28 }
 0x365   : > { %8613 = vst [vmem:[#allocation56_spill] sm:$0xff] %v6228_v30  ;;  %2415 = vmatmul.f32.gmra.mxu0 %v6242_v18 }
 0x366   : > { %8617 = vst [vmem:[#allocation58_spill] sm:$0xff] %v6242_v18  ;;  %v6247_v55 = vsel %vm1612_vm8, %v4120_v54, %v8618_v35  ;;  %v6260_v35 = vsel %vm1612_vm8, %v4150_v44, %v4151_v7  ;;  %v6265_v54 = vsel %vm1737_vm9, %v4131_v45, %v8475_v1  ;;  %v4166_v1 = vunpack.i.h.bf16 %v6191_v16 }
 0x367   : > { %8619 = vst [vmem:[#allocation59_spill] sm:$0xff] %v6247_v55  ;;  %2470 = vmatmul.f32.gmra.mxu2 %v6247_v55  ;;  %v8483_v55 = vunpack.i.l.bf16 %v6191_v16 }
 0x368   : > { %v6256_v57 = vpop.permute.xlu1 %4158  ;;  %8621 = vst [vmem:[#allocation61_spill] sm:$0xff] %v6260_v35 }
 0x369   : > { %8622 = vst [vmem:[#allocation62_spill] sm:$0xff] %v6265_v54 }
 0x36a   : > { %8624 = vst [vmem:[#allocation63_spill] sm:$0xff] %v6274_v61 }
 0x36b   : > { %v2386_v30 = vpop.f32.mrf.mxu3 }
 0x36c   : > { %2532 = vmatmul.f32.gmra.mxu1 %v6260_v35  ;;  %2582 = vmatmul.f32.gmra.mxu3 %v6265_v54  ;;  %v6277_v30 = vsel %vm1612_vm8, %v4121_v28, %v4130_v50  ;;  %v4140_v54 = vunpack.i.l.bf16 %v6150_v8  ;;  %v8482_v35 = vunpack.i.h.bf16 %v6139_v32  ;;  %v6292_v28 = vsel %vm1612_vm8, %v8483_v55, %v4166_v1 }
 0x36d   : > { %8625 = vst [vmem:[#allocation64_spill] sm:$0xff] %v6277_v30  ;;  %2417 = vmatmul.f32.gmra.mxu0 %v6274_v61  ;;  %v6281_v45 = vpop.f32.mrf.mxu1  ;;  %v4141_v55 = vunpack.i.h.bf16 %v6150_v8 }
 0x36e   : > { %8626 = vst [vmem:[#allocation65_spill] sm:$0xff] %v6281_v45  ;;  %v6297_v45 = vsel %vm1737_vm9, %v4146_v2, %v8482_v35  ;;  %v6312_v35 = vpop.permute.xlu0 %1170 }
 0x36f   : > { %2472 = vmatmul.f32.gmra.mxu2 %v6277_v30  ;;  %8627 = vst [vmem:[#allocation66_spill] sm:$0xff] %v6292_v28  ;;  %v1169_v30 = vpop.permute.xlu2 %1168 }
 0x370   : > { %v1163_v18 = vpop.permute.xlu1 %1162  ;;  %8628 = vst [vmem:[#allocation67_spill] sm:$0xff] %v6297_v45 }
 0x371   : > { %v1203_v29 = vsel %vm1184_vm6, %v1161_v26, %v1163_v18  ;;  %v8629_v26 = vunpack.i.h.bf16 %v5458_v39  ;;  %v4170_v39 = vunpack.i.l.bf16 %v6221_v4 }
 0x372   : > { %v1293_v50 = vmax.f32 %v5616_v3, %v1203_v29  ;;  %v6308_v29 = vsel %vm1612_vm8, %v4140_v54, %v4145_v27 }
 0x373   : > { %v6305_v3 = vsel %vm1487_vm7, %v8629_v26, %v4140_v54  ;;  %8631 = vst [vmem:[#allocation69_spill] sm:$0xff] %v6308_v29  ;;  %v1205_v26 = vsel %vm1184_vm6, %v1169_v30, %v6312_v35 }
 0x374   : > { %v1339_v61 = vmax.f32 %v5790_v51, %v1293_v50  ;;  %2535 = vmatmul.f32.gmra.mxu1 %v6292_v28  ;;  %2585 = vmatmul.f32.gmra.mxu3 %v6297_v45  ;;  %8630 = vst [vmem:[#allocation68_spill] sm:$0xff] %v6305_v3  ;;  %v4171_v45 = vunpack.i.h.bf16 %v6221_v4 }
 0x375   : > { %2420 = vmatmul.f32.gmra.mxu0 %v6305_v3  ;;  %v2526_v2 = vpop.f32.mrf.mxu1  ;;  %v8633_v3 = vunpack.i.l.bf16 %v5511_v53 }
 0x376   : > { %v6314_v51 = vmax.f32 %v1339_v61, 0.0  ;;  %v6326_v61 = vmax.f32 %v5939_v36, %v1205_v26  ;;  %v6331_v4 = vsel %vm1612_vm8, %v4170_v39, %v4171_v45  ;;  %v6344_v36 = vsel %vm1612_vm8, %v4141_v55, %v4150_v44 }
 0x377   : > { %2475 = vmatmul.f32.gmra.mxu2 %v6308_v29  ;;  %v8488_v29 = vunpack.i.l.bf16 %v6173_v48  ;;  %v6341_v28 = vsel %vm1487_vm7, %v8633_v3, %v4141_v55  ;;  %8634 = vst [vmem:[#allocation71_spill] sm:$0xff] %v6344_v36  ;;  %v4227_v55 = vpack.i.bf16 %v6080_v42, %v5809_v40 }
 0x378   : > { %v1165_v27 = vpop.permute.xlu1 %1164  ;;  %v4212_v54 = vpack.i.bf16 %v6314_v51, %v5809_v40 }
 0x379   : > { %v1204_v2 = vsel %vm1184_vm6, %v1165_v27, %v1167_v25  ;;  %v6336_v30 = vsel %vm1737_vm9, %v4151_v7, %v8488_v29 }
 0x37a   : > { %v1295_v8 = vmax.f32 %v5924_v52, %v1204_v2  ;;  %4213 = vrot.lane.b32.xlu2 %v4212_v54, %s4408_s29  ;;  %8632 = vst [vmem:[#allocation70_spill] sm:$0xff] %v6336_v30  ;;  %v1294_v52 = vmax.f32 %v5909_v31, %v1163_v18  ;;  %v6359_v31 = vmax.f32 %v5927_v11, %v1167_v25  ;;  %v4160_v18 = vunpack.i.l.bf16 %v6256_v57 }
 0x37b   : > { %v8489_v2 = vunpack.i.h.bf16 %v6173_v48 }
 0x37c   : > { %v1341_v26 = vmax.f32 %v1293_v50, %v1295_v8  ;;  %v1343_v27 = vmax.f32 %v1295_v8, %v6326_v61  ;;  %2537 = vmatmul.f32.gmra.mxu1 %v6331_v4  ;;  %2587 = vmatmul.f32.gmra.mxu3 %v6336_v30  ;;  %v1340_v44 = vmax.f32 %v6034_v34, %v1294_v52  ;;  %v8641_v30 = vunpack.i.l.bf16 %v5699_v43 }
 0x37d   : > { %2422 = vmatmul.f32.gmra.mxu0 %v6341_v28  ;;  %v1342_v29 = vmax.f32 %v1294_v52, %v6359_v31  ;;  %v6375_v34 = vsel %vm1737_vm9, %v4166_v1, %v8489_v2  ;;  %v8636_v52 = vunpack.i.h.bf16 %v5511_v53 }
 0x37e   : > { %v6352_v7 = vmax.f32 %v1341_v26, 0.0  ;;  %v6354_v3 = vmax.f32 %v1343_v27, 0.0  ;;  %v1173_v27 = vpop.permute.xlu0 %1172  ;;  %8635 = vst [vmem:[#allocation72_spill] sm:$0xff] %v6375_v34  ;;  %v6377_v25 = vmax.f32 %v1340_v44, 0.0  ;;  %v4161_v44 = vunpack.i.h.bf16 %v6256_v57 }
 0x37f   : > { %2477 = vmatmul.f32.gmra.mxu2 %v6344_v36  ;;  %v6393_v1 = vmax.f32 %v1342_v29, 0.0 }
 0x380   : > { %v4184_v50 = vpop.permute.xlu1 %4183  ;;  %v4232_v54 = vpack.i.bf16 %v6354_v3, %v6352_v7  ;;  %v4242_v53 = vpack.i.bf16 %v6377_v25, %v6314_v51 }
 0x381   : > { %v4186_v8 = vunpack.i.h.bf16 %v4184_v50  ;;  %v4185_v26 = vunpack.i.l.bf16 %v4184_v50  ;;  %v8638_v50 = vunpack.i.l.bf16 %v6191_v16  ;;  %v8492_v16 = vunpack.i.l.bf16 %v6223_v56 }
 0x382   : > { %4228 = vrot.lane.b32.xlu2 %v4227_v55, %s4407_s3  ;;  %4233 = vrot.lane.b32.xlu0 %v4232_v54, %s4408_s29  ;;  %v6384_v55 = vsel %vm1487_vm7, %v8636_v52, %v4160_v18  ;;  %v4247_v52 = vpack.i.bf16 %v6393_v1, %v6352_v7 }
 0x383   : > { %v6370_v11 = vsel %vm1612_vm8, %v4185_v26, %v4186_v8  ;;  %8637 = vst [vmem:[#allocation73_spill] sm:$0xff] %v6384_v55  ;;  %v6389_v54 = vsel %vm1612_vm8, %v4160_v18, %v8638_v50  ;;  %v6409_v57 = vsel %vm1737_vm9, %v4171_v45, %v8492_v16  ;;  %v4180_v16 = vunpack.i.l.bf16 %v6267_v37 }
 0x384   : > { %2540 = vmatmul.f32.gmra.mxu1 %v6370_v11  ;;  %2590 = vmatmul.f32.gmra.mxu3 %v6375_v34  ;;  %8639 = vst [vmem:[#allocation74_spill] sm:$0xff] %v6389_v54 }
 0x385   : > { %2425 = vmatmul.f32.gmra.mxu0 %v6384_v55  ;;  %8640 = vst [vmem:[#allocation75_spill] sm:$0xff] %v6409_v57 }
 0x386   : > { %v4204_v50 = vpop.permute.xlu0 %4203 }
 0x387   : > { %2480 = vmatmul.f32.gmra.mxu2 %v6389_v54  ;;  %v4205_v45 = vunpack.i.l.bf16 %v4204_v50 }
 0x388   : > { %v4189_v2 = vpop.permute.xlu1 %4188 }
 0x389   : > { %v4191_v34 = vunpack.i.h.bf16 %v4189_v2  ;;  %v4190_v18 = vunpack.i.l.bf16 %v4189_v2  ;;  %v6416_v2 = vsel %vm1487_vm7, %v8641_v30, %v4161_v44  ;;  %v8642_v30 = vld [vmem:[#allocation30_spill] sm:$0xff] }
 0x38a   : > { %4243 = vrot.lane.b32.xlu2 %v4242_v53, %s4407_s3  ;;  %4248 = vrot.lane.b32.xlu0 %v4247_v52, %s4407_s3  ;;  %v6419_v53 = vsel %vm1612_vm8, %v4161_v44, %v4170_v39  ;;  %v4206_v52 = vunpack.i.h.bf16 %v4204_v50  ;;  %v6436_v39 = vpop.permute.xlu2 %4193  ;;  %s3636_s3 = sshll.u32 %s136_s26, 4  ;;  %s3637_s3 = int_to_ptr.vmem [resolvable:$true] %s3636_s3 }
 0x38b   : > { %v6404_v29 = vsel %vm1612_vm8, %v4190_v18, %v4191_v34 }
 0x38c   : > { %2542 = vmatmul.f32.gmra.mxu1 %v6404_v29  ;;  %2592 = vmatmul.f32.gmra.mxu3 %v6409_v57  ;;  %v8497_v57 = vunpack.i.h.bf16 %v6223_v56  ;;  %v6439_v44 = vsel %vm1612_vm8, %v4205_v45, %v4206_v52 }
 0x38d   : > { %2427 = vmatmul.f32.gmra.mxu0 %v6416_v2 }
 0x38e   : > { %v6444_v50 = vsel %vm1737_vm9, %v4186_v8, %v8497_v57 }
 0x38f   : > { %2482 = vmatmul.f32.gmra.mxu2 %v6419_v53  ;;  %8643 = vst [vmem:[#allocation30_spill] sm:$0xff] %v6444_v50 }
 0x390   : > { %v6424_v54 = vpop.permute.xlu1 %1174 }
 0x391   : > { %v1206_v55 = vsel %vm1184_vm6, %v1173_v27, %v6424_v54 }
 0x392   : > { %v6430_v36 = vmax.f32 %v8642_v30, %v1206_v55  ;;  %1802 = vrot.lane.b32.xlu2 %v5454_v38, %s4409_s25  ;;  %4258 = vrot.lane.b32.xlu0 %v5891_v12, %s4408_s29  ;;  %v8644_v55 = vunpack.i.h.bf16 %v5699_v43  ;;  %v6456_v30 = vsel %vm1612_vm8, %v4180_v16, %v4185_v26  ;;  %v8499_v43 = vunpack.i.l.bf16 %v6436_v39 }
 0x393   : > { %8645 = vst [vmem:[#allocation76_spill] sm:$0xff] %v6456_v30 }
 0x394   : > { %v1345_v27 = vmax.f32 %v6326_v61, %v6430_v36  ;;  %2545 = vmatmul.f32.gmra.mxu1 %v6439_v44  ;;  %2595 = vmatmul.f32.gmra.mxu3 %v6444_v50  ;;  %v6453_v12 = vsel %vm1487_vm7, %v8644_v55, %v4180_v16  ;;  %v4181_v61 = vunpack.i.h.bf16 %v6267_v37  ;;  %v8647_v16 = vunpack.i.l.bf16 %v5772_v60 }
 0x395   : > { %2430 = vmatmul.f32.gmra.mxu0 %v6453_v12 }
 0x396   : > { %v6460_v8 = vmax.f32 %v1345_v27, 0.0  ;;  %v4199_v27 = vpop.permute.xlu2 %4198 }
 0x397   : > { %2485 = vmatmul.f32.gmra.mxu2 %v6456_v30 }
 0x398   : > { %v6463_v57 = vpop.permute.xlu1 %4208  ;;  %v4252_v50 = vpack.i.bf16 %v5601_v24, %v6460_v8  ;;  %v6483_v24 = vsel %vm1737_vm9, %v4191_v34, %v8499_v43  ;;  %v8504_v34 = vunpack.i.h.bf16 %v6436_v39  ;;  %v4200_v43 = vunpack.i.l.bf16 %v4199_v27 }
 0x399   : > { %v8500_v55 = vunpack.i.h.bf16 %v6463_v57  ;;  %v4210_v26 = vunpack.i.l.bf16 %v6463_v57  ;;  %8646 = vst [vmem:[#allocation77_spill] sm:$0xff] %v6483_v24 }
 0x39a   : > { %1806 = vrot.lane.b32.xlu2 %v5456_v33, %s4409_s25  ;;  %1808 = vrot.lane.b32.xlu0 %v5634_v22, %s4409_s25  ;;  %v6490_v22 = vsel %vm1487_vm7, %v8647_v16, %v4181_v61  ;;  %v8648_v16 = vld [vmem:[#allocation26_spill] sm:$0xff] }
 0x39b   : > { %4253 = vrot.lane.b32.xlu1 %v4252_v50, %s4408_s29  ;;  %v6478_v37 = vsel %vm1612_vm8, %v4210_v26, %v8500_v55  ;;  %v6493_v50 = vsel %vm1612_vm8, %v4181_v61, %v4190_v18  ;;  %v6516_v61 = vsel %vm1737_vm9, %v4206_v52, %v8504_v34  ;;  %v1984_v34 = vld [vmem:[%s8414_s1 + $0x228] sm:$0xff] }
 0x39c   : > { %2547 = vmatmul.f32.gmra.mxu1 %v6478_v37  ;;  %2597 = vmatmul.f32.gmra.mxu3 %v6483_v24  ;;  %8649 = vst [vmem:[#allocation26_spill] sm:$0xff] %v6516_v61 }
 0x39d   : > { %2432 = vmatmul.f32.gmra.mxu0 %v6490_v22  ;;  %2781 = vmatpush.msrb.mxu3 %v1984_v34  ;;  %v8659_v34 = vunpack.i.l.bf16 %v6069_v20 }
 0x39f   : > { %2487 = vmatmul.f32.gmra.mxu2 %v6493_v50 }
 0x3a0   : > { %v6498_v55 = vpop.permute.xlu1 %4223 }
 0x3a1   : > { %v8503_v24 = vunpack.i.h.bf16 %v6498_v55  ;;  %v4225_v30 = vunpack.i.l.bf16 %v6498_v55 }
 0x3a2   : > { %4263 = vrot.lane.b32.xlu2 %v8648_v16, %s4408_s29  ;;  %1812 = vrot.lane.b32.xlu0 %v5638_v5, %s4409_s25  ;;  %v8650_v16 = vunpack.i.h.bf16 %v5772_v60  ;;  %v8651_v60 = vunpack.i.l.bf16 %v5825_v15 }
 0x3a3   : > { %1804 = vrot.lane.b32.xlu1 %v5781_v49, %s4409_s25  ;;  %v6511_v18 = vsel %vm1612_vm8, %v4225_v30, %v8503_v24  ;;  %v6526_v49 = vsel %vm1612_vm8, %v4200_v43, %v4205_v45  ;;  %v4201_v24 = vunpack.i.h.bf16 %v4199_v27  ;;  %v8652_v27 = vld [vmem:[#allocation22_spill] sm:$0xff] }
 0x3a4   : > { %2550 = vmatmul.f32.gmra.mxu1 %v6511_v18  ;;  %2600 = vmatmul.f32.gmra.mxu3 %v6516_v61  ;;  %v6523_v5 = vsel %vm1487_vm7, %v8650_v16, %v4200_v43  ;;  %v6544_v43 = vpop.permute.xlu0 %4218 }
 0x3a5   : > { %2435 = vmatmul.f32.gmra.mxu0 %v6523_v5  ;;  %v6539_v52 = vsel %vm1487_vm7, %v8651_v60, %v4201_v24  ;;  %v6542_v45 = vsel %vm1612_vm8, %v4201_v24, %v4210_v26  ;;  %v8653_v26 = vunpack.i.h.bf16 %v5825_v15  ;;  %v8654_v60 = vld [vmem:[#allocation35_spill] sm:$0xff]  ;;  %v8655_v15 = vunpack.i.l.bf16 %v6135_v0 }
 0x3a7   : > { %2490 = vmatmul.f32.gmra.mxu2 %v6526_v49 }
 0x3aa   : > { %1816 = vrot.lane.b32.xlu2 %v5853_v13, %s4409_s25  ;;  %1818 = vrot.lane.b32.xlu0 %v5563_v14, %s4409_s25  ;;  %v4220_v13 = vunpack.i.l.bf16 %v6544_v43 }
 0x3ab   : > { %1810 = vrot.lane.b32.xlu1 %v5514_v62, %s4409_s25 }
 0x3ac   : > { %v6558_v24 = vsel %vm1487_vm7, %v8653_v26, %v4220_v13  ;;  %v6561_v16 = vsel %vm1612_vm8, %v4220_v13, %v4225_v30  ;;  %v6579_v13 = vpop.permute.xlu1 %4238 }
 0x3ad   : > { %2437 = vmatmul.f32.gmra.mxu0 %v6539_v52  ;;  %v8506_v26 = vunpack.i.l.bf16 %v6579_v13 }
 0x3af   : > { %2492 = vmatmul.f32.gmra.mxu2 %v6542_v45 }
 0x3b2   : > { %1820 = vrot.lane.b32.xlu2 %v5954_v46, %s4409_s25  ;;  %1822 = vrot.lane.b32.xlu0 %v8652_v27, %s4409_s25  ;;  %v8505_v46 = vunpack.i.h.bf16 %v6544_v43 }
 0x3b3   : > { %1814 = vrot.lane.b32.xlu1 %v5516_v6, %s4409_s25 }
 0x3b4   : > { %v6577_v30 = vsel %vm1487_vm7, %v8655_v15, %v8505_v46  ;;  %v8507_v46 = vunpack.i.h.bf16 %v6579_v13 }
 0x3b5   : > { %2440 = vmatmul.f32.gmra.mxu0 %v6558_v24  ;;  %8656 = vst [vmem:[#allocation22_spill] sm:$0xff] %v6577_v30 }
 0x3b7   : > { %2495 = vmatmul.f32.gmra.mxu2 %v6561_v16 }
 0x3ba   : > { %1826 = vrot.lane.b32.xlu2 %v5588_v23, %s4409_s25  ;;  %4273 = vrot.lane.b32.xlu0 %v8654_v60, %s4408_s29  ;;  %v8657_v60 = vunpack.i.h.bf16 %v6135_v0 }
 0x3bb   : > { %4268 = vrot.lane.b32.xlu1 %v5970_v19, %s4408_s29  ;;  %v2207_v19 = vld [vmem:[%s8414_s1 + $0x920] sm:$0xff] }
 0x3bc   : > { %v6595_v15 = vsel %vm1487_vm7, %v8657_v60, %v8506_v26  ;;  %2671 = vmatpush.msra.mxu2 %v2207_v19  ;;  %v2205_v60 = vld [vmem:[%s8414_s1 + $0x910] sm:$0xff] }
 0x3bd   : > { %2442 = vmatmul.f32.gmra.mxu0 %v6577_v30  ;;  %8658 = vst [vmem:[#allocation35_spill] sm:$0xff] %v6595_v15  ;;  %v2173_v26 = vld [vmem:[%s8414_s1 + $0x810] sm:$0xff] }
 0x3be   : > { %2672 = vmatpush.msra.mxu2 %v2205_v60  ;;  %v1982_v60 = vld [vmem:[%s8414_s1 + $0x218] sm:$0xff] }
 0x3bf   : > { %2782 = vmatpush.msrb.mxu3 %v1982_v60 }
 0x3c2   : > { %1830 = vrot.lane.b32.xlu2 %v5766_v17, %s4409_s25  ;;  %v2175_v17 = vld [vmem:[%s8414_s1 + $0x820] sm:$0xff] }
 0x3c3   : > { %1824 = vrot.lane.b32.xlu1 %v5693_v47, %s4409_s25  ;;  %2616 = vmatpush.msra.mxu0 %v2175_v17  ;;  %v2239_v17 = vld [vmem:[%s8414_s1 + $0xa20] sm:$0x3f] }
 0x3c4   : > { %3756 = vmatpush.msk.msrb.mxu1 %vm2279_vm10, %v2239_v17 }
 0x3c5   : > { %2445 = vmatmul.f32.gmra.mxu0 %v6595_v15  ;;  %v8665_v15 = vunpack.i.h.bf16 %v6463_v57  ;;  %v2199_v57 = vld [vmem:[%s8414_s1 + $0x8e0] sm:$0xff] }
 0x3c6   : > { %2617 = vmatpush.msra.mxu0 %v2173_v26  ;;  %v2203_v26 = vld [vmem:[%s8414_s1 + $0x900] sm:$0xff] }
 0x3c7   : > { %v6601_v47 = vpop.f32.mrf.mxu3  ;;  %2673 = vmatpush.msra.mxu2 %v2203_v26  ;;  %v2201_v26 = vld [vmem:[%s8414_s1 + $0x8f0] sm:$0xff] }
 0x3c9   : > { %2674 = vmatpush.msra.mxu2 %v2201_v26 }
 0x3ca   : > { %1832 = vrot.lane.b32.xlu2 %v6036_v41, %s4409_s25  ;;  %v767_v0 = vpop.f32.mrf.mxu0  ;;  %v6623_v41 = vsel %vm1487_vm7, %v8659_v34, %v8507_v46 }
 0x3cb   : > { %1828 = vrot.lane.b32.xlu1 %v5730_v58, %s4409_s25  ;;  %v768_v19 = vadd.f32 %v767_v0, %v4900_v10  ;;  %8660 = vst [vmem:[#allocation78_spill] sm:$0xff] %v6623_v41  ;;  %v8661_v58 = vld [vmem:[#allocation15_spill] sm:$0xff]  ;;  %2675 = vmatpush.msra.mxu2 %v2199_v57 }
 0x3cd   : > { %v6627_v0 = vadd.f32 %v8661_v58, %v768_v19  ;;  %2447 = vmatmul.f32.gmra.mxu0 %v6623_v41  ;;  %v8662_v58 = vld [vmem:[#allocation27_spill] sm:$0xff] }
 0x3cf   : > { %1176 = vrot.lane.b32.xlu0 %v6627_v0, %s4405_s6  ;;  %v2391_v20 = vpop.f32.mrf.mxu3 }
 0x3d0   : > { %v945_v34 = vpop.f32.mrf.mxu2  ;;  %v2237_v20 = vld [vmem:[%s8414_s1 + $0xa10] sm:$0xff] }
 0x3d1   : > { %v946_v19 = vadd.f32 %v945_v34, %v4902_v59  ;;  %2727 = vmatpush.msrb.mxu1 %v2237_v20  ;;  %v2171_v34 = vld [vmem:[%s8414_s1 + $0x800] sm:$0xff] }
 0x3d2   : > { %v770_v17 = vpop.f32.mrf.mxu0  ;;  %2618 = vmatpush.msra.mxu0 %v2171_v34 }
 0x3d3   : > { %v6640_v46 = vadd.f32 %v8662_v58, %v946_v19  ;;  %v1980_v19 = vld [vmem:[%s8414_s1 + $0x208] sm:$0xff]  ;;  %v2169_v58 = vld [vmem:[%s8414_s1 + $0x7f0] sm:$0xff]  ;;  %v771_v20 = vadd.f32 %v770_v17, %v4900_v10 }
 0x3d4   : > { %v6648_v61 = vpop.permute.xlu2 %4213  ;;  %2783 = vmatpush.msrb.mxu3 %v1980_v19  ;;  %2619 = vmatpush.msra.mxu0 %v2169_v58  ;;  %v8670_v58 = vld [vmem:[#allocation29_spill] sm:$0xff] }
 0x3d5   : > { %1178 = vrot.lane.b32.xlu1 %v6640_v46, %s4405_s6  ;;  %v8664_v41 = vunpack.i.l.bf16 %v6648_v61 }
 0x3d7   : > { %1834 = vrot.lane.b32.xlu0 %v5809_v40, %s4409_s25  ;;  %v6668_v60 = vpop.f32.mrf.mxu3  ;;  %v6675_v30 = vsel %vm1737_vm9, %v8665_v15, %v8664_v41  ;;  %v2167_v40 = vld [vmem:[%s8414_s1 + $0x7e0] sm:$0xff]  ;;  %v8669_v15 = vld [vmem:[#allocation17_spill] sm:$0xff] }
 0x3d8   : > { %8663 = vst [vmem:[#allocation15_spill] sm:$0xff] %v6668_v60  ;;  %v948_v34 = vpop.f32.mrf.mxu2  ;;  %2602 = vmatmul.f32.gmra.mxu3 %v6675_v30  ;;  %2620 = vmatpush.msra.mxu0 %v2167_v40  ;;  %v6690_v41 = vadd.f32 %v8669_v15, %v771_v20  ;;  %v2163_v15 = vld [vmem:[%s8414_s1 + $0x7c0] sm:$0xff]  ;;  %v8672_v40 = vunpack.i.h.bf16 %v6544_v43  ;;  %v8675_v43 = vunpack.i.h.bf16 %v6648_v61  ;;  %v4282_v60 = vpack.i.bf16 %v6393_v1, %v6377_v25 }
 0x3d9   : > { %8666 = vst [vmem:[#allocation27_spill] sm:$0xff] %v6675_v30  ;;  %v949_v19 = vadd.f32 %v948_v34, %v4902_v59  ;;  %v6679_v10 = vpop.f32.mrf.mxu1  ;;  %v2235_v59 = vld [vmem:[%s8414_s1 + $0xa00] sm:$0xff]  ;;  %v2165_v34 = vld [vmem:[%s8414_s1 + $0x7d0] sm:$0xff] }
 0x3da   : > { %8667 = vst [vmem:[#allocation79_spill] sm:$0xff] %v6679_v10  ;;  %v6687_v17 = vpop.f32.mrf.mxu0  ;;  %v2197_v10 = vld [vmem:[%s8414_s1 + $0x8d0] sm:$0xff]  ;;  %2728 = vmatpush.msrb.mxu1 %v2235_v59  ;;  %2621 = vmatpush.msra.mxu0 %v2165_v34 }
 0x3db   : > { %8668 = vst [vmem:[#allocation80_spill] sm:$0xff] %v6687_v17  ;;  %v6693_v26 = vadd.f32 %v8670_v58, %v949_v19  ;;  %2676 = vmatpush.msra.mxu2 %v2197_v10  ;;  %v2195_v58 = vld [vmem:[%s8414_s1 + $0x8c0] sm:$0xff]  ;;  %v2233_v59 = vld [vmem:[%s8414_s1 + $0x9f0] sm:$0xff]  ;;  %v1978_v17 = vld [vmem:[%s8414_s1 + $0x1f8] sm:$0xff] }
 0x3dc   : > { %v6705_v57 = vpop.permute.xlu2 %4228  ;;  %2622 = vmatpush.msra.mxu0 %v2163_v15  ;;  %2729 = vmatpush.msrb.mxu1 %v2233_v59  ;;  %v2193_v59 = vld [vmem:[%s8414_s1 + $0x8b0] sm:$0xff] }
 0x3dd   : > { %v4230_v19 = vunpack.i.l.bf16 %v6705_v57  ;;  %1182 = vrot.lane.b32.xlu2 %v6693_v26, %s4405_s6  ;;  %1180 = vrot.lane.b32.xlu1 %v6690_v41, %s4405_s6  ;;  %v8673_v10 = vunpack.i.h.bf16 %v6705_v57  ;;  %s3792_s6 = sshll.u32 %s4449_s13, 3 }
 0x3de   : > { %2677 = vmatpush.msra.mxu2 %v2195_v58  ;;  %2784 = vmatpush.msrb.mxu3 %v1978_v17  ;;  %v2157_v58 = vld [vmem:[%s8414_s1 + $0x790] sm:$0xff]  ;;  %s3634_s30 = scalar_lea.hbm %s8415_s2, %s3792_s6 }
 0x3df   : > { %4278 = vrot.lane.b32.xlu0 %v6087_v9, %s4408_s29  ;;  %v6724_v34 = vpop.f32.mrf.mxu3  ;;  %v6729_v20 = vsel %vm1612_vm8, %v8672_v40, %v4230_v19  ;;  %v6734_v15 = vsel %vm1612_vm8, %v4230_v19, %v8673_v10  ;;  %v2161_v9 = vld [vmem:[%s8414_s1 + $0x7b0] sm:$0xff]  ;;  %v8676_v40 = vunpack.i.h.bf16 %v6498_v55  ;;  %v2231_v10 = vld [vmem:[%s8414_s1 + $0x9e0] sm:$0xff] }
 0x3e0   : > { %8671 = vst [vmem:[#allocation17_spill] sm:$0xff] %v6724_v34  ;;  %2497 = vmatmul.f32.gmra.mxu2 %v6729_v20  ;;  %2552 = vmatmul.f32.gmra.mxu1 %v6734_v15  ;;  %v2159_v55 = vld [vmem:[%s8414_s1 + $0x7a0] sm:$0xff] }
 0x3e1   : > { %v6751_v19 = vsel %vm1737_vm9, %v8676_v40, %v8675_v43  ;;  %2623 = vmatpush.msra.mxu0 %v2161_v9  ;;  %2678 = vmatpush.msra.mxu2 %v2193_v59  ;;  %v2191_v43 = vld [vmem:[%s8414_s1 + $0x8a0] sm:$0xff]  ;;  %v2229_v40 = vld [vmem:[%s8414_s1 + $0x9d0] sm:$0xff] }
 0x3e2   : > { %v6742_v34 = vpop.f32.mrf.mxu2  ;;  %8677 = vst [vmem:[#allocation81_spill] sm:$0xff] %v6751_v19  ;;  %2605 = vmatmul.f32.gmra.mxu3 %v6751_v19  ;;  %v2416_v30 = vpop.f32.mrf.mxu0  ;;  %2730 = vmatpush.msrb.mxu1 %v2231_v10  ;;  %v2189_v59 = vld [vmem:[%s8414_s1 + $0x890] sm:$0xff]  ;;  %v2227_v10 = vld [vmem:[%s8414_s1 + $0x9c0] sm:$0xff] }
 0x3e3   : > { %8674 = vst [vmem:[#allocation29_spill] sm:$0xff] %v6742_v34  ;;  %v2531_v34 = vpop.f32.mrf.mxu1  ;;  %v1976_v30 = vld [vmem:[%s8414_s1 + $0x1e8] sm:$0xff]  ;;  %2624 = vmatpush.msra.mxu0 %v2159_v55  ;;  %2679 = vmatpush.msra.mxu2 %v2191_v43  ;;  %v1974_v43 = vld [vmem:[%s8414_s1 + $0x1d8] sm:$0xff] }
 0x3e4   : > { %v6772_v17 = vpop.permute.xlu2 %4243  ;;  %2785 = vmatpush.msrb.mxu3 %v1976_v30  ;;  %2731 = vmatpush.msrb.mxu1 %v2229_v40  ;;  %v8678_v30 = vunpack.i.l.bf16 %v6579_v13  ;;  %v2155_v40 = vld [vmem:[%s8414_s1 + $0x780] sm:$0xff] }
 0x3e5   : > { %v8513_v34 = vunpack.i.h.bf16 %v6772_v17  ;;  %v4245_v9 = vunpack.i.l.bf16 %v6772_v17  ;;  %1838 = vrot.lane.b32.xlu2 %v6314_v51, %s4409_s25  ;;  %1836 = vrot.lane.b32.xlu1 %v6080_v42, %s4409_s25 }
 0x3e6   : > { %2625 = vmatpush.msra.mxu0 %v2157_v58  ;;  %v2225_v58 = vld [vmem:[%s8414_s1 + $0x9b0] sm:$0xff]  ;;  %2680 = vmatpush.msra.mxu2 %v2189_v59 }
 0x3e7   : > { %1840 = vrot.lane.b32.xlu0 %v6377_v25, %s4409_s25  ;;  %v2581_v55 = vpop.f32.mrf.mxu3  ;;  %v6794_v51 = vsel %vm1612_vm8, %v8678_v30, %v4245_v9  ;;  %v6799_v42 = vsel %vm1612_vm8, %v4245_v9, %v8513_v34  ;;  %v2187_v30 = vld [vmem:[%s8414_s1 + $0x880] sm:$0xff]  ;;  %2732 = vmatpush.msrb.mxu1 %v2227_v10  ;;  %v2153_v34 = vld [vmem:[%s8414_s1 + $0x770] sm:$0xff] }
 0x3e8   : > { %2500 = vmatmul.f32.gmra.mxu2 %v6794_v51  ;;  %2555 = vmatmul.f32.gmra.mxu1 %v6799_v42  ;;  %v2185_v59 = vld [vmem:[%s8414_s1 + $0x870] sm:$0xff]  ;;  %v2223_v10 = vld [vmem:[%s8414_s1 + $0x9a0] sm:$0xff] }
 0x3e9   : > { %2786 = vmatpush.msrb.mxu3 %v1974_v43  ;;  %2626 = vmatpush.msra.mxu0 %v2155_v40  ;;  %v1970_v43 = vld [vmem:[%s8414_s1 + $0x1b8] sm:$0xff]  ;;  %v8681_v40 = vld [vmem:[#allocation28_spill] sm:$0xff]  ;;  %v2151_v25 = vld [vmem:[%s8414_s1 + $0x760] sm:$0xff] }
 0x3ea   : > { %v2471_v55 = vpop.f32.mrf.mxu2  ;;  %v6823_v19 = vpop.f32.mrf.mxu0  ;;  %2681 = vmatpush.msra.mxu2 %v2187_v30  ;;  %2733 = vmatpush.msrb.mxu1 %v2225_v58  ;;  %v2221_v30 = vld [vmem:[%s8414_s1 + $0x990] sm:$0xff] }
 0x3eb   : > { %v6815_v9 = vpop.f32.mrf.mxu1  ;;  %v1972_v55 = vld [vmem:[%s8414_s1 + $0x1c8] sm:$0xff]  ;;  %8680 = vst [vmem:[#allocation83_spill] sm:$0xff] %v6823_v19  ;;  %2627 = vmatpush.msra.mxu0 %v2153_v34  ;;  %v1298_v19 = vmax.f32 %v8681_v40, %v6312_v35  ;;  %v2183_v34 = vld [vmem:[%s8414_s1 + $0x860] sm:$0xff] }
 0x3ec   : > { %8679 = vst [vmem:[#allocation82_spill] sm:$0xff] %v6815_v9  ;;  %2787 = vmatpush.msrb.mxu3 %v1972_v55  ;;  %2682 = vmatpush.msra.mxu2 %v2185_v59  ;;  %v1968_v35 = vld [vmem:[%s8414_s1 + $0x1a8] sm:$0xff]  ;;  %v2149_v55 = vld [vmem:[%s8414_s1 + $0x750] sm:$0xff] }
 0x3ed   : > { %4283 = vrot.lane.b32.xlu2 %v4282_v60, %s4408_s29  ;;  %1842 = vrot.lane.b32.xlu1 %v6352_v7, %s4409_s25  ;;  %v1344_v7 = vmax.f32 %v6359_v31, %v1298_v19  ;;  %v6856_v60 = vmax.f32 %v5966_v21, %v6424_v54  ;;  %v2181_v59 = vld [vmem:[%s8414_s1 + $0x850] sm:$0xff]  ;;  %v2219_v21 = vld [vmem:[%s8414_s1 + $0x980] sm:$0xff] }
 0x3ee   : > { %2734 = vmatpush.msrb.mxu1 %v2223_v10  ;;  %2788 = vmatpush.msrb.mxu3 %v1970_v43  ;;  %v1966_v31 = vld [vmem:[%s8414_s1 + $0x198] sm:$0xff]  ;;  %v2179_v43 = vld [vmem:[%s8414_s1 + $0x840] sm:$0xff] }
 0x3ef   : > { %1844 = vrot.lane.b32.xlu0 %v6393_v1, %s4409_s25  ;;  %v6860_v58 = vpop.f32.mrf.mxu3  ;;  %2628 = vmatpush.msra.mxu0 %v2151_v25  ;;  %v2147_v1 = vld [vmem:[%s8414_s1 + $0x740] sm:$0xff]  ;;  %v1390_v25 = vmax.f32 %v1344_v7, 0.0  ;;  %v2145_v7 = vld [vmem:[%s8414_s1 + $0x730] sm:$0xff] }
 0x3f0   : > { %8682 = vst [vmem:[#allocation28_spill] sm:$0xff] %v6860_v58  ;;  %2683 = vmatpush.msra.mxu2 %v2183_v34  ;;  %2735 = vmatpush.msrb.mxu1 %v2221_v30  ;;  %v1346_v34 = vmax.f32 %v1298_v19, %v6856_v60  ;;  %v2217_v30 = vld [vmem:[%s8414_s1 + $0x970] sm:$0xff] }
 0x3f1   : > { %2789 = vmatpush.msrb.mxu3 %v1968_v35  ;;  %2629 = vmatpush.msra.mxu0 %v2149_v55  ;;  %v1964_v35 = vld [vmem:[%s8414_s1 + $0x188] sm:$0xff]  ;;  %v2177_v55 = vld [vmem:[%s8414_s1 + $0x830] sm:$0xff] }
 0x3f2   : > { %v6868_v10 = vpop.f32.mrf.mxu2  ;;  %v2421_v40 = vpop.f32.mrf.mxu0  ;;  %2684 = vmatpush.msra.mxu2 %v2181_v59  ;;  %2736 = vmatpush.msrb.mxu1 %v2219_v21  ;;  %v2215_v59 = vld [vmem:[%s8414_s1 + $0x960] sm:$0xff]  ;;  %v1962_v21 = vld [vmem:[%s8414_s1 + $0x178] sm:$0xff] }
 0x3f3   : > { %8683 = vst [vmem:[#allocation84_spill] sm:$0xff] %v6868_v10  ;;  %v2536_v54 = vpop.f32.mrf.mxu1  ;;  %2790 = vmatpush.msrb.mxu3 %v1966_v31  ;;  %2630 = vmatpush.msra.mxu0 %v2147_v1  ;;  %v1392_v31 = vmax.f32 %v1346_v34, 0.0  ;;  %v2213_v34 = vld [vmem:[%s8414_s1 + $0x950] sm:$0xff] }
 0x3f4   : > { %v6889_v54 = vpop.permute.xlu0 %4233  ;;  %2685 = vmatpush.msra.mxu2 %v2179_v43  ;;  %2737 = vmatpush.msrb.mxu1 %v2217_v30 }
 0x3f5   : > { %v8515_v19 = vunpack.i.l.bf16 %v6889_v54  ;;  %1848 = vrot.lane.b32.xlu2 %v1390_v25, %s4409_s25  ;;  %1846 = vrot.lane.b32.xlu1 %v6354_v3, %s4409_s25  ;;  %v8684_v3 = vunpack.i.h.bf16 %v6705_v57 }
 0x3f6   : > { %2791 = vmatpush.msrb.mxu3 %v1964_v35  ;;  %2631 = vmatpush.msra.mxu0 %v2145_v7  ;;  %v4287_v35 = vpack.i.bf16 %v1392_v31, %v1390_v25  ;;  %v2211_v7 = vld [vmem:[%s8414_s1 + $0x940] sm:$0xff]  ;;  %v1803_v25 = vpop.permute.xlu2 %1802 }
 0x3f7   : > { %1850 = vrot.lane.b32.xlu0 %v6460_v8, %s4409_s25  ;;  %v2586_v1 = vpop.f32.mrf.mxu3  ;;  %v6914_v43 = vsel %vm1737_vm9, %v8684_v3, %v8515_v19  ;;  %2686 = vmatpush.msra.mxu2 %v2177_v55  ;;  %v1960_v8 = vld [vmem:[%s8414_s1 + $0x168] sm:$0xff]  ;;  %v1958_v55 = vld [vmem:[%s8414_s1 + $0x158] sm:$0xff] }
 0x3f8   : > { %8685 = vst [vmem:[#allocation85_spill] sm:$0xff] %v6914_v43  ;;  %2607 = vmatmul.f32.gmra.mxu3 %v6914_v43  ;;  %2738 = vmatpush.msrb.mxu1 %v2215_v59  ;;  %v8516_v1 = vunpack.i.h.bf16 %v6889_v54  ;;  %v2209_v59 = vld [vmem:[%s8414_s1 + $0x930] sm:$0xff] }
 0x3f9   : > { %2792 = vmatpush.msrb.mxu3 %v1962_v21 }
 0x3fa   : > { %v2476_v40 = vpop.f32.mrf.mxu2  ;;  %v6925_v57 = vpop.f32.mrf.mxu0  ;;  %2739 = vmatpush.msrb.mxu1 %v2213_v34  ;;  %v8689_v34 = vunpack.i.h.bf16 %v6579_v13  ;;  %v8692_v13 = vunpack.i.h.bf16 %v6772_v17 }
 0x3fb   : > { %v6923_v30 = vpop.f32.mrf.mxu1  ;;  %8687 = vst [vmem:[#allocation87_spill] sm:$0xff] %v6925_v57  ;;  %2793 = vmatpush.msrb.mxu3 %v1960_v8  ;;  %v8702_v57 = vunpack.i.h.bf16 %v6177_v63 }
 0x3fc   : > { %8686 = vst [vmem:[#allocation86_spill] sm:$0xff] %v6923_v30  ;;  %v4249_v3 = vpop.permute.xlu0 %4248  ;;  %2740 = vmatpush.msrb.mxu1 %v2211_v7  ;;  %v6961_v7 = vsel %vm1737_vm9, %v8692_v13, %v8516_v1 }
 0x3fd   : > { %v4251_v40 = vunpack.i.h.bf16 %v4249_v3  ;;  %v4250_v19 = vunpack.i.l.bf16 %v4249_v3  ;;  %1852 = vrot.lane.b32.xlu2 %v1392_v31, %s4409_s25  ;;  %4288 = vrot.lane.b32.xlu1 %v4287_v35, %s4408_s29  ;;  %v1956_v31 = vld [vmem:[%s8414_s1 + $0x148] sm:$0xff]  ;;  %8693 = vst [vmem:[#allocation91_spill] sm:$0xff] %v6961_v7  ;;  %s4410_s29 = smov 108  }
 0x3fe   : > { %2794 = vmatpush.msrb.mxu3 %v1958_v55  ;;  %2741 = vmatpush.msrb.mxu1 %v2209_v59  ;;  %v1954_v55 = vld [vmem:[%s8414_s1 + $0x138] sm:$0xff]  ;;  %v1807_v30 = vpop.permute.xlu2 %1806 }
 0x3ff   : > { %v6939_v21 = vpop.f32.mrf.mxu3  ;;  %v6944_v8 = vsel %vm1612_vm8, %v8689_v34, %v4250_v19  ;;  %v6947_v3 = vsel %vm1612_vm8, %v4250_v19, %v4251_v40 }
 0x400   : > { %8688 = vst [vmem:[#allocation88_spill] sm:$0xff] %v6939_v21  ;;  %2502 = vmatmul.f32.gmra.mxu2 %v6944_v8  ;;  %2557 = vmatmul.f32.gmra.mxu1 %v6947_v3 }
 0x401   : > { %8690 = vst [vmem:[#allocation89_spill] sm:$0xff] %v6944_v8  ;;  %2610 = vmatmul.f32.gmra.mxu3 %v6961_v7 }
 0x402   : > { %v6952_v35 = vpop.f32.mrf.mxu2  ;;  %v2426_v34 = vpop.f32.mrf.mxu0  ;;  %2795 = vmatpush.msrb.mxu3 %v1956_v31 }
 0x403   : > { %8691 = vst [vmem:[#allocation90_spill] sm:$0xff] %v6952_v35  ;;  %v2541_v19 = vpop.f32.mrf.mxu1 }
 0x404   : > { %2796 = vmatpush.msrb.mxu3 %v1954_v55  ;;  %v4259_v58 = vpop.permute.xlu0 %4258 }
 0x407   : > { %v2591_v10 = vpop.f32.mrf.mxu3 }
 0x40a   : > { %v2481_v21 = vpop.f32.mrf.mxu2  ;;  %v6969_v17 = vpop.f32.mrf.mxu0 }
 0x40b   : > { %v6967_v9 = vpop.f32.mrf.mxu1  ;;  %8695 = vst [vmem:[#allocation93_spill] sm:$0xff] %v6969_v17  ;;  %v8699_v21 = vunpack.i.l.bf16 %v6177_v63  ;;  %v4261_v63 = vunpack.i.h.bf16 %v4259_v58 }
 0x40c   : > { %8694 = vst [vmem:[#allocation92_spill] sm:$0xff] %v6967_v9  ;;  %v1809_v9 = vpop.permute.xlu0 %1808 }
 0x40d   : > { %v6971_v13 = vpop.permute.xlu1 %4253 }
 0x40e   : > { %v4256_v19 = vunpack.i.h.bf16 %v6971_v13  ;;  %v8517_v59 = vunpack.i.l.bf16 %v6971_v13 }
 0x40f   : > { %v6975_v1 = vpop.f32.mrf.mxu3 }
 0x410   : > { %8696 = vst [vmem:[#allocation94_spill] sm:$0xff] %v6975_v1  ;;  %v6982_v10 = vsel %vm1737_vm9, %v4251_v40, %v8517_v59  ;;  %v6987_v31 = vsel %vm1737_vm9, %v8699_v21, %v4256_v19  ;;  %v6990_v55 = vsel %vm1862_vm11, %v4256_v19, %v1803_v25  ;;  %v4260_v40 = vunpack.i.l.bf16 %v4259_v58 }
 0x411   : > { %8698 = vst [vmem:[#allocation96_spill] sm:$0xff] %v6982_v10  ;;  %2612 = vmatmul.f32.gmra.mxu3 %v6982_v10  ;;  %2632 = vmatmul.f32.vlgmr.msra.gmra.mxu0 %v6987_v31 }
 0x412   : > { %v6977_v34 = vpop.f32.mrf.mxu2  ;;  %8700 = vst [vmem:[#allocation97_spill] sm:$0xff] %v6987_v31  ;;  %2687 = vmatmul.f32.vlgmr.msra.gmra.mxu2 %v6990_v55  ;;  %v2431_v17 = vpop.f32.mrf.mxu0  ;;  %v7003_v10 = vsel %vm1737_vm9, %v8702_v57, %v4260_v40  ;;  %v7017_v57 = vsel %vm1862_vm11, %v1807_v30, %v1809_v9 }
 0x413   : > { %8697 = vst [vmem:[#allocation95_spill] sm:$0xff] %v6977_v34  ;;  %v2546_v1 = vpop.f32.mrf.mxu1  ;;  %v4264_v34 = vpop.permute.xlu2 %4263  ;;  %v8705_v17 = vld [vmem:[#allocation9_spill] sm:$0xff] }
 0x414   : > { %8701 = vst [vmem:[#allocation98_spill] sm:$0xff] %v6990_v55  ;;  %v7007_v1 = vsel %vm1862_vm11, %v4260_v40, %v1807_v30  ;;  %v8706_v7 = vmax.f32 %v8705_v17, 0.0 }
 0x415   : > { %v1805_v59 = vpop.permute.xlu1 %1804  ;;  %8703 = vst [vmem:[#allocation99_spill] sm:$0xff] %v7003_v10 }
 0x416   : > { %v6996_v35 = vsel %vm1862_vm11, %v1803_v25, %v1805_v59  ;;  %8704 = vst [vmem:[#allocation100_spill] sm:$0xff] %v7007_v1 }
 0x417   : > { %3757 = vmatmul.msk.f32.vlgmr.msrb.gmra.mxu1 %vm2248_vm12, %v6996_v35  ;;  %v2596_v19 = vpop.f32.mrf.mxu3 }
 0x418   : > { %v1813_v19 = vpop.permute.xlu0 %1812 }
 0x419   : > { %2635 = vmatmul.f32.gmra.mxu0 %v7003_v10  ;;  %2797 = vmatmul.f32.vlgmr.msrb.gmra.mxu3 %v8706_v7  ;;  %v8711_v7 = vunpack.i.l.bf16 %v6139_v32 }
 0x41a   : > { %v2486_v21 = vpop.f32.mrf.mxu2  ;;  %2690 = vmatmul.f32.gmra.mxu2 %v7007_v1  ;;  %v7014_v59 = vpop.f32.mrf.mxu0  ;;  %v4265_v1 = vunpack.i.l.bf16 %v4264_v34 }
 0x41b   : > { %v7011_v25 = vpop.f32.mrf.mxu1  ;;  %8708 = vst [vmem:[#allocation101_spill] sm:$0xff] %v7014_v59  ;;  %v1817_v21 = vpop.permute.xlu2 %1816  ;;  %v8714_v59 = vld [vmem:[#allocation12_spill] sm:$0xff] }
 0x41c   : > { %8707 = vst [vmem:[#allocation9_spill] sm:$0xff] %v7011_v25  ;;  %v7028_v25 = vsel %vm1737_vm9, %v8711_v7, %v4261_v63 }
 0x41d   : > { %v1811_v43 = vpop.permute.xlu1 %1810  ;;  %8712 = vst [vmem:[#allocation104_spill] sm:$0xff] %v7028_v25 }
 0x41e   : > { %v7032_v58 = vsel %vm1862_vm11, %v4261_v63, %v1811_v43  ;;  %v7037_v55 = vsel %vm1862_vm11, %v1811_v43, %v1813_v19  ;;  %v8715_v63 = vunpack.i.h.bf16 %v6139_v32  ;;  %v4266_v19 = vunpack.i.h.bf16 %v4264_v34 }
 0x41f   : > { %3758 = vmatmul.msk.f32.gmra.mxu1 %vm2248_vm12, %v7017_v57  ;;  %v7021_v40 = vpop.f32.mrf.mxu3  ;;  %8713 = vst [vmem:[#allocation105_spill] sm:$0xff] %v7032_v58 }
 0x420   : > { %8709 = vst [vmem:[#allocation102_spill] sm:$0xff] %v7021_v40  ;;  %v1819_v40 = vpop.permute.xlu0 %1818 }
 0x421   : > { %2637 = vmatmul.f32.gmra.mxu0 %v7028_v25  ;;  %2800 = vmatmul.f32.gmra.mxu3 %v8714_v59  ;;  %v7044_v59 = vsel %vm1737_vm9, %v8715_v63, %v4265_v1  ;;  %v7068_v34 = vsel %vm1862_vm11, %v4266_v19, %v1819_v40 }
 0x422   : > { %v7023_v17 = vpop.f32.mrf.mxu2  ;;  %2692 = vmatmul.f32.gmra.mxu2 %v7032_v58  ;;  %v2436_v30 = vpop.f32.mrf.mxu0  ;;  %8716 = vst [vmem:[#allocation12_spill] sm:$0xff] %v7044_v59 }
 0x423   : > { %8710 = vst [vmem:[#allocation103_spill] sm:$0xff] %v7023_v17  ;;  %v2551_v9 = vpop.f32.mrf.mxu1  ;;  %v1821_v17 = vpop.permute.xlu2 %1820  ;;  %v8718_v30 = vld [vmem:[#allocation5_spill] sm:$0xff] }
 0x424   : > { %8723 = vst [vmem:[#allocation109_spill] sm:$0xff] %v7068_v34 }
 0x425   : > { %v1815_v10 = vpop.permute.xlu1 %1814 }
 0x426   : > { %v7048_v9 = vsel %vm1862_vm11, %v4265_v1, %v1815_v10  ;;  %v8721_v1 = vunpack.i.l.bf16 %v6173_v48 }
 0x427   : > { %3759 = vmatmul.msk.f32.gmra.mxu1 %vm2248_vm12, %v7037_v55  ;;  %v2601_v7 = vpop.f32.mrf.mxu3  ;;  %8717 = vst [vmem:[#allocation106_spill] sm:$0xff] %v7048_v9 }
 0x428   : > { %v1823_v32 = vpop.permute.xlu0 %1822 }
 0x429   : > { %2640 = vmatmul.f32.gmra.mxu0 %v7044_v59  ;;  %2802 = vmatmul.f32.gmra.mxu3 %v8718_v30  ;;  %v7064_v30 = vsel %vm1737_vm9, %v8721_v1, %v4266_v19  ;;  %v7073_v59 = vsel %vm1862_vm11, %v1819_v40, %v1821_v17 }
 0x42a   : > { %v2491_v25 = vpop.f32.mrf.mxu2  ;;  %2695 = vmatmul.f32.gmra.mxu2 %v7048_v9  ;;  %v7052_v43 = vpop.f32.mrf.mxu0  ;;  %8722 = vst [vmem:[#allocation108_spill] sm:$0xff] %v7064_v30 }
 0x42b   : > { %8719 = vst [vmem:[#allocation5_spill] sm:$0xff] %v7052_v43  ;;  %v7055_v25 = vsel %vm1862_vm11, %v1815_v10, %v1817_v21  ;;  %v1827_v7 = vpop.permute.xlu2 %1826  ;;  %v8724_v43 = vld [vmem:[#allocation6_spill] sm:$0xff] }
 0x42d   : > { %v4269_v58 = vpop.permute.xlu1 %4268 }
 0x42e   : > { %v4270_v21 = vunpack.i.l.bf16 %v4269_v58 }
 0x42f   : > { %3760 = vmatmul.msk.f32.gmra.mxu1 %vm2248_vm12, %v7055_v25 }
 0x430   : > { %v7082_v19 = vpop.permute.xlu0 %4273 }
 0x431   : > { %2642 = vmatmul.f32.gmra.mxu0 %v7064_v30  ;;  %2805 = vmatmul.f32.gmra.mxu3 %v8724_v43  ;;  %v7086_v43 = vsel %vm1862_vm11, %v4270_v21, %v1823_v32  ;;  %v4275_v8 = vunpack.i.l.bf16 %v7082_v19 }
 0x432   : > { %v7059_v63 = vpop.f32.mrf.mxu2  ;;  %2697 = vmatmul.f32.gmra.mxu2 %v7068_v34  ;;  %v2441_v10 = vpop.f32.mrf.mxu0  ;;  %8727 = vst [vmem:[#allocation110_spill] sm:$0xff] %v7086_v43 }
 0x433   : > { %8720 = vst [vmem:[#allocation107_spill] sm:$0xff] %v7059_v63  ;;  %v8725_v63 = vunpack.i.h.bf16 %v6173_v48  ;;  %v8728_v10 = vld [vmem:[#allocation7_spill] sm:$0xff]  ;;  %v1831_v40 = vpop.permute.xlu2 %1830  ;;  %v2048_v48 = vld [vmem:[%s8414_s1 + $0x428] sm:$0xff] }
 0x434   : > { %2891 = vmatpush.msrb.mxu2 %v2048_v48 }
 0x435   : > { %v1825_v9 = vpop.permute.xlu1 %1824  ;;  %v7080_v30 = vsel %vm1737_vm9, %v8725_v63, %v4270_v21  ;;  %v2016_v21 = vld [vmem:[%s8414_s1 + $0x328] sm:$0xff] }
 0x436   : > { %8726 = vst [vmem:[#allocation6_spill] sm:$0xff] %v7080_v30  ;;  %v7096_v63 = vsel %vm1862_vm11, %v1823_v32, %v1825_v9  ;;  %2836 = vmatpush.msrb.mxu0 %v2016_v21  ;;  %v8732_v32 = vld [vmem:[#allocation8_spill] sm:$0xff] }
 0x437   : > { %3761 = vmatmul.msk.f32.gmra.mxu1 %vm2248_vm12, %v7073_v59  ;;  %v2080_v21 = vld [vmem:[%s8414_s1 + $0x528] sm:$0xff] }
 0x438   : > { %2946 = vmatpush.msra.mxu1 %v2080_v21  ;;  %v2044_v21 = vld [vmem:[%s8414_s1 + $0x408] sm:$0xff] }
 0x439   : > { %2645 = vmatmul.f32.gmra.mxu0 %v7080_v30  ;;  %2807 = vmatmul.f32.gmra.mxu3 %v8728_v10  ;;  %v8729_v10 = vunpack.i.l.bf16 %v6223_v56 }
 0x43a   : > { %v2496_v1 = vpop.f32.mrf.mxu2  ;;  %2700 = vmatmul.f32.gmra.mxu2 %v7086_v43  ;;  %v7090_v17 = vpop.f32.mrf.mxu0 }
 0x43b   : > { %v4271_v1 = vunpack.i.h.bf16 %v4269_v58  ;;  %v2112_v58 = vld [vmem:[%s8414_s1 + $0x628] sm:$0xff]  ;;  %v1833_v31 = vpop.permute.xlu2 %1832 }
 0x43c   : > { %3001 = vmatpush.msra.mxu3 %v2112_v58 }
 0x43d   : > { %v1829_v30 = vpop.permute.xlu1 %1828  ;;  %v7109_v43 = vsel %vm1737_vm9, %v8729_v10, %v4271_v1  ;;  %v7113_v9 = vsel %vm1862_vm11, %v4271_v1, %v1827_v7  ;;  %v2046_v10 = vld [vmem:[%s8414_s1 + $0x418] sm:$0xff] }
 0x43e   : > { %8730 = vst [vmem:[#allocation7_spill] sm:$0xff] %v7109_v43  ;;  %2892 = vmatpush.msrb.mxu2 %v2046_v10  ;;  %v7125_v1 = vsel %vm1862_vm11, %v1827_v7, %v1829_v30  ;;  %v2014_v10 = vld [vmem:[%s8414_s1 + $0x318] sm:$0xff] }
 0x43f   : > { %3762 = vmatmul.msk.f32.gmra.mxu1 %vm2248_vm12, %v7096_v63  ;;  %8731 = vst [vmem:[#allocation111_spill] sm:$0xff] %v7113_v9  ;;  %v2110_v7 = vld [vmem:[%s8414_s1 + $0x618] sm:$0xff]  ;;  %2837 = vmatpush.msrb.mxu0 %v2014_v10 }
 0x440   : > { %3002 = vmatpush.msra.mxu3 %v2110_v7  ;;  %2893 = vmatpush.msrb.mxu2 %v2044_v21  ;;  %v7165_v7 = vsel %vm1862_vm11, %v1831_v40, %v1833_v31  ;;  %v2010_v31 = vld [vmem:[%s8414_s1 + $0x2f8] sm:$0xff] }
 0x441   : > { %2647 = vmatmul.f32.gmra.mxu0 %v7109_v43  ;;  %2810 = vmatmul.f32.gmra.mxu3 %v8732_v32  ;;  %v1177_v48 = vpop.permute.xlu0 %1176 }
 0x442   : > { %2702 = vmatmul.f32.gmra.mxu2 %v7113_v9  ;;  %v2446_v34 = vpop.f32.mrf.mxu0  ;;  %v8733_v9 = vunpack.i.h.bf16 %v6223_v56 }
 0x443   : > { %v1183_v10 = vpop.permute.xlu2 %1182 }
 0x444   : > { %v7134_v43 = vsel %vm1737_vm9, %v8733_v9, %v4275_v8  ;;  %v1304_v21 = vmax.f32 %v6693_v26, %v1183_v10 }
 0x447   : > { %3763 = vmatmul.msk.f32.gmra.mxu1 %vm2248_vm12, %v7125_v1  ;;  %v1179_v34 = vpop.permute.xlu1 %1178 }
 0x448   : > { %v1207_v58 = vsel %vm1184_vm6, %v1177_v48, %v1179_v34  ;;  %v1302_v32 = vmax.f32 %v6640_v46, %v1179_v34  ;;  %v7145_v48 = vsel %vm1862_vm11, %v4275_v8, %v1831_v40  ;;  %v8735_v46 = vld [vmem:[#allocation10_spill] sm:$0xff]  ;;  %v2012_v8 = vld [vmem:[%s8414_s1 + $0x308] sm:$0xff] }
 0x449   : > { %v1301_v30 = vmax.f32 %v6627_v0, %v1207_v58  ;;  %2650 = vmatmul.f32.gmra.mxu0 %v7134_v43  ;;  %8734 = vst [vmem:[#allocation8_spill] sm:$0xff] %v7145_v48  ;;  %2812 = vmatmul.f32.gmra.mxu3 %v8735_v46  ;;  %v1835_v56 = vpop.permute.xlu0 %1834  ;;  %v2078_v0 = vld [vmem:[%s8414_s1 + $0x518] sm:$0xff]  ;;  %v4276_v58 = vunpack.i.h.bf16 %v7082_v19 }
 0x44a   : > { %v1348_v9 = vmax.f32 %v6856_v60, %v1302_v32  ;;  %2705 = vmatmul.f32.gmra.mxu2 %v7145_v48  ;;  %v2108_v60 = vld [vmem:[%s8414_s1 + $0x608] sm:$0xff]  ;;  %2947 = vmatpush.msra.mxu1 %v2078_v0  ;;  %v1350_v40 = vmax.f32 %v1302_v32, %v1304_v21  ;;  %v2042_v32 = vld [vmem:[%s8414_s1 + $0x3f8] sm:$0xff] }
 0x44b   : > { %v1347_v34 = vmax.f32 %v6430_v36, %v1301_v30  ;;  %2838 = vmatpush.msrb.mxu0 %v2012_v8  ;;  %3003 = vmatpush.msra.mxu3 %v2108_v60  ;;  %v7184_v0 = vsel %vm1862_vm11, %v4276_v58, %v1835_v56  ;;  %v8737_v8 = vld [vmem:[#allocation11_spill] sm:$0xff]  ;;  %v2008_v60 = vld [vmem:[%s8414_s1 + $0x2e8] sm:$0xff] }
 0x44c   : > { %v1394_v46 = vmax.f32 %v1348_v9, 0.0  ;;  %v8736_v9 = vunpack.i.l.bf16 %v6436_v39  ;;  %2894 = vmatpush.msrb.mxu2 %v2042_v32  ;;  %v1396_v21 = vmax.f32 %v1350_v40, 0.0  ;;  %v2002_v40 = vld [vmem:[%s8414_s1 + $0x2b8] sm:$0xff] }
 0x44d   : > { %v1393_v36 = vmax.f32 %v1347_v34, 0.0  ;;  %2839 = vmatpush.msrb.mxu0 %v2010_v31 }
 0x44e   : > { %1856 = vrot.lane.b32.xlu1 %v1394_v46, %s4409_s25  ;;  %v7176_v34 = vsel %vm1737_vm9, %v8736_v9, %v4276_v58  ;;  %v2106_v46 = vld [vmem:[%s8414_s1 + $0x5f8] sm:$0xff]  ;;  %v2004_v9 = vld [vmem:[%s8414_s1 + $0x2c8] sm:$0xff] }
 0x44f   : > { %3764 = vmatmul.msk.f32.gmra.mxu1 %vm2248_vm12, %v7165_v7  ;;  %v1181_v48 = vpop.permute.xlu1 %1180  ;;  %1854 = vrot.lane.b32.xlu0 %v1393_v36, %s4409_s25 }
 0x450   : > { %v1208_v19 = vsel %vm1184_vm6, %v1181_v48, %v1183_v10  ;;  %v2006_v10 = vld [vmem:[%s8414_s1 + $0x2d8] sm:$0xff]  ;;  %2840 = vmatpush.msrb.mxu0 %v2008_v60  ;;  %3004 = vmatpush.msra.mxu3 %v2106_v46 }
 0x451   : > { %v1303_v26 = vmax.f32 %v6690_v41, %v1208_v19  ;;  %2652 = vmatmul.f32.gmra.mxu0 %v7176_v34  ;;  %2815 = vmatmul.f32.gmra.mxu3 %v8737_v8  ;;  %v4279_v48 = vpop.permute.xlu0 %4278  ;;  %v2076_v41 = vld [vmem:[%s8414_s1 + $0x508] sm:$0xff]  ;;  %v8738_v8 = vunpack.i.h.bf16 %v6436_v39 }
 0x452   : > { %2707 = vmatmul.f32.gmra.mxu2 %v7184_v0  ;;  %2948 = vmatpush.msra.mxu1 %v2076_v41  ;;  %v4280_v36 = vunpack.i.l.bf16 %v4279_v48  ;;  %v2000_v39 = vld [vmem:[%s8414_s1 + $0x2a8] sm:$0xff]  ;;  %v4281_v46 = vunpack.i.h.bf16 %v4279_v48  ;;  %v8742_v48 = vunpack.i.l.bf16 %v6648_v61 }
 0x453   : > { %v1349_v58 = vmax.f32 %v1301_v30, %v1303_v26  ;;  %2841 = vmatpush.msrb.mxu0 %v2006_v10  ;;  %v1839_v30 = vpop.permute.xlu2 %1838  ;;  %v2040_v41 = vld [vmem:[%s8414_s1 + $0x3e8] sm:$0xff] }
 0x454   : > { %v7214_v60 = vsel %vm1737_vm9, %v8738_v8, %v4280_v36  ;;  %v7221_v32 = vsel %vm1862_vm11, %v4280_v36, %v1839_v30  ;;  %2895 = vmatpush.msrb.mxu2 %v2040_v41  ;;  %v1998_v36 = vld [vmem:[%s8414_s1 + $0x298] sm:$0xff]  ;;  %v7255_v8 = vsel %vm1737_vm9, %v8742_v48, %v4281_v46  ;;  %v1996_v41 = vld [vmem:[%s8414_s1 + $0x288] sm:$0xff] }
 0x455   : > { %v1395_v19 = vmax.f32 %v1349_v58, 0.0  ;;  %8739 = vst [vmem:[#allocation10_spill] sm:$0xff] %v7214_v60  ;;  %2842 = vmatpush.msrb.mxu0 %v2004_v9  ;;  %v2104_v58 = vld [vmem:[%s8414_s1 + $0x5e8] sm:$0xff] }
 0x456   : > { %8740 = vst [vmem:[#allocation11_spill] sm:$0xff] %v7221_v32  ;;  %3005 = vmatpush.msra.mxu3 %v2104_v58  ;;  %v2100_v9 = vld [vmem:[%s8414_s1 + $0x5c8] sm:$0xff] }
 0x457   : > { %v1837_v31 = vpop.permute.xlu1 %1836  ;;  %1858 = vrot.lane.b32.xlu2 %v1395_v19, %s4409_s25  ;;  %1860 = vrot.lane.b32.xlu0 %v1396_v21, %s4409_s25  ;;  %v2102_v21 = vld [vmem:[%s8414_s1 + $0x5d8] sm:$0xff]  ;;  %8743 = vst [vmem:[#allocation113_spill] sm:$0xff] %v7255_v8 }
 0x458   : > { %v7209_v26 = vsel %vm1862_vm11, %v1835_v56, %v1837_v31  ;;  %2843 = vmatpush.msrb.mxu0 %v2002_v40  ;;  %3006 = vmatpush.msra.mxu3 %v2102_v21 }
 0x459   : > { %2655 = vmatmul.f32.gmra.mxu0 %v7214_v60  ;;  %2817 = vmatmul.f32.gmra.mxu3 %v5454_v38  ;;  %v1841_v56 = vpop.permute.xlu0 %1840  ;;  %v2074_v38 = vld [vmem:[%s8414_s1 + $0x4f8] sm:$0xff] }
 0x45a   : > { %2710 = vmatmul.f32.gmra.mxu2 %v7221_v32  ;;  %3765 = vmatmul.msk.f32.gmra.mxu1 %vm2248_vm12, %v7209_v26 }
 0x45b   : > { %v7236_v10 = vpop.f32.mrf.mxu3  ;;  %2949 = vmatpush.msra.mxu1 %v2074_v38  ;;  %2844 = vmatpush.msrb.mxu0 %v2000_v39  ;;  %v2098_v39 = vld [vmem:[%s8414_s1 + $0x5b8] sm:$0xff]  ;;  %v4284_v58 = vpop.permute.xlu2 %4283  ;;  %v7267_v38 = vsel %vm1862_vm11, %v1839_v30, %v1841_v56 }
 0x45c   : > { %8741 = vst [vmem:[#allocation112_spill] sm:$0xff] %v7236_v10  ;;  %3007 = vmatpush.msra.mxu3 %v2100_v9  ;;  %v1994_v30 = vld [vmem:[%s8414_s1 + $0x278] sm:$0xff]  ;;  %v4285_v21 = vunpack.i.l.bf16 %v4284_v58  ;;  %v1992_v10 = vld [vmem:[%s8414_s1 + $0x268] sm:$0xff] }
 0x45d   : > { %v7247_v19 = vpop.f32.mrf.mxu1  ;;  %2845 = vmatpush.msrb.mxu0 %v1998_v36  ;;  %v2072_v36 = vld [vmem:[%s8414_s1 + $0x4e8] sm:$0xff] }
 0x45e   : > { %3008 = vmatpush.msra.mxu3 %v2098_v39  ;;  %2950 = vmatpush.msra.mxu1 %v2072_v36 }
 0x45f   : > { %v1843_v31 = vpop.permute.xlu1 %1842  ;;  %2846 = vmatpush.msrb.mxu0 %v1996_v41  ;;  %v8745_v41 = vunpack.i.h.bf16 %v6648_v61  ;;  %v2036_v61 = vld [vmem:[%s8414_s1 + $0x3c8] sm:$0xff] }
 0x460   : > { %v7258_v40 = vsel %vm1862_vm11, %v4281_v46, %v1843_v31  ;;  %v2038_v46 = vld [vmem:[%s8414_s1 + $0x3d8] sm:$0xff] }
 0x461   : > { %8744 = vst [vmem:[#allocation114_spill] sm:$0xff] %v7258_v40  ;;  %2657 = vmatmul.f32.gmra.mxu0 %v7255_v8  ;;  %2820 = vmatmul.f32.gmra.mxu3 %v5456_v33  ;;  %v2096_v33 = vld [vmem:[%s8414_s1 + $0x5a8] sm:$0xff]  ;;  %v1845_v9 = vpop.permute.xlu0 %1844  ;;  %v7297_v39 = vsel %vm1737_vm9, %v8745_v41, %v4285_v21 }
 0x462   : > { %2712 = vmatmul.f32.gmra.mxu2 %v7258_v40  ;;  %3766 = vmatmul.msk.f32.gmra.mxu1 %vm2248_vm12, %v7267_v38  ;;  %v2094_v40 = vld [vmem:[%s8414_s1 + $0x598] sm:$0xff]  ;;  %8746 = vst [vmem:[#allocation115_spill] sm:$0xff] %v7297_v39  ;;  %v7309_v36 = vsel %vm1862_vm11, %v1843_v31, %v1845_v9  ;;  %v1988_v31 = vld [vmem:[%s8414_s1 + $0x248] sm:$0xff] }
 0x463   : > { %v7286_v56 = vpop.f32.mrf.mxu2  ;;  %2896 = vmatpush.msrb.mxu2 %v2038_v46  ;;  %2847 = vmatpush.msrb.mxu0 %v1994_v30  ;;  %v1990_v46 = vld [vmem:[%s8414_s1 + $0x258] sm:$0xff]  ;;  %v4286_v30 = vunpack.i.h.bf16 %v4284_v58  ;;  %v1849_v9 = vpop.permute.xlu2 %1848 }
 0x464   : > { %3009 = vmatpush.msra.mxu3 %v2096_v33  ;;  %v1986_v33 = vld [vmem:[%s8414_s1 + $0x238] sm:$0xff] }
 0x465   : > { %v2606_v48 = vpop.f32.mrf.mxu3  ;;  %v2556_v8 = vpop.f32.mrf.mxu1  ;;  %2848 = vmatpush.msrb.mxu0 %v1992_v10  ;;  %v2070_v10 = vld [vmem:[%s8414_s1 + $0x4d8] sm:$0xff]  ;;  %2897 = vmatpush.msrb.mxu2 %v2036_v61 }
 0x466   : > { %3010 = vmatpush.msra.mxu3 %v2094_v40  ;;  %v2092_v8 = vld [vmem:[%s8414_s1 + $0x588] sm:$0xff]  ;;  %2951 = vmatpush.msra.mxu1 %v2070_v10 }
 0x467   : > { %v1847_v32 = vpop.permute.xlu1 %1846  ;;  %2849 = vmatpush.msrb.mxu0 %v1990_v46  ;;  %v8748_v46 = vunpack.i.l.bf16 %v6889_v54 }
 0x468   : > { %v7300_v48 = vsel %vm1862_vm11, %v4285_v21, %v1847_v32  ;;  %3011 = vmatpush.msra.mxu3 %v2092_v8  ;;  %v2088_v21 = vld [vmem:[%s8414_s1 + $0x568] sm:$0xff]  ;;  %v2086_v8 = vld [vmem:[%s8414_s1 + $0x558] sm:$0xff]  ;;  %v7343_v61 = vsel %vm1862_vm11, %v1847_v32, %v1849_v9 }
 0x469   : > { %8747 = vst [vmem:[#allocation116_spill] sm:$0xff] %v7300_v48  ;;  %2660 = vmatmul.f32.gmra.mxu0 %v7297_v39  ;;  %2822 = vmatmul.f32.gmra.mxu3 %v5514_v62  ;;  %v2090_v62 = vld [vmem:[%s8414_s1 + $0x578] sm:$0xff]  ;;  %v1851_v41 = vpop.permute.xlu0 %1850  ;;  %v7337_v58 = vsel %vm1737_vm9, %v8748_v46, %v4286_v30  ;;  %v2032_v46 = vld [vmem:[%s8414_s1 + $0x3a8] sm:$0xff] }
 0x46a   : > { %2715 = vmatmul.f32.gmra.mxu2 %v7300_v48  ;;  %3767 = vmatmul.msk.f32.gmra.mxu1 %vm2248_vm12, %v7309_v36  ;;  %8749 = vst [vmem:[#allocation117_spill] sm:$0xff] %v7337_v58 }
 0x46b   : > { %v2501_v40 = vpop.f32.mrf.mxu2  ;;  %2850 = vmatpush.msrb.mxu0 %v1988_v31  ;;  %3012 = vmatpush.msra.mxu3 %v2090_v62  ;;  %v7350_v31 = vsel %vm1862_vm11, %v4286_v30, %v1851_v41  ;;  %v2034_v62 = vld [vmem:[%s8414_s1 + $0x3b8] sm:$0xff] }
 0x46c   : > { %8750 = vst [vmem:[#allocation118_spill] sm:$0xff] %v7350_v31  ;;  %v2068_v40 = vld [vmem:[%s8414_s1 + $0x4c8] sm:$0xff]  ;;  %2898 = vmatpush.msrb.mxu2 %v2034_v62  ;;  %v2082_v30 = vld [vmem:[%s8414_s1 + $0x538] sm:$0xff] }
 0x46d   : > { %2851 = vmatpush.msrb.mxu0 %v1986_v33  ;;  %3013 = vmatpush.msra.mxu3 %v2088_v21  ;;  %v1853_v33 = vpop.permute.xlu2 %1852  ;;  %v8751_v21 = vunpack.i.h.bf16 %v6889_v54  ;;  %v2066_v62 = vld [vmem:[%s8414_s1 + $0x4b8] sm:$0xff] }
 0x46e   : > { %2952 = vmatpush.msra.mxu1 %v2068_v40  ;;  %2899 = vmatpush.msrb.mxu2 %v2032_v46  ;;  %v2028_v46 = vld [vmem:[%s8414_s1 + $0x388] sm:$0xff] }
 0x46f   : > { %v7345_v10 = vpop.permute.xlu1 %4288  ;;  %3014 = vmatpush.msra.mxu3 %v2086_v8  ;;  %v7379_v8 = vsel %vm1862_vm11, %v1851_v41, %v1853_v33  ;;  %v2030_v41 = vld [vmem:[%s8414_s1 + $0x398] sm:$0xff] }
 0x470   : > { %v8541_v32 = vunpack.i.l.bf16 %v7345_v10  ;;  %2953 = vmatpush.msra.mxu1 %v2066_v62  ;;  %v8540_v40 = vunpack.i.h.bf16 %v7345_v10  ;;  %2900 = vmatpush.msrb.mxu2 %v2030_v41  ;;  %v8755_v62 = vld [vmem:[#allocation13_spill] sm:$0xff] }
 0x471   : > { %2662 = vmatmul.f32.gmra.mxu0 %v7337_v58  ;;  %2825 = vmatmul.f32.gmra.mxu3 %v5516_v6  ;;  %v2084_v6 = vld [vmem:[%s8414_s1 + $0x548] sm:$0xff] }
 0x472   : > { %2717 = vmatmul.f32.gmra.mxu2 %v7350_v31  ;;  %3768 = vmatmul.msk.f32.gmra.mxu1 %vm2248_vm12, %v7343_v61  ;;  %v7373_v9 = vsel %vm1737_vm9, %v8751_v21, %v8541_v32  ;;  %v7406_v21 = vpop.f32.mrf.mxu0  ;;  %v2054_v31 = vld [vmem:[%s8414_s1 + $0x458] sm:$0xff] }
 0x473   : > { %3015 = vmatpush.msra.mxu3 %v2084_v6  ;;  %8752 = vst [vmem:[#allocation119_spill] sm:$0xff] %v7373_v9  ;;  %v8753_v6 = vunpack.i.l.bf16 %v6971_v13  ;;  %v2062_v13 = vld [vmem:[%s8414_s1 + $0x498] sm:$0xff]  ;;  %2901 = vmatpush.msrb.mxu2 %v2028_v46  ;;  %v8758_v46 = vld [vmem:[#allocation44_spill] sm:$0xff] }
 0x475   : > { %3016 = vmatpush.msra.mxu3 %v2082_v30  ;;  %v7402_v30 = vsel %vm1737_vm9, %v8753_v6, %v8540_v40  ;;  %v2026_v6 = vld [vmem:[%s8414_s1 + $0x378] sm:$0xff] }
 0x476   : > { %8754 = vst [vmem:[#allocation120_spill] sm:$0xff] %v7402_v30  ;;  %2902 = vmatpush.msrb.mxu2 %v2026_v6  ;;  %v2058_v6 = vld [vmem:[%s8414_s1 + $0x478] sm:$0xff] }
 0x479   : > { %2665 = vmatmul.f32.gmra.mxu0 %v7373_v9  ;;  %2827 = vmatmul.f32.gmra.mxu3 %v5563_v14  ;;  %v2064_v14 = vld [vmem:[%s8414_s1 + $0x4a8] sm:$0xff] }
 0x47a   : > { %3769 = vmatmul.msk.f32.gmra.mxu1 %vm2248_vm12, %v7379_v8  ;;  %v2056_v9 = vld [vmem:[%s8414_s1 + $0x468] sm:$0xff] }
 0x47b   : > { %v7388_v54 = vpop.f32.mrf.mxu3  ;;  %2954 = vmatpush.msra.mxu1 %v2064_v14 }
 0x47d   : > { %2955 = vmatpush.msra.mxu1 %v2062_v13  ;;  %v7416_v41 = vpop.f32.mrf.mxu1 }
 0x481   : > { %2667 = vmatmul.f32.gmra.mxu0 %v7402_v30  ;;  %2830 = vmatmul.f32.gmra.mxu3 %v8652_v27 }
 0x483   : > { %v7418_v27 = vpop.f32.mrf.mxu2 }
 0x484   : > { %v2611_v33 = vpop.f32.mrf.mxu3 }
 0x485   : > { %v2060_v33 = vld [vmem:[%s8414_s1 + $0x488] sm:$0xff] }
 0x486   : > { %2956 = vmatpush.msra.mxu1 %v2060_v33  ;;  %v8761_v33 = vld [vmem:[#allocation16_spill] sm:$0xff] }
 0x488   : > { %2957 = vmatpush.msra.mxu1 %v2058_v6 }
 0x489   : > { %2832 = vmatmul.f32.gmra.mxu3 %v5588_v23  ;;  %2852 = vmatmul.f32.vlgmr.msrb.gmra.mxu0 %v8755_v62  ;;  %v8757_v23 = vld [vmem:[#allocation14_spill] sm:$0xff] }
 0x48a   : > { %2958 = vmatpush.msra.mxu1 %v2056_v9  ;;  %v8769_v9 = vld [vmem:[#allocation56_spill] sm:$0xff] }
 0x48c   : > { %2959 = vmatpush.msra.mxu1 %v2054_v31  ;;  %v2050_v31 = vld [vmem:[%s8414_s1 + $0x438] sm:$0xff] }
 0x48e   : > { %v7420_v14 = vpop.f32.mrf.mxu0 }
 0x48f   : > { %8756 = vst [vmem:[#allocation13_spill] sm:$0xff] %v7420_v14  ;;  %v2024_v14 = vld [vmem:[%s8414_s1 + $0x368] sm:$0xff] }
 0x490   : > { %2903 = vmatpush.msrb.mxu2 %v2024_v14  ;;  %v8765_v14 = vld [vmem:[#allocation51_spill] sm:$0xff] }
 0x491   : > { %2855 = vmatmul.f32.gmra.mxu0 %v8757_v23  ;;  %3017 = vmatmul.f32.vlgmr.msra.gmra.mxu3 %v8758_v46  ;;  %v8762_v23 = vld [vmem:[#allocation45_spill] sm:$0xff] }
 0x494   : > { %v7430_v13 = vpop.f32.mrf.mxu3  ;;  %v7432_v62 = vpop.f32.mrf.mxu1 }
 0x495   : > { %8759 = vst [vmem:[#allocation14_spill] sm:$0xff] %v7432_v62  ;;  %v7434_v40 = vpop.f32.mrf.mxu2 }
 0x496   : > { %8760 = vst [vmem:[#allocation44_spill] sm:$0xff] %v7434_v40  ;;  %v2636_v32 = vpop.f32.mrf.mxu0 }
 0x497   : > { %v2022_v32 = vld [vmem:[%s8414_s1 + $0x358] sm:$0xff] }
 0x498   : > { %2904 = vmatpush.msrb.mxu2 %v2022_v32  ;;  %v8768_v32 = vld [vmem:[#allocation20_spill] sm:$0xff] }
 0x499   : > { %2857 = vmatmul.f32.gmra.mxu0 %v8761_v33  ;;  %3020 = vmatmul.f32.gmra.mxu3 %v8762_v23  ;;  %v8764_v33 = vld [vmem:[#allocation18_spill] sm:$0xff] }
 0x49c   : > { %v2746_v46 = vpop.f32.mrf.mxu1  ;;  %v7444_v30 = vpop.f32.mrf.mxu3 }
 0x49d   : > { %v2691_v62 = vpop.f32.mrf.mxu2 }
 0x49e   : > { %v7446_v40 = vpop.f32.mrf.mxu0 }
 0x49f   : > { %8763 = vst [vmem:[#allocation16_spill] sm:$0xff] %v7446_v40  ;;  %v2020_v40 = vld [vmem:[%s8414_s1 + $0x348] sm:$0xff] }
 0x4a0   : > { %2905 = vmatpush.msrb.mxu2 %v2020_v40  ;;  %v8772_v40 = vld [vmem:[#allocation61_spill] sm:$0xff] }
 0x4a1   : > { %2860 = vmatmul.f32.gmra.mxu0 %v8764_v33  ;;  %3022 = vmatmul.f32.gmra.mxu3 %v8765_v14 }
 0x4a4   : > { %v7456_v6 = vpop.f32.mrf.mxu1  ;;  %v2801_v23 = vpop.f32.mrf.mxu3 }
 0x4a5   : > { %8766 = vst [vmem:[#allocation45_spill] sm:$0xff] %v7456_v6  ;;  %v7458_v62 = vpop.f32.mrf.mxu2  ;;  %v2052_v6 = vld [vmem:[%s8414_s1 + $0x448] sm:$0xff] }
 0x4a6   : > { %8767 = vst [vmem:[#allocation18_spill] sm:$0xff] %v7458_v62  ;;  %v2641_v46 = vpop.f32.mrf.mxu0  ;;  %2960 = vmatpush.msra.mxu1 %v2052_v6  ;;  %v2144_v6 = vld [vmem:[%s8414_s1 + $0x728] sm:$0xff] }
 0x4a7   : > { %v2018_v46 = vld [vmem:[%s8414_s1 + $0x338] sm:$0xff]  ;;  %3056 = vmatpush.msra.mxu0 %v2144_v6 }
 0x4a8   : > { %2906 = vmatpush.msrb.mxu2 %v2018_v46  ;;  %2961 = vmatpush.msra.mxu1 %v2050_v31  ;;  %v2176_v46 = vld [vmem:[%s8414_s1 + $0x828] sm:$0xff]  ;;  %v8776_v31 = vld [vmem:[#allocation66_spill] sm:$0xff] }
 0x4a9   : > { %2862 = vmatmul.f32.gmra.mxu0 %v8768_v32  ;;  %3025 = vmatmul.f32.gmra.mxu3 %v8769_v9  ;;  %v8771_v32 = vld [vmem:[#allocation21_spill] sm:$0xff]  ;;  %v2142_v6 = vld [vmem:[%s8414_s1 + $0x718] sm:$0xff] }
 0x4aa   : > { %3111 = vmatpush.msra.mxu2 %v2176_v46  ;;  %v2174_v46 = vld [vmem:[%s8414_s1 + $0x818] sm:$0xff]  ;;  %3057 = vmatpush.msra.mxu0 %v2142_v6 }
 0x4ac   : > { %v2751_v33 = vpop.f32.mrf.mxu1  ;;  %v7468_v14 = vpop.f32.mrf.mxu3  ;;  %3112 = vmatpush.msra.mxu2 %v2174_v46  ;;  %v8779_v46 = vunpack.i.l.bf16 %v7345_v10 }
 0x4ad   : > { %v2696_v23 = vpop.f32.mrf.mxu2 }
 0x4ae   : > { %v7476_v62 = vpop.f32.mrf.mxu0 }
 0x4af   : > { %8770 = vst [vmem:[#allocation51_spill] sm:$0xff] %v7476_v62 }
 0x4b1   : > { %2865 = vmatmul.f32.gmra.mxu0 %v8771_v32  ;;  %3027 = vmatmul.f32.gmra.mxu3 %v8772_v40  ;;  %v2240_v32 = vld [vmem:[%s8414_s1 + $0xa28] sm:$0x3f] }
 0x4b2   : > { %v8775_v40 = vld [vmem:[#allocation32_spill] sm:$0xff]  ;;  %3772 = vmatpush.msk.msrb.mxu3 %vm2279_vm10, %v2240_v32 }
 0x4b4   : > { %v7483_v9 = vpop.f32.mrf.mxu1  ;;  %v2806_v33 = vpop.f32.mrf.mxu3 }
 0x4b5   : > { %8773 = vst [vmem:[#allocation20_spill] sm:$0xff] %v7483_v9  ;;  %v7485_v23 = vpop.f32.mrf.mxu2 }
 0x4b6   : > { %8774 = vst [vmem:[#allocation56_spill] sm:$0xff] %v7485_v23  ;;  %v2646_v58 = vpop.f32.mrf.mxu0  ;;  %v2208_v23 = vld [vmem:[%s8414_s1 + $0x928] sm:$0xff] }
 0x4b7   : > { %3166 = vmatpush.msrb.mxu1 %v2208_v23  ;;  %v2172_v23 = vld [vmem:[%s8414_s1 + $0x808] sm:$0xff] }
 0x4b8   : > { %3113 = vmatpush.msra.mxu2 %v2172_v23  ;;  %v1859_v23 = vpop.permute.xlu2 %1858 }
 0x4b9   : > { %2867 = vmatmul.f32.gmra.mxu0 %v8775_v40  ;;  %3030 = vmatmul.f32.gmra.mxu3 %v8776_v31  ;;  %v8778_v40 = vld [vmem:[#allocation34_spill] sm:$0xff] }
 0x4bc   : > { %v2756_v58 = vpop.f32.mrf.mxu1  ;;  %v7499_v33 = vpop.f32.mrf.mxu3 }
 0x4bd   : > { %v2701_v9 = vpop.f32.mrf.mxu2 }
 0x4be   : > { %v7507_v62 = vpop.f32.mrf.mxu0  ;;  %v2238_v9 = vld [vmem:[%s8414_s1 + $0xa18] sm:$0xff] }
 0x4bf   : > { %8777 = vst [vmem:[#allocation21_spill] sm:$0xff] %v7507_v62  ;;  %3222 = vmatpush.msrb.mxu3 %v2238_v9  ;;  %v2206_v9 = vld [vmem:[%s8414_s1 + $0x918] sm:$0xff] }
 0x4c0   : > { %v1857_v32 = vpop.permute.xlu1 %1856  ;;  %3167 = vmatpush.msrb.mxu1 %v2206_v9 }
 0x4c1   : > { %2870 = vmatmul.f32.gmra.mxu0 %v8778_v40  ;;  %3032 = vmatmul.f32.gmra.mxu3 %v6331_v4  ;;  %v1855_v31 = vpop.permute.xlu0 %1854 }
 0x4c2   : > { %v7521_v58 = vsel %vm1862_vm11, %v1855_v31, %v1857_v32  ;;  %v7526_v62 = vsel %vm1862_vm11, %v8779_v46, %v1855_v31  ;;  %v2140_v31 = vld [vmem:[%s8414_s1 + $0x708] sm:$0xff] }
 0x4c3   : > { %8780 = vst [vmem:[#allocation61_spill] sm:$0xff] %v7526_v62  ;;  %2720 = vmatmul.f32.gmra.mxu2 %v7526_v62  ;;  %3770 = vmatmul.msk.f32.gmra.mxu1 %vm2248_vm12, %v7521_v58  ;;  %v2236_v46 = vld [vmem:[%s8414_s1 + $0xa08] sm:$0xff]  ;;  %v8784_v62 = vunpack.i.h.bf16 %v7345_v10  ;;  %v2134_v10 = vld [vmem:[%s8414_s1 + $0x6d8] sm:$0xff] }
 0x4c4   : > { %v7531_v4 = vpop.f32.mrf.mxu1  ;;  %v2811_v6 = vpop.f32.mrf.mxu3  ;;  %3058 = vmatpush.msra.mxu0 %v2140_v31  ;;  %v2170_v31 = vld [vmem:[%s8414_s1 + $0x7f8] sm:$0xff]  ;;  %3223 = vmatpush.msrb.mxu3 %v2236_v46  ;;  %v2132_v46 = vld [vmem:[%s8414_s1 + $0x6c8] sm:$0xff] }
 0x4c5   : > { %8781 = vst [vmem:[#allocation32_spill] sm:$0xff] %v7531_v4  ;;  %v7536_v32 = vpop.f32.mrf.mxu2  ;;  %v2138_v6 = vld [vmem:[%s8414_s1 + $0x6f8] sm:$0xff]  ;;  %v8783_v4 = vld [vmem:[#allocation37_spill] sm:$0xff]  ;;  %v7561_v48 = vsel %vm1862_vm11, %v8784_v62, %v1859_v23  ;;  %3114 = vmatpush.msra.mxu2 %v2170_v31  ;;  %v2128_v31 = vld [vmem:[%s8414_s1 + $0x6a8] sm:$0xff] }
 0x4c6   : > { %8782 = vst [vmem:[#allocation66_spill] sm:$0xff] %v7536_v32  ;;  %v2651_v40 = vpop.f32.mrf.mxu0  ;;  %3059 = vmatpush.msra.mxu0 %v2138_v6  ;;  %v2234_v6 = vld [vmem:[%s8414_s1 + $0x9f8] sm:$0xff] }
 0x4c7   : > { %v2136_v40 = vld [vmem:[%s8414_s1 + $0x6e8] sm:$0xff]  ;;  %8785 = vst [vmem:[#allocation34_spill] sm:$0xff] %v7561_v48  ;;  %3224 = vmatpush.msrb.mxu3 %v2234_v6  ;;  %v2126_v6 = vld [vmem:[%s8414_s1 + $0x698] sm:$0xff] }
 0x4c8   : > { %3060 = vmatpush.msra.mxu0 %v2136_v40  ;;  %v8787_v40 = vld [vmem:[#allocation39_spill] sm:$0xff] }
 0x4c9   : > { %2872 = vmatmul.f32.gmra.mxu0 %v8783_v4  ;;  %3035 = vmatmul.f32.gmra.mxu3 %v6370_v11  ;;  %v1861_v9 = vpop.permute.xlu0 %1860  ;;  %v2204_v11 = vld [vmem:[%s8414_s1 + $0x908] sm:$0xff] }
 0x4ca   : > { %v7556_v32 = vsel %vm1862_vm11, %v1859_v23, %v1861_v9  ;;  %3168 = vmatpush.msrb.mxu1 %v2204_v11  ;;  %3061 = vmatpush.msra.mxu0 %v2134_v10  ;;  %v2130_v9 = vld [vmem:[%s8414_s1 + $0x6b8] sm:$0xff]  ;;  %v2168_v11 = vld [vmem:[%s8414_s1 + $0x7e8] sm:$0xff] }
 0x4cb   : > { %2722 = vmatmul.f32.gmra.mxu2 %v7561_v48  ;;  %3771 = vmatmul.msk.f32.gmra.mxu1 %vm2248_vm12, %v7556_v32  ;;  %v2202_v10 = vld [vmem:[%s8414_s1 + $0x8f8] sm:$0xff] }
 0x4cc   : > { %v2761_v4 = vpop.f32.mrf.mxu1  ;;  %v7569_v39 = vpop.f32.mrf.mxu3  ;;  %3062 = vmatpush.msra.mxu0 %v2132_v46  ;;  %3115 = vmatpush.msra.mxu2 %v2168_v11 }
 0x4cd   : > { %v2706_v62 = vpop.f32.mrf.mxu2  ;;  %v2232_v4 = vld [vmem:[%s8414_s1 + $0x9e8] sm:$0xff]  ;;  %3169 = vmatpush.msrb.mxu1 %v2202_v10  ;;  %v2226_v10 = vld [vmem:[%s8414_s1 + $0x9b8] sm:$0xff] }
 0x4ce   : > { %v7574_v23 = vpop.f32.mrf.mxu0  ;;  %3063 = vmatpush.msra.mxu0 %v2130_v9  ;;  %v8788_v62 = vld [vmem:[#allocation53_spill] sm:$0xff]  ;;  %3225 = vmatpush.msrb.mxu3 %v2232_v4  ;;  %v2230_v9 = vld [vmem:[%s8414_s1 + $0x9d8] sm:$0xff] }
 0x4cf   : > { %8786 = vst [vmem:[#allocation37_spill] sm:$0xff] %v7574_v23 }
 0x4d0   : > { %3064 = vmatpush.msra.mxu0 %v2128_v31  ;;  %3226 = vmatpush.msrb.mxu3 %v2230_v9  ;;  %v2228_v31 = vld [vmem:[%s8414_s1 + $0x9c8] sm:$0xff]  ;;  %v2166_v9 = vld [vmem:[%s8414_s1 + $0x7d8] sm:$0xff] }
 0x4d1   : > { %2875 = vmatmul.f32.gmra.mxu0 %v8787_v40  ;;  %3037 = vmatmul.f32.gmra.mxu3 %v6404_v29  ;;  %v8789_v29 = vld [vmem:[#allocation54_spill] sm:$0xff] }
 0x4d2   : > { %3065 = vmatpush.msra.mxu0 %v2126_v6  ;;  %3227 = vmatpush.msrb.mxu3 %v2228_v31  ;;  %v2120_v6 = vld [vmem:[%s8414_s1 + $0x668] sm:$0xff]  ;;  %v8793_v31 = vld [vmem:[#allocation58_spill] sm:$0xff] }
 0x4d3   : > { %2907 = vmatmul.f32.vlgmr.msrb.gmra.mxu2 %v8788_v62  ;;  %2962 = vmatmul.f32.vlgmr.msra.gmra.mxu1 %v8789_v29  ;;  %v2124_v62 = vld [vmem:[%s8414_s1 + $0x688] sm:$0xff]  ;;  %v2122_v29 = vld [vmem:[%s8414_s1 + $0x678] sm:$0xff] }
 0x4d4   : > { %v2816_v46 = vpop.f32.mrf.mxu3  ;;  %3066 = vmatpush.msra.mxu0 %v2124_v62  ;;  %3228 = vmatpush.msrb.mxu3 %v2226_v10  ;;  %v2224_v62 = vld [vmem:[%s8414_s1 + $0x9a8] sm:$0xff]  ;;  %v2222_v10 = vld [vmem:[%s8414_s1 + $0x998] sm:$0xff] }
 0x4d5   : > { %v7607_v40 = vpop.f32.mrf.mxu2  ;;  %v8792_v46 = vld [vmem:[#allocation41_spill] sm:$0xff]  ;;  %3116 = vmatpush.msra.mxu2 %v2166_v9  ;;  %v2220_v9 = vld [vmem:[%s8414_s1 + $0x988] sm:$0xff] }
 0x4d6   : > { %8790 = vst [vmem:[#allocation39_spill] sm:$0xff] %v7607_v40  ;;  %v2656_v11 = vpop.f32.mrf.mxu0  ;;  %3067 = vmatpush.msra.mxu0 %v2122_v29  ;;  %v2118_v29 = vld [vmem:[%s8414_s1 + $0x658] sm:$0xff]  ;;  %3229 = vmatpush.msrb.mxu3 %v2224_v62 }
 0x4d7   : > { %v7615_v4 = vpop.f32.mrf.mxu1  ;;  %v2200_v11 = vld [vmem:[%s8414_s1 + $0x8e8] sm:$0xff]  ;;  %v2218_v62 = vld [vmem:[%s8414_s1 + $0x978] sm:$0xff] }
 0x4d8   : > { %8791 = vst [vmem:[#allocation53_spill] sm:$0xff] %v7615_v4  ;;  %3068 = vmatpush.msra.mxu0 %v2120_v6  ;;  %3170 = vmatpush.msrb.mxu1 %v2200_v11  ;;  %v8796_v11 = vld [vmem:[#allocation43_spill] sm:$0xff] }
 0x4d9   : > { %2877 = vmatmul.f32.gmra.mxu0 %v8792_v46  ;;  %3040 = vmatmul.f32.gmra.mxu3 %v6439_v44  ;;  %v8794_v44 = vld [vmem:[#allocation59_spill] sm:$0xff] }
 0x4da   : > { %3069 = vmatpush.msra.mxu0 %v2118_v29  ;;  %3230 = vmatpush.msrb.mxu3 %v2222_v10  ;;  %v2164_v29 = vld [vmem:[%s8414_s1 + $0x7c8] sm:$0xff]  ;;  %v2198_v10 = vld [vmem:[%s8414_s1 + $0x8d8] sm:$0xff] }
 0x4db   : > { %2910 = vmatmul.f32.gmra.mxu2 %v8793_v31  ;;  %2965 = vmatmul.f32.gmra.mxu1 %v8794_v44  ;;  %v2116_v31 = vld [vmem:[%s8414_s1 + $0x648] sm:$0xff]  ;;  %v2114_v44 = vld [vmem:[%s8414_s1 + $0x638] sm:$0xff] }
 0x4dc   : > { %v7639_v46 = vpop.f32.mrf.mxu3  ;;  %3070 = vmatpush.msra.mxu0 %v2116_v31  ;;  %3231 = vmatpush.msrb.mxu3 %v2220_v9  ;;  %v8797_v31 = vld [vmem:[#allocation63_spill] sm:$0xff] }
 0x4dd   : > { %v2711_v4 = vpop.f32.mrf.mxu2  ;;  %3117 = vmatpush.msra.mxu2 %v2164_v29  ;;  %3171 = vmatpush.msrb.mxu1 %v2198_v10  ;;  %v8802_v29 = vld [vmem:[#allocation47_spill] sm:$0xff]  ;;  %v2210_v10 = vld [vmem:[%s8414_s1 + $0x938] sm:$0xff] }
 0x4de   : > { %v7647_v40 = vpop.f32.mrf.mxu0  ;;  %v7661_v4 = vld [vmem:[%s8414_s1 + $0xa30] ss:$8 sm:$0x3]  ;;  %3071 = vmatpush.msra.mxu0 %v2114_v44  ;;  %3232 = vmatpush.msrb.mxu3 %v2218_v62 }
 0x4df   : > { %8795 = vst [vmem:[#allocation54_spill] sm:$0xff] %v7647_v40  ;;  %v2766_v6 = vpop.f32.mrf.mxu1  ;;  %v2214_v44 = vld [vmem:[%s8414_s1 + $0x958] sm:$0xff] }
 0x4e0   : > { %v8798_v6 = vld [vmem:[#allocation64_spill] sm:$0xff] }
 0x4e1   : > { %2880 = vmatmul.f32.gmra.mxu0 %v8796_v11  ;;  %3042 = vmatmul.f32.gmra.mxu3 %v6478_v37  ;;  %v2216_v37 = vld [vmem:[%s8414_s1 + $0x968] sm:$0xff]  ;;  %v7680_v11 = vperm.slane %v7661_v4, 0 }
 0x4e2   : > { %3233 = vmatpush.msrb.mxu3 %v2216_v37  ;;  %v2196_v37 = vld [vmem:[%s8414_s1 + $0x8c8] sm:$0xff] }
 0x4e3   : > { %2912 = vmatmul.f32.gmra.mxu2 %v8797_v31  ;;  %2967 = vmatmul.f32.gmra.mxu1 %v8798_v6  ;;  %v8800_v31 = vld [vmem:[#allocation42_spill] sm:$0xff] }
 0x4e4   : > { %v2821_v40 = vpop.f32.mrf.mxu3  ;;  %v2334_v6 = vadd.f32 %v8800_v31, %v7680_v11  ;;  %3234 = vmatpush.msrb.mxu3 %v2214_v44  ;;  %v8804_v44 = vld [vmem:[#allocation69_spill] sm:$0xff]  ;;  %3172 = vmatpush.msrb.mxu1 %v2196_v37 }
 0x4e5   : > { %v7682_v9 = vpop.f32.mrf.mxu2  ;;  %v2212_v40 = vld [vmem:[%s8414_s1 + $0x948] sm:$0xff] }
 0x4e6   : > { %8799 = vst [vmem:[#allocation41_spill] sm:$0xff] %v7682_v9  ;;  %v2661_v23 = vpop.f32.mrf.mxu0  ;;  %v2389_v62 = vadd.f32 %v6601_v47, %v2334_v6  ;;  %3235 = vmatpush.msrb.mxu3 %v2212_v40  ;;  %v8803_v47 = vld [vmem:[#allocation68_spill] sm:$0xff] }
 0x4e7   : > { %v7689_v48 = vpop.f32.mrf.mxu1  ;;  %v2162_v23 = vld [vmem:[%s8414_s1 + $0x7b8] sm:$0xff]  ;;  %v2160_v9 = vld [vmem:[%s8414_s1 + $0x7a8] sm:$0xff] }
 0x4e8   : > { %8801 = vst [vmem:[#allocation58_spill] sm:$0xff] %v7689_v48  ;;  %v2444_v31 = vadd.f32 %v7090_v17, %v2389_v62  ;;  %3118 = vmatpush.msra.mxu2 %v2162_v23  ;;  %3236 = vmatpush.msrb.mxu3 %v2210_v10  ;;  %v8805_v40 = vld [vmem:[#allocation48_spill] sm:$0xff]  ;;  %v8806_v10 = vld [vmem:[#allocation71_spill] sm:$0xff] }
 0x4e9   : > { %2882 = vmatmul.f32.gmra.mxu0 %v8802_v29  ;;  %3045 = vmatmul.f32.gmra.mxu3 %v6511_v18 }
 0x4ea   : > { %v2499_v18 = vadd.f32 %v7286_v56, %v2444_v31  ;;  %3119 = vmatpush.msra.mxu2 %v2160_v9  ;;  %v2194_v56 = vld [vmem:[%s8414_s1 + $0x8b8] sm:$0xff] }
 0x4eb   : > { %2915 = vmatmul.f32.gmra.mxu2 %v8803_v47  ;;  %2970 = vmatmul.f32.gmra.mxu1 %v8804_v44  ;;  %v2192_v47 = vld [vmem:[%s8414_s1 + $0x8a8] sm:$0xff]  ;;  %v8809_v44 = vld [vmem:[#allocation74_spill] sm:$0xff] }
 0x4ec   : > { %v7710_v6 = vpop.f32.mrf.mxu3  ;;  %v2554_v17 = vadd.f32 %v7247_v19, %v2499_v18  ;;  %3173 = vmatpush.msrb.mxu1 %v2194_v56 }
 0x4ed   : > { %v2716_v29 = vpop.f32.mrf.mxu2 }
 0x4ee   : > { %v2663_v48 = vpop.f32.mrf.mxu0  ;;  %v2609_v62 = vadd.f32 %v7388_v54, %v2554_v17  ;;  %3174 = vmatpush.msrb.mxu1 %v2192_v47  ;;  %v2156_v17 = vld [vmem:[%s8414_s1 + $0x788] sm:$0xff]  ;;  %v8814_v47 = vld [vmem:[#allocation67_spill] sm:$0xff] }
 0x4ef   : > { %v2771_v60 = vpop.f32.mrf.mxu1 }
 0x4f0   : > { %v2664_v23 = vadd.f32 %v2663_v48, %v2609_v62  ;;  %v8808_v48 = vld [vmem:[#allocation73_spill] sm:$0xff] }
 0x4f1   : > { %2885 = vmatmul.f32.gmra.mxu0 %v8805_v40  ;;  %3047 = vmatmul.f32.gmra.mxu3 %v6734_v15  ;;  %v2158_v15 = vld [vmem:[%s8414_s1 + $0x798] sm:$0xff]  ;;  %v8810_v40 = vld [vmem:[#allocation52_spill] sm:$0xff] }
 0x4f2   : > { %3120 = vmatpush.msra.mxu2 %v2158_v15  ;;  %v2184_v15 = vld [vmem:[%s8414_s1 + $0x868] sm:$0xff] }
 0x4f3   : > { %2917 = vmatmul.f32.gmra.mxu2 %v6341_v28  ;;  %2972 = vmatmul.f32.gmra.mxu1 %v8806_v10  ;;  %v8807_v28 = vld [vmem:[#allocation50_spill] sm:$0xff] }
 0x4f4   : > { %v2826_v60 = vpop.f32.mrf.mxu3  ;;  %3121 = vmatpush.msra.mxu2 %v2156_v17  ;;  %v2154_v10 = vld [vmem:[%s8414_s1 + $0x778] sm:$0xff]  ;;  %v8816_v17 = vld [vmem:[#allocation72_spill] sm:$0xff] }
 0x4f5   : > { %v2718_v9 = vpop.f32.mrf.mxu2 }
 0x4f6   : > { %v2719_v37 = vadd.f32 %v2718_v9, %v2664_v23  ;;  %v2666_v19 = vpop.f32.mrf.mxu0  ;;  %v2188_v23 = vld [vmem:[%s8414_s1 + $0x888] sm:$0xff]  ;;  %3122 = vmatpush.msra.mxu2 %v2154_v10  ;;  %v8819_v10 = vld [vmem:[#allocation30_spill] sm:$0xff] }
 0x4f7   : > { %v2773_v31 = vpop.f32.mrf.mxu1  ;;  %v2152_v9 = vld [vmem:[%s8414_s1 + $0x768] sm:$0xff]  ;;  %v8813_v19 = vld [vmem:[#allocation62_spill] sm:$0xff] }
 0x4f8   : > { %v7730_v54 = vadd.f32 %v2773_v31, %v2719_v37  ;;  %v2186_v37 = vld [vmem:[%s8414_s1 + $0x878] sm:$0xff]  ;;  %3123 = vmatpush.msra.mxu2 %v2152_v9  ;;  %v8823_v9 = vld [vmem:[#allocation77_spill] sm:$0xff] }
 0x4f9   : > { %2887 = vmatmul.f32.gmra.mxu0 %v8807_v28  ;;  %3050 = vmatmul.f32.gmra.mxu3 %v6799_v42  ;;  %v2190_v42 = vld [vmem:[%s8414_s1 + $0x898] sm:$0xff] }
 0x4fa   : > { %3316 = vrot.lane.b32.xlu2 %v7730_v54, %s4410_s29  ;;  %3175 = vmatpush.msrb.mxu1 %v2190_v42  ;;  %v2150_v31 = vld [vmem:[%s8414_s1 + $0x758] sm:$0xff]  ;;  %v8817_v42 = vld [vmem:[#allocation75_spill] sm:$0xff] }
 0x4fb   : > { %2920 = vmatmul.f32.gmra.mxu2 %v8808_v48  ;;  %2975 = vmatmul.f32.gmra.mxu1 %v8809_v44  ;;  %v2182_v28 = vld [vmem:[%s8414_s1 + $0x858] sm:$0xff] }
 0x4fc   : > { %v7738_v18 = vpop.f32.mrf.mxu3  ;;  %3176 = vmatpush.msrb.mxu1 %v2188_v23  ;;  %3124 = vmatpush.msra.mxu2 %v2150_v31  ;;  %v8815_v48 = vld [vmem:[#allocation70_spill] sm:$0xff] }
 0x4fe   : > { %v7740_v29 = vpop.f32.mrf.mxu0  ;;  %3177 = vmatpush.msrb.mxu1 %v2186_v37 }
 0x500   : > { %3178 = vmatpush.msrb.mxu1 %v2184_v15 }
 0x501   : > { %3052 = vmatmul.f32.gmra.mxu3 %v6947_v3  ;;  %3072 = vmatmul.f32.vlgmr.msra.gmra.mxu0 %v8810_v40  ;;  %v8811_v3 = vld [vmem:[#allocation57_spill] sm:$0xff]  ;;  %v8818_v40 = vld [vmem:[#allocation22_spill] sm:$0xff] }
 0x502   : > { %3179 = vmatpush.msrb.mxu1 %v2182_v28  ;;  %v8828_v28 = vld [vmem:[#allocation98_spill] sm:$0xff] }
 0x503   : > { %2922 = vmatmul.f32.gmra.mxu2 %v6416_v2  ;;  %2977 = vmatmul.f32.gmra.mxu1 %v6419_v53  ;;  %v8812_v2 = vld [vmem:[#allocation76_spill] sm:$0xff] }
 0x504   : > { %v2831_v56 = vpop.f32.mrf.mxu3 }
 0x506   : > { %v7752_v62 = vpop.f32.mrf.mxu0 }
 0x509   : > { %3075 = vmatmul.f32.gmra.mxu0 %v8811_v3  ;;  %3773 = vmatmul.msk.f32.vlgmr.msrb.gmra.mxu3 %vm2248_vm12, %v6996_v35 }
 0x50b   : > { %2925 = vmatmul.f32.gmra.mxu2 %v6453_v12  ;;  %2980 = vmatmul.f32.gmra.mxu1 %v8812_v2 }
 0x50c   : > { %v7765_v53 = vpop.f32.mrf.mxu3 }
 0x50e   : > { %v2856_v60 = vpop.f32.mrf.mxu0 }
 0x511   : > { %3077 = vmatmul.f32.gmra.mxu0 %v8813_v19  ;;  %3774 = vmatmul.msk.f32.gmra.mxu3 %vm2248_vm12, %v7017_v57  ;;  %v8825_v19 = vld [vmem:[#allocation89_spill] sm:$0xff] }
 0x513   : > { %2927 = vmatmul.f32.gmra.mxu2 %v6490_v22  ;;  %2982 = vmatmul.f32.gmra.mxu1 %v6493_v50  ;;  %v2148_v50 = vld [vmem:[%s8414_s1 + $0x748] sm:$0xff] }
 0x514   : > { %v7778_v12 = vpop.f32.mrf.mxu3  ;;  %3125 = vmatpush.msra.mxu2 %v2148_v50 }
 0x516   : > { %v7780_v35 = vpop.f32.mrf.mxu0 }
 0x519   : > { %3080 = vmatmul.f32.gmra.mxu0 %v8814_v47  ;;  %3775 = vmatmul.msk.f32.gmra.mxu3 %vm2248_vm12, %v7037_v55  ;;  %v2180_v55 = vld [vmem:[%s8414_s1 + $0x848] sm:$0xff] }
 0x51a   : > { %3180 = vmatpush.msrb.mxu1 %v2180_v55 }
 0x51b   : > { %2930 = vmatmul.f32.gmra.mxu2 %v6523_v5  ;;  %2985 = vmatmul.f32.gmra.mxu1 %v6526_v49  ;;  %v2146_v49 = vld [vmem:[%s8414_s1 + $0x738] sm:$0xff] }
 0x51c   : > { %v3021_v22 = vpop.f32.mrf.mxu3  ;;  %3126 = vmatpush.msra.mxu2 %v2146_v49 }
 0x51e   : > { %v2861_v57 = vpop.f32.mrf.mxu0 }
 0x51f   : > { %v8826_v57 = vld [vmem:[#allocation26_spill] sm:$0xff] }
 0x521   : > { %3082 = vmatmul.f32.gmra.mxu0 %v8815_v48  ;;  %3776 = vmatmul.msk.f32.gmra.mxu3 %vm2248_vm12, %v7055_v25 }
 0x523   : > { %2932 = vmatmul.f32.gmra.mxu2 %v6539_v52  ;;  %2987 = vmatmul.f32.gmra.mxu1 %v6542_v45  ;;  %v2178_v52 = vld [vmem:[%s8414_s1 + $0x838] sm:$0xff] }
 0x524   : > { %v7804_v5 = vpop.f32.mrf.mxu3  ;;  %3181 = vmatpush.msrb.mxu1 %v2178_v52 }
 0x526   : > { %v7812_v44 = vpop.f32.mrf.mxu0 }
 0x529   : > { %3085 = vmatmul.f32.gmra.mxu0 %v8816_v17  ;;  %3777 = vmatmul.msk.f32.gmra.mxu3 %vm2248_vm12, %v7073_v59  ;;  %v7859_v17 = vperm.slane %v7661_v4, 1 }
 0x52b   : > { %2935 = vmatmul.f32.gmra.mxu2 %v6558_v24  ;;  %2990 = vmatmul.f32.gmra.mxu1 %v6561_v16  ;;  %v8820_v24 = vld [vmem:[#allocation35_spill] sm:$0xff]  ;;  %v2824_v4 = vadd.f32 %v7710_v6, %v7859_v17 }
 0x52c   : > { %v3026_v45 = vpop.f32.mrf.mxu3 }
 0x52e   : > { %v2866_v25 = vpop.f32.mrf.mxu0 }
 0x52f   : > { %v8829_v25 = vld [vmem:[#allocation27_spill] sm:$0xff] }
 0x531   : > { %3087 = vmatmul.f32.gmra.mxu0 %v8817_v42  ;;  %3778 = vmatmul.msk.f32.gmra.mxu3 %vm2248_vm12, %v7096_v63  ;;  %v8821_v63 = vld [vmem:[#allocation60_spill] sm:$0xff] }
 0x532   : > { %v2339_v3 = vadd.f32 %v8821_v63, %v7680_v11 }
 0x533   : > { %2937 = vmatmul.f32.gmra.mxu2 %v8818_v40  ;;  %2992 = vmatmul.f32.gmra.mxu1 %v6729_v20  ;;  %v8822_v20 = vld [vmem:[#allocation15_spill] sm:$0xff] }
 0x534   : > { %v7827_v59 = vpop.f32.mrf.mxu3  ;;  %v2394_v60 = vadd.f32 %v8822_v20, %v2339_v3  ;;  %v8832_v3 = vld [vmem:[#allocation81_spill] sm:$0xff] }
 0x536   : > { %v7829_v56 = vpop.f32.mrf.mxu0  ;;  %v2449_v37 = vadd.f32 %v7406_v21, %v2394_v60  ;;  %v8827_v21 = vld [vmem:[#allocation97_spill] sm:$0xff] }
 0x538   : > { %v2504_v31 = vadd.f32 %v7418_v27, %v2449_v37  ;;  %v8835_v37 = vld [vmem:[#allocation85_spill] sm:$0xff] }
 0x539   : > { %3090 = vmatmul.f32.gmra.mxu0 %v8819_v10  ;;  %3779 = vmatmul.msk.f32.gmra.mxu3 %vm2248_vm12, %v7125_v1  ;;  %v8824_v1 = vld [vmem:[#allocation78_spill] sm:$0xff] }
 0x53a   : > { %v2559_v50 = vadd.f32 %v7416_v41, %v2504_v31 }
 0x53b   : > { %2940 = vmatmul.f32.gmra.mxu2 %v8820_v24  ;;  %2995 = vmatmul.f32.gmra.mxu1 %v6794_v51 }
 0x53c   : > { %v3031_v16 = vpop.f32.mrf.mxu3 }
 0x53e   : > { %v2871_v23 = vpop.f32.mrf.mxu0 }
 0x540   : > { %v2776_v2 = vpop.f32.mrf.mxu1 }
 0x541   : > { %3092 = vmatmul.f32.gmra.mxu0 %v8823_v9  ;;  %3780 = vmatmul.msk.f32.gmra.mxu3 %vm2248_vm12, %v7165_v7  ;;  %v2614_v7 = vadd.f32 %v7430_v13, %v2559_v50  ;;  %v8830_v13 = vld [vmem:[#allocation99_spill] sm:$0xff]  ;;  %v8834_v2 = vld [vmem:[#allocation105_spill] sm:$0xff] }
 0x543   : > { %2942 = vmatmul.f32.gmra.mxu2 %v8824_v1  ;;  %2997 = vmatmul.f32.gmra.mxu1 %v8825_v19  ;;  %v2669_v27 = vadd.f32 %v7740_v29, %v2614_v7  ;;  %v8831_v29 = vld [vmem:[#allocation100_spill] sm:$0xff]  ;;  %v2804_v1 = vadd.f32 %v7468_v14, %v7859_v17 }
 0x544   : > { %v7845_v51 = vpop.f32.mrf.mxu3  ;;  %v8836_v19 = vld [vmem:[#allocation12_spill] sm:$0xff] }
 0x545   : > { %v8839_v14 = vld [vmem:[#allocation108_spill] sm:$0xff] }
 0x546   : > { %v7848_v15 = vpop.f32.mrf.mxu0  ;;  %v2721_v47 = vpop.f32.mrf.mxu2 }
 0x547   : > { %v2859_v47 = vadd.f32 %v7780_v35, %v2804_v1 }
 0x548   : > { %v2778_v22 = vpop.f32.mrf.mxu1 }
 0x549   : > { %3095 = vmatmul.f32.gmra.mxu0 %v8826_v57  ;;  %3781 = vmatmul.msk.f32.gmra.mxu3 %vm2248_vm12, %v7209_v26  ;;  %v2799_v26 = vadd.f32 %v7444_v30, %v7859_v17  ;;  %v8833_v30 = vld [vmem:[#allocation104_spill] sm:$0xff] }
 0x54b   : > { %3127 = vmatmul.f32.vlgmr.msra.gmra.mxu2 %v8827_v21  ;;  %3182 = vmatmul.f32.vlgmr.msrb.gmra.mxu1 %v8828_v28  ;;  %v2854_v40 = vadd.f32 %v7752_v62, %v2799_v26  ;;  %v8838_v28 = vld [vmem:[#allocation91_spill] sm:$0xff] }
 0x54c   : > { %v3036_v48 = vpop.f32.mrf.mxu3 }
 0x54d   : > { %v8840_v48 = vld [vmem:[#allocation109_spill] sm:$0xff] }
 0x54e   : > { %v2876_v49 = vpop.f32.mrf.mxu0  ;;  %v2723_v55 = vpop.f32.mrf.mxu2 }
 0x54f   : > { %v2724_v41 = vadd.f32 %v2723_v55, %v2669_v27 }
 0x550   : > { %v2963_v52 = vpop.f32.mrf.mxu1 }
 0x551   : > { %v7861_v45 = vadd.f32 %v2778_v22, %v2724_v41  ;;  %3097 = vmatmul.f32.gmra.mxu0 %v8829_v25  ;;  %3782 = vmatmul.msk.f32.gmra.mxu3 %vm2248_vm12, %v7267_v38  ;;  %v8841_v41 = vld [vmem:[#allocation96_spill] sm:$0xff]  ;;  %v8842_v25 = vld [vmem:[#allocation6_spill] sm:$0xff] }
 0x553   : > { %3130 = vmatmul.f32.gmra.mxu2 %v8830_v13  ;;  %3185 = vmatmul.f32.gmra.mxu1 %v8831_v29 }
 0x554   : > { %v7870_v42 = vpop.f32.mrf.mxu3 }
 0x556   : > { %v2878_v10 = vpop.f32.mrf.mxu0  ;;  %v2908_v24 = vpop.f32.mrf.mxu2 }
 0x557   : > { %v7875_v16 = vadd.f32 %v2878_v10, %v2824_v4  ;;  %v2909_v23 = vadd.f32 %v2908_v24, %v2854_v40 }
 0x558   : > { %v2966_v38 = vpop.f32.mrf.mxu1 }
 0x559   : > { %v2964_v63 = vadd.f32 %v2963_v52, %v2909_v23  ;;  %3100 = vmatmul.f32.gmra.mxu0 %v8832_v3  ;;  %3783 = vmatmul.msk.f32.gmra.mxu3 %vm2248_vm12, %v7309_v36  ;;  %v8837_v36 = vld [vmem:[#allocation106_spill] sm:$0xff]  ;;  %v2809_v52 = vadd.f32 %v7499_v33, %v7859_v17  ;;  %v8844_v33 = vld [vmem:[#allocation7_spill] sm:$0xff] }
 0x55a   : > { %v8845_v23 = vld [vmem:[#allocation111_spill] sm:$0xff] }
 0x55b   : > { %3132 = vmatmul.f32.gmra.mxu2 %v8833_v30  ;;  %3187 = vmatmul.f32.gmra.mxu1 %v8834_v2  ;;  %v3019_v6 = vadd.f32 %v7778_v12, %v2964_v63  ;;  %v2829_v12 = vadd.f32 %v7738_v18, %v7859_v17  ;;  %v2864_v13 = vadd.f32 %v7812_v44, %v2809_v52 }
 0x55c   : > { %v3041_v20 = vpop.f32.mrf.mxu3  ;;  %v2814_v2 = vadd.f32 %v7569_v39, %v7859_v17 }
 0x55d   : > { %v8846_v20 = vld [vmem:[#allocation8_spill] sm:$0xff] }
 0x55e   : > { %v2881_v62 = vpop.f32.mrf.mxu0  ;;  %v2911_v60 = vpop.f32.mrf.mxu2 }
 0x55f   : > { %v2869_v62 = vadd.f32 %v7829_v56, %v2814_v2  ;;  %v2819_v56 = vadd.f32 %v7639_v46, %v7859_v17 }
 0x560   : > { %v2968_v9 = vpop.f32.mrf.mxu1 }
 0x561   : > { %3102 = vmatmul.f32.gmra.mxu0 %v8835_v37  ;;  %3784 = vmatmul.msk.f32.gmra.mxu3 %vm2248_vm12, %v7343_v61 }
 0x563   : > { %3135 = vmatmul.f32.gmra.mxu2 %v8836_v19  ;;  %3190 = vmatmul.f32.gmra.mxu1 %v8837_v36 }
 0x564   : > { %v7890_v31 = vpop.f32.mrf.mxu3 }
 0x566   : > { %v2883_v22 = vpop.f32.mrf.mxu0  ;;  %v2913_v50 = vpop.f32.mrf.mxu2 }
 0x567   : > { %v7895_v57 = vadd.f32 %v2883_v22, %v2829_v12  ;;  %v2914_v7 = vadd.f32 %v2913_v50, %v2859_v47  ;;  %v8847_v47 = vld [vmem:[#allocation10_spill] sm:$0xff]  ;;  %v8848_v22 = vld [vmem:[#allocation11_spill] sm:$0xff] }
 0x568   : > { %v2971_v61 = vpop.f32.mrf.mxu1 }
 0x569   : > { %v2969_v21 = vadd.f32 %v2968_v9, %v2914_v7  ;;  %3105 = vmatmul.f32.gmra.mxu0 %v8838_v28  ;;  %3785 = vmatmul.msk.f32.gmra.mxu3 %vm2248_vm12, %v7379_v8  ;;  %v8843_v8 = vld [vmem:[#allocation110_spill] sm:$0xff]  ;;  %v8849_v28 = vld [vmem:[#allocation113_spill] sm:$0xff] }
 0x56b   : > { %3137 = vmatmul.f32.gmra.mxu2 %v8839_v14  ;;  %3192 = vmatmul.f32.gmra.mxu1 %v8840_v48  ;;  %v3024_v18 = vadd.f32 %v7804_v5, %v2969_v21  ;;  %v2834_v5 = vadd.f32 %v7765_v53, %v7859_v17  ;;  %v8850_v14 = vld [vmem:[#allocation114_spill] sm:$0xff] }
 0x56c   : > { %v3046_v27 = vpop.f32.mrf.mxu3 }
 0x56e   : > { %v2886_v35 = vpop.f32.mrf.mxu0  ;;  %v2916_v49 = vpop.f32.mrf.mxu2 }
 0x56f   : > { %v8851_v49 = vld [vmem:[#allocation115_spill] sm:$0xff] }
 0x570   : > { %v2973_v55 = vpop.f32.mrf.mxu1 }
 0x571   : > { %3107 = vmatmul.f32.gmra.mxu0 %v8841_v41  ;;  %3786 = vmatmul.msk.f32.gmra.mxu3 %vm2248_vm12, %v7521_v58 }
 0x573   : > { %3140 = vmatmul.f32.gmra.mxu2 %v8842_v25  ;;  %3195 = vmatmul.f32.gmra.mxu1 %v8843_v8 }
 0x574   : > { %v7910_v26 = vpop.f32.mrf.mxu3 }
 0x576   : > { %v2888_v29 = vpop.f32.mrf.mxu0  ;;  %v2918_v4 = vpop.f32.mrf.mxu2 }
 0x577   : > { %v7915_v40 = vadd.f32 %v2888_v29, %v2834_v5  ;;  %v2919_v10 = vadd.f32 %v2918_v4, %v2864_v13  ;;  %v8853_v13 = vld [vmem:[#allocation117_spill] sm:$0xff] }
 0x578   : > { %v2976_v58 = vpop.f32.mrf.mxu1 }
 0x579   : > { %v2974_v24 = vadd.f32 %v2973_v55, %v2919_v10  ;;  %3787 = vmatmul.msk.f32.gmra.mxu3 %vm2248_vm12, %v7556_v32 }
 0x57b   : > { %3142 = vmatmul.f32.gmra.mxu2 %v8844_v33  ;;  %3197 = vmatmul.f32.gmra.mxu1 %v8845_v23  ;;  %v3029_v38 = vadd.f32 %v7827_v59, %v2974_v24  ;;  %v8855_v23 = vld [vmem:[#allocation119_spill] sm:$0xff] }
 0x57c   : > { %v3051_v63 = vpop.f32.mrf.mxu3 }
 0x57e   : > { %v3073_v53 = vpop.f32.mrf.mxu0  ;;  %v2921_v3 = vpop.f32.mrf.mxu2 }
 0x57f   : > { %v7922_v44 = vadd.f32 %v3073_v53, %v3019_v6 }
 0x580   : > { %v2978_v30 = vpop.f32.mrf.mxu1 }
 0x583   : > { %3145 = vmatmul.f32.gmra.mxu2 %v7134_v43  ;;  %3200 = vmatmul.f32.gmra.mxu1 %v8846_v20  ;;  %v8857_v20 = vld [vmem:[#allocation120_spill] sm:$0xff] }
 0x584   : > { %v7928_v32 = vpop.f32.mrf.mxu3 }
 0x586   : > { %v3076_v60 = vpop.f32.mrf.mxu0  ;;  %v2923_v9 = vpop.f32.mrf.mxu2 }
 0x587   : > { %v2924_v59 = vadd.f32 %v2923_v9, %v2869_v62 }
 0x588   : > { %v2981_v37 = vpop.f32.mrf.mxu1 }
 0x589   : > { %v2979_v1 = vadd.f32 %v2978_v30, %v2924_v59 }
 0x58b   : > { %3147 = vmatmul.f32.gmra.mxu2 %v7176_v34  ;;  %3202 = vmatmul.f32.gmra.mxu1 %v7184_v0  ;;  %v3034_v6 = vadd.f32 %v7845_v51, %v2979_v1  ;;  %v2874_v34 = vadd.f32 %v7848_v15, %v2819_v56  ;;  %v8852_v15 = vld [vmem:[#allocation116_spill] sm:$0xff] }
 0x58c   : > { %v7934_v39 = vpop.f32.mrf.mxu3 }
 0x58e   : > { %v3078_v43 = vpop.f32.mrf.mxu0  ;;  %v2926_v19 = vpop.f32.mrf.mxu2 }
 0x58f   : > { %v7936_v36 = vadd.f32 %v3078_v43, %v3024_v18 }
 0x590   : > { %v2983_v12 = vpop.f32.mrf.mxu1 }
 0x593   : > { %3150 = vmatmul.f32.gmra.mxu2 %v8847_v47  ;;  %3205 = vmatmul.f32.gmra.mxu1 %v8848_v22 }
 0x594   : > { %v3241_v50 = vpop.f32.mrf.mxu3 }
 0x596   : > { %v3081_v0 = vpop.f32.mrf.mxu0  ;;  %v2928_v7 = vpop.f32.mrf.mxu2 }
 0x597   : > { %v2929_v51 = vadd.f32 %v2928_v7, %v2874_v34 }
 0x598   : > { %v2986_v61 = vpop.f32.mrf.mxu1 }
 0x599   : > { %v2984_v21 = vadd.f32 %v2983_v12, %v2929_v51 }
 0x59b   : > { %3152 = vmatmul.f32.gmra.mxu2 %v8849_v28  ;;  %3207 = vmatmul.f32.gmra.mxu1 %v8850_v14  ;;  %v3039_v48 = vadd.f32 %v7870_v42, %v2984_v21  ;;  %v8854_v42 = vld [vmem:[#allocation118_spill] sm:$0xff] }
 0x59c   : > { %v7946_v18 = vpop.f32.mrf.mxu3 }
 0x59e   : > { %v3083_v46 = vpop.f32.mrf.mxu0  ;;  %v2931_v17 = vpop.f32.mrf.mxu2 }
 0x59f   : > { %v7948_v27 = vadd.f32 %v3083_v46, %v3029_v38  ;;  %v8856_v38 = vld [vmem:[#allocation61_spill] sm:$0xff] }
 0x5a0   : > { %v2988_v35 = vpop.f32.mrf.mxu1 }
 0x5a3   : > { %3155 = vmatmul.f32.gmra.mxu2 %v8851_v49  ;;  %3210 = vmatmul.f32.gmra.mxu1 %v8852_v15  ;;  %v8860_v49 = vld [vmem:[#allocation40_spill] sm:$0xff] }
 0x5a4   : > { %v3246_v55 = vpop.f32.mrf.mxu3 }
 0x5a6   : > { %v3086_v41 = vpop.f32.mrf.mxu0  ;;  %v2933_v52 = vpop.f32.mrf.mxu2 }
 0x5a7   : > { %v2934_v25 = vadd.f32 %v2933_v52, %v7875_v16 }
 0x5a8   : > { %v2991_v8 = vpop.f32.mrf.mxu1 }
 0x5a9   : > { %v2989_v5 = vadd.f32 %v2988_v35, %v2934_v25  ;;  %v8862_v8 = vld [vmem:[#allocation90_spill] sm:$0xff] }
 0x5ab   : > { %3157 = vmatmul.f32.gmra.mxu2 %v8853_v13  ;;  %3212 = vmatmul.f32.gmra.mxu1 %v8854_v42  ;;  %v3044_v29 = vadd.f32 %v7890_v31, %v2989_v5  ;;  %v8858_v31 = vld [vmem:[#allocation34_spill] sm:$0xff] }
 0x5ac   : > { %v7956_v4 = vpop.f32.mrf.mxu3 }
 0x5ae   : > { %v3088_v10 = vpop.f32.mrf.mxu0  ;;  %v2936_v58 = vpop.f32.mrf.mxu2 }
 0x5af   : > { %v7958_v24 = vadd.f32 %v3088_v10, %v3034_v6  ;;  %v8863_v58 = vld [vmem:[#allocation82_spill] sm:$0xff] }
 0x5b0   : > { %v2993_v33 = vpop.f32.mrf.mxu1 }
 0x5b3   : > { %3160 = vmatmul.f32.gmra.mxu2 %v8855_v23  ;;  %3215 = vmatmul.f32.gmra.mxu1 %v8856_v38  ;;  %v8864_v38 = vld [vmem:[#allocation88_spill] sm:$0xff] }
 0x5b4   : > { %v3251_v16 = vpop.f32.mrf.mxu3 }
 0x5b6   : > { %v3091_v63 = vpop.f32.mrf.mxu0  ;;  %v2938_v53 = vpop.f32.mrf.mxu2 }
 0x5b7   : > { %v2939_v3 = vadd.f32 %v2938_v53, %v7895_v57 }
 0x5b8   : > { %v2996_v30 = vpop.f32.mrf.mxu1 }
 0x5b9   : > { %v2994_v2 = vadd.f32 %v2993_v33, %v2939_v3  ;;  %v8866_v3 = vld [vmem:[#allocation51_spill] sm:$0xff] }
 0x5bb   : > { %3162 = vmatmul.f32.gmra.mxu2 %v8857_v20  ;;  %3217 = vmatmul.f32.gmra.mxu1 %v8858_v31  ;;  %v3049_v62 = vadd.f32 %v7910_v26, %v2994_v2  ;;  %v8867_v20 = vld [vmem:[#allocation46_spill] sm:$0xff] }
 0x5bc   : > { %v7966_v60 = vpop.f32.mrf.mxu3 }
 0x5be   : > { %v3093_v9 = vpop.f32.mrf.mxu0  ;;  %v2941_v59 = vpop.f32.mrf.mxu2 }
 0x5bf   : > { %v7968_v37 = vadd.f32 %v3093_v9, %v3039_v48 }
 0x5c0   : > { %v2998_v1 = vpop.f32.mrf.mxu1 }
 0x5c4   : > { %v3256_v6 = vpop.f32.mrf.mxu3 }
 0x5c6   : > { %v3096_v43 = vpop.f32.mrf.mxu0  ;;  %v2943_v19 = vpop.f32.mrf.mxu2 }
 0x5c7   : > { %v2944_v57 = vadd.f32 %v2943_v19, %v7915_v40  ;;  %v8870_v19 = vld [vmem:[#allocation95_spill] sm:$0xff] }
 0x5c8   : > { %v3183_v12 = vpop.f32.mrf.mxu1 }
 0x5c9   : > { %v2999_v56 = vadd.f32 %v2998_v1, %v2944_v57  ;;  %v8869_v1 = vld [vmem:[#allocation93_spill] sm:$0xff] }
 0x5cb   : > { %v7972_v47 = vadd.f32 %v7928_v32, %v2999_v56  ;;  %v8859_v32 = vld [vmem:[#allocation24_spill] sm:$0xff] }
 0x5cc   : > { %v7974_v22 = vpop.f32.mrf.mxu3  ;;  %v2314_v46 = vadd.f32 %v8859_v32, %v7680_v11 }
 0x5ce   : > { %v3098_v26 = vpop.f32.mrf.mxu0  ;;  %v3128_v50 = vpop.f32.mrf.mxu2  ;;  %v2369_v15 = vadd.f32 %v8860_v49, %v2314_v46  ;;  %v8875_v46 = vld [vmem:[#allocation21_spill] sm:$0xff] }
 0x5cf   : > { %v7976_v34 = vadd.f32 %v3098_v26, %v3044_v29  ;;  %v3129_v0 = vadd.f32 %v3128_v50, %v7922_v44 }
 0x5d0   : > { %v3186_v7 = vpop.f32.mrf.mxu1 }
 0x5d1   : > { %v3184_v51 = vadd.f32 %v3183_v12, %v3129_v0  ;;  %v8871_v12 = vld [vmem:[#allocation20_spill] sm:$0xff] }
 0x5d3   : > { %v7980_v61 = vadd.f32 %v7934_v39, %v3184_v51  ;;  %v8861_v39 = vld [vmem:[#allocation87_spill] sm:$0xff]  ;;  %v8872_v51 = vld [vmem:[#allocation86_spill] sm:$0xff] }
 0x5d4   : > { %v3261_v21 = vpop.f32.mrf.mxu3  ;;  %v2424_v52 = vadd.f32 %v8861_v39, %v2369_v15  ;;  %v8877_v15 = vld [vmem:[#allocation66_spill] sm:$0xff] }
 0x5d6   : > { %v3101_v40 = vpop.f32.mrf.mxu0  ;;  %v3131_v28 = vpop.f32.mrf.mxu2  ;;  %v2479_v5 = vadd.f32 %v8862_v8, %v2424_v52  ;;  %v8878_v52 = vld [vmem:[#allocation101_spill] sm:$0xff] }
 0x5d7   : > { %v8873_v40 = vld [vmem:[#allocation94_spill] sm:$0xff] }
 0x5d8   : > { %v3188_v14 = vpop.f32.mrf.mxu1  ;;  %v2534_v33 = vadd.f32 %v8863_v58, %v2479_v5  ;;  %v8879_v5 = vld [vmem:[#allocation103_spill] sm:$0xff] }
 0x5da   : > { %v2589_v16 = vadd.f32 %v8864_v38, %v2534_v33  ;;  %v8881_v38 = vld [vmem:[#allocation92_spill] sm:$0xff] }
 0x5dc   : > { %v7982_v48 = vpop.f32.mrf.mxu3  ;;  %v2644_v30 = vadd.f32 %v8866_v3, %v2589_v16  ;;  %v8883_v3 = vld [vmem:[#allocation37_spill] sm:$0xff] }
 0x5de   : > { %v3103_v17 = vpop.f32.mrf.mxu0  ;;  %v3133_v35 = vpop.f32.mrf.mxu2 }
 0x5df   : > { %v7987_v55 = vadd.f32 %v3103_v17, %v3049_v62  ;;  %v3134_v44 = vadd.f32 %v3133_v35, %v7936_v36  ;;  %v8865_v36 = vld [vmem:[#allocation25_spill] sm:$0xff] }
 0x5e0   : > { %v3191_v41 = vpop.f32.mrf.mxu1  ;;  %v2319_v53 = vadd.f32 %v8865_v36, %v7680_v11  ;;  %v8882_v36 = vld [vmem:[#allocation102_spill] sm:$0xff] }
 0x5e1   : > { %v3189_v25 = vadd.f32 %v3188_v14, %v3134_v44  ;;  %v8874_v14 = vld [vmem:[#allocation33_spill] sm:$0xff] }
 0x5e2   : > { %v2374_v31 = vadd.f32 %v8867_v20, %v2319_v53  ;;  %v2324_v32 = vadd.f32 %v8874_v14, %v7680_v11  ;;  %v8884_v20 = vld [vmem:[#allocation38_spill] sm:$0xff] }
 0x5e3   : > { %v7993_v13 = vadd.f32 %v7946_v18, %v3189_v25  ;;  %v8868_v18 = vld [vmem:[#allocation56_spill] sm:$0xff] }
 0x5e4   : > { %v3266_v42 = vpop.f32.mrf.mxu3  ;;  %v2699_v62 = vadd.f32 %v8868_v18, %v2644_v30  ;;  %v2429_v6 = vadd.f32 %v8869_v1, %v2374_v31  ;;  %v2329_v31 = vadd.f32 %v8884_v20, %v7680_v11  ;;  %v8885_v18 = vld [vmem:[#allocation39_spill] sm:$0xff] }
 0x5e6   : > { %v3106_v29 = vpop.f32.mrf.mxu0  ;;  %v3136_v10 = vpop.f32.mrf.mxu2  ;;  %v2484_v57 = vadd.f32 %v8870_v19, %v2429_v6  ;;  %v8008_v56 = vadd.f32 %v8871_v12, %v2699_v62 }
 0x5e7   : > { %v8880_v29 = vld [vmem:[#allocation32_spill] sm:$0xff] }
 0x5e8   : > { %v3193_v23 = vpop.f32.mrf.mxu1  ;;  %v2539_v21 = vadd.f32 %v8872_v51, %v2484_v57  ;;  %v8888_v57 = vld [vmem:[#allocation53_spill] sm:$0xff] }
 0x5ea   : > { %v2594_v28 = vadd.f32 %v8873_v40, %v2539_v21 }
 0x5ec   : > { %v7997_v63 = vpop.f32.mrf.mxu3  ;;  %v2649_v17 = vadd.f32 %v8875_v46, %v2594_v28  ;;  %v8891_v28 = vld [vmem:[#allocation112_spill] sm:$0xff] }
 0x5ee   : > { %v3138_v2 = vpop.f32.mrf.mxu2  ;;  %v2704_v44 = vadd.f32 %v8877_v15, %v2649_v17  ;;  %v8893_v17 = vld [vmem:[#allocation54_spill] sm:$0xff]  ;;  %v8895_v15 = vld [vmem:[#allocation41_spill] sm:$0xff] }
 0x5ef   : > { %v3139_v9 = vadd.f32 %v3138_v2, %v7948_v27 }
 0x5f0   : > { %v3196_v59 = vpop.f32.mrf.mxu1  ;;  %v8027_v10 = vadd.f32 %v8880_v29, %v2704_v44  ;;  %v8898_v29 = vld [vmem:[#allocation84_spill] sm:$0xff] }
 0x5f1   : > { %v3194_v43 = vadd.f32 %v3193_v23, %v3139_v9  ;;  %v8886_v59 = vld [vmem:[#allocation55_spill] sm:$0xff] }
 0x5f2   : > { %v2384_v1 = vadd.f32 %v8886_v59, %v2329_v31  ;;  %v8903_v31 = vld [vmem:[#allocation29_spill] sm:$0xff]  ;;  %v8906_v59 = vld [vmem:[#allocation16_spill] sm:$0xff] }
 0x5f3   : > { %v8011_v26 = vadd.f32 %v7956_v4, %v3194_v43  ;;  %v8876_v4 = vld [vmem:[#allocation49_spill] sm:$0xff] }
 0x5f4   : > { %v3271_v50 = vpop.f32.mrf.mxu3  ;;  %v2379_v49 = vadd.f32 %v8876_v4, %v2324_v32  ;;  %v8887_v43 = vld [vmem:[#allocation5_spill] sm:$0xff]  ;;  %v8892_v32 = vld [vmem:[#allocation23_spill] sm:$0xff]  ;;  %v8894_v4 = vld [vmem:[#allocation36_spill] sm:$0xff] }
 0x5f5   : > { %v4292_v0 = vpack.i.bf16 %v8011_v26, %v8008_v56  ;;  %v2439_v19 = vadd.f32 %v8887_v43, %v2384_v1  ;;  %v2309_v46 = vadd.f32 %v8892_v32, %v7680_v11  ;;  %v8907_v43 = vld [vmem:[#allocation18_spill] sm:$0xff]  ;;  %v8911_v32 = vld [vmem:[#allocation44_spill] sm:$0xff] }
 0x5f6   : > { %v3141_v7 = vpop.f32.mrf.mxu2  ;;  %v2434_v25 = vadd.f32 %v8878_v52, %v2379_v49  ;;  %v8896_v52 = vld [vmem:[#allocation83_spill] sm:$0xff] }
 0x5f7   : > { %4293 = vrot.lane.b32.xlu1 %v4292_v0, %s4410_s29  ;;  %v8889_v0 = vld [vmem:[#allocation107_spill] sm:$0xff]  ;;  %v2364_v49 = vadd.f32 %v8894_v4, %v2309_v46  ;;  %v3108_v4 = vpop.f32.mrf.mxu0 }
 0x5f8   : > { %v3198_v27 = vpop.f32.mrf.mxu1  ;;  %v2489_v42 = vadd.f32 %v8879_v5, %v2434_v25  ;;  %v2494_v7 = vadd.f32 %v8889_v0, %v2439_v19  ;;  %v8897_v5 = vld [vmem:[#allocation19_spill] sm:$0xff] }
 0x5f9   : > { %v2419_v25 = vadd.f32 %v8896_v52, %v2364_v49 }
 0x5fa   : > { %v2544_v16 = vadd.f32 %v8881_v38, %v2489_v42  ;;  %v2304_v42 = vadd.f32 %v8897_v5, %v7680_v11 }
 0x5fc   : > { %v2599_v53 = vadd.f32 %v8882_v36, %v2544_v16  ;;  %v3273_v52 = vpop.f32.mrf.mxu3 }
 0x5fe   : > { %v3143_v35 = vpop.f32.mrf.mxu2  ;;  %v2654_v30 = vadd.f32 %v8883_v3, %v2599_v53  ;;  %v8901_v3 = vld [vmem:[#allocation80_spill] sm:$0xff] }
 0x5ff   : > { %v3144_v41 = vadd.f32 %v3143_v35, %v7958_v24 }
 0x600   : > { %v3201_v39 = vpop.f32.mrf.mxu1 }
 0x601   : > { %v3199_v8 = vadd.f32 %v3198_v27, %v3144_v41  ;;  %v8890_v27 = vld [vmem:[#allocation9_spill] sm:$0xff] }
 0x602   : > { %v2549_v40 = vadd.f32 %v8890_v27, %v2494_v7  ;;  %v8908_v7 = vld [vmem:[#allocation17_spill] sm:$0xff] }
 0x603   : > { %v8030_v58 = vadd.f32 %v7966_v60, %v3199_v8  ;;  %v2709_v60 = vadd.f32 %v8885_v18, %v2654_v30 }
 0x604   : > { %v2604_v14 = vadd.f32 %v8891_v28, %v2549_v40  ;;  %v8910_v40 = vld [vmem:[#allocation45_spill] sm:$0xff] }
 0x605   : > { %v4297_v33 = vpack.i.bf16 %v8030_v58, %v8027_v10  ;;  %v8045_v12 = vadd.f32 %v8888_v57, %v2709_v60  ;;  %v8904_v60 = vld [vmem:[#allocation28_spill] sm:$0xff] }
 0x606   : > { %v3146_v23 = vpop.f32.mrf.mxu2  ;;  %v2659_v35 = vadd.f32 %v8893_v17, %v2604_v14 }
 0x607   : > { %4298 = vrot.lane.b32.xlu2 %v4297_v33, %s4410_s29  ;;  %v2474_v33 = vadd.f32 %v8898_v29, %v2419_v25  ;;  %v8899_v23 = vld [vmem:[#allocation58_spill] sm:$0xff] }
 0x608   : > { %v3203_v24 = vpop.f32.mrf.mxu1  ;;  %v2714_v44 = vadd.f32 %v8895_v15, %v2659_v35  ;;  %v8912_v35 = vld [vmem:[#allocation14_spill] sm:$0xff] }
 0x60a   : > { %v8067_v38 = vadd.f32 %v8899_v23, %v2714_v44 }
 0x60e   : > { %v3148_v2 = vpop.f32.mrf.mxu2 }
 0x60f   : > { %v3149_v62 = vadd.f32 %v3148_v2, %v7968_v37  ;;  %v8902_v2 = vld [vmem:[#allocation79_spill] sm:$0xff] }
 0x610   : > { %v3206_v9 = vpop.f32.mrf.mxu1  ;;  %v2529_v20 = vadd.f32 %v8902_v2, %v2474_v33 }
 0x611   : > { %v3204_v6 = vadd.f32 %v3203_v24, %v3149_v62  ;;  %v8900_v24 = vld [vmem:[#allocation31_spill] sm:$0xff]  ;;  %v8905_v9 = vld [vmem:[#allocation65_spill] sm:$0xff] }
 0x612   : > { %v2359_v36 = vadd.f32 %v8900_v24, %v2304_v42  ;;  %v2584_v62 = vadd.f32 %v8904_v60, %v2529_v20  ;;  %v3426_v60 = vld [vmem:[%s8414_s1 + $0xb30] sm:$0xff] }
 0x613   : > { %v8048_v50 = vadd.f32 %v7974_v22, %v3204_v6  ;;  %3485 = vmatpush.msrb.mxu0 %v3426_v60  ;;  %v3430_v60 = vld [vmem:[%s8414_s1 + $0xb70] sm:$0xff] }
 0x614   : > { %v2414_v30 = vadd.f32 %v8901_v3, %v2359_v36  ;;  %v2639_v1 = vadd.f32 %v8906_v59, %v2584_v62  ;;  %v3442_v62 = vld [vmem:[%s8414_s1 + $0xc30] sm:$0xff]  ;;  %v3419_v59 = vld [vmem:[%s8414_s1 + $0xac0] sm:$0xff] }
 0x615   : > { %v4302_v51 = vpack.i.bf16 %v8048_v50, %v8045_v12  ;;  %3505 = vmatpush.msrb.mxu2 %v3442_v62 }
 0x616   : > { %v3151_v21 = vpop.f32.mrf.mxu2  ;;  %v2469_v18 = vadd.f32 %v8903_v31, %v2414_v30  ;;  %v2694_v19 = vadd.f32 %v8907_v43, %v2639_v1  ;;  %v3418_v1 = vld [vmem:[%s8414_s1 + $0xab0] sm:$0xff]  ;;  %v3417_v43 = vld [vmem:[%s8414_s1 + $0xaa0] sm:$0xff] }
 0x617   : > { %4303 = vrot.lane.b32.xlu0 %v4302_v51, %s4410_s29 }
 0x618   : > { %v3208_v37 = vpop.f32.mrf.mxu1  ;;  %v8089_v28 = vadd.f32 %v8910_v40, %v2694_v19  ;;  %v3416_v19 = vld [vmem:[%s8414_s1 + $0xa90] sm:$0xff] }
 0x619   : > { %v3412_v40 = vld [vmem:[%s8414_s1 + $0xa50] sm:$0xff] }
 0x61e   : > { %v3153_v22 = vpop.f32.mrf.mxu2 }
 0x61f   : > { %v3154_v41 = vadd.f32 %v3153_v22, %v7976_v34 }
 0x620   : > { %v3211_v39 = vpop.f32.mrf.mxu1 }
 0x621   : > { %v3209_v8 = vadd.f32 %v3208_v37, %v3154_v41  ;;  %v8909_v37 = vld [vmem:[#allocation13_spill] sm:$0xff] }
 0x623   : > { %v8070_v16 = vadd.f32 %v7982_v48, %v3209_v8  ;;  %v2524_v48 = vadd.f32 %v8905_v9, %v2469_v18  ;;  %v8111_v8 = vpop.permute.xlu2 %3316  ;;  %v3421_v9 = vld [vmem:[%s8414_s1 + $0xae0] sm:$0xff] }
 0x625   : > { %v4307_v34 = vpack.i.bf16 %v8070_v16, %v8067_v38  ;;  %v2579_v51 = vadd.f32 %v8908_v7, %v2524_v48  ;;  %v3420_v48 = vld [vmem:[%s8414_s1 + $0xad0] sm:$0xff] }
 0x626   : > { %v3156_v53 = vpop.f32.mrf.mxu2  ;;  %v3414_v7 = vld [vmem:[%s8414_s1 + $0xa70] sm:$0xff] }
 0x627   : > { %4308 = vrot.lane.b32.xlu1 %v4307_v34, %s4410_s29  ;;  %v2634_v27 = vadd.f32 %v8909_v37, %v2579_v51  ;;  %v3413_v51 = vld [vmem:[%s8414_s1 + $0xa60] sm:$0xff] }
 0x628   : > { %v3213_v11 = vpop.f32.mrf.mxu1 }
 0x629   : > { %v2689_v46 = vadd.f32 %v8911_v32, %v2634_v27  ;;  %v3440_v27 = vld [vmem:[%s8414_s1 + $0xc10] sm:$0xff]  ;;  %v3411_v32 = vld [vmem:[%s8414_s1 + $0xa40] sm:$0xff] }
 0x62b   : > { %v8101_v22 = vadd.f32 %v8912_v35, %v2689_v46 }
 0x62d   : > { %v4312_v49 = vpack.i.bf16 %v7980_v61, %v8101_v22 }
 0x62e   : > { %v3158_v6 = vpop.f32.mrf.mxu2 }
 0x62f   : > { %v3159_v57 = vadd.f32 %v3158_v6, %v7987_v55  ;;  %3320 = vrot.lane.b32.xlu1 %v7861_v45, %s4410_s29  ;;  %v4317_v55 = vpack.i.bf16 %v7993_v13, %v8089_v28  ;;  %v3441_v6 = vld [vmem:[%s8414_s1 + $0xc20] sm:$0xff] }
 0x630   : > { %v3216_v0 = vpop.f32.mrf.mxu1  ;;  %3506 = vmatpush.msrb.mxu2 %v3441_v6 }
 0x631   : > { %v3214_v21 = vadd.f32 %v3213_v11, %v3159_v57  ;;  %v3415_v57 = vld [vmem:[%s8414_s1 + $0xa80] sm:$0xff] }
 0x632   : > { %3507 = vmatpush.msrb.mxu2 %v3440_v27  ;;  %v3454_v27 = vld [vmem:[%s8414_s1 + $0xcf0] sm:$0xff] }
 0x633   : > { %v8092_v14 = vadd.f32 %v7997_v63, %v3214_v21  ;;  %v3109_v63 = vadd.f32 %v3108_v4, %v7972_v47 }
 0x635   : > { %3318 = vrot.lane.b32.xlu0 %v8092_v14, %s4410_s29 }
 0x636   : > { %v3161_v17 = vpop.f32.mrf.mxu2 }
 0x637   : > { %4318 = vrot.lane.b32.xlu1 %v4317_v55, %s4410_s29  ;;  %v3439_v55 = vld [vmem:[%s8414_s1 + $0xc00] sm:$0xff]  ;;  %v3438_v17 = vld [vmem:[%s8414_s1 + $0xbf0] sm:$0xff] }
 0x638   : > { %v3218_v41 = vpop.f32.mrf.mxu1  ;;  %3508 = vmatpush.msrb.mxu2 %v3439_v55 }
 0x63a   : > { %3509 = vmatpush.msrb.mxu2 %v3438_v17 }
 0x63d   : > { %4313 = vrot.lane.b32.xlu0 %v4312_v49, %s4410_s29 }
 0x63e   : > { %v3163_v15 = vpop.f32.mrf.mxu2 }
 0x63f   : > { %v3164_v44 = vadd.f32 %v3163_v15, %v3109_v63  ;;  %v3437_v63 = vld [vmem:[%s8414_s1 + $0xbe0] sm:$0xff] }
 0x640   : > { %3510 = vmatpush.msrb.mxu2 %v3437_v63 }
 0x641   : > { %v3219_v39 = vadd.f32 %v3218_v41, %v3164_v44 }
 0x643   : > { %v8107_v25 = vadd.f32 %v3273_v52, %v3219_v39 }
 0x645   : > { %3322 = vrot.lane.b32.xlu2 %v8107_v25, %s4410_s29  ;;  %s4411_s29 = smov 12  }
 0x661   : > { %v4299_v5 = vpop.permute.xlu2 %4298 }
 0x662   : > { %v4301_v42 = vunpack.i.h.bf16 %v4299_v5  ;;  %v4300_v29 = vunpack.i.l.bf16 %v4299_v5  ;;  %v3436_v5 = vld [vmem:[%s8414_s1 + $0xbd0] sm:$0xff] }
 0x663   : > { %3511 = vmatpush.msrb.mxu2 %v3436_v5  ;;  %v3448_v5 = vld [vmem:[%s8414_s1 + $0xc90] sm:$0xff] }
 0x664   : > { %v3328_v47 = vsel %vm3324_vm13, %v4300_v29, %v4301_v42  ;;  %v3356_v36 = vmax.f32 %v8030_v58, %v4301_v42  ;;  %v3422_v58 = vld [vmem:[%s8414_s1 + $0xaf0] sm:$0xff] }
 0x665   : > { %v3355_v3 = vmax.f32 %v8027_v10, %v3328_v47  ;;  %v3423_v10 = vld [vmem:[%s8414_s1 + $0xb00] sm:$0xff] }
 0x669   : > { %v4294_v33 = vpop.permute.xlu1 %4293 }
 0x66a   : > { %v4296_v23 = vunpack.i.h.bf16 %v4294_v33  ;;  %v4295_v24 = vunpack.i.l.bf16 %v4294_v33 }
 0x66c   : > { %v3354_v34 = vmax.f32 %v8011_v26, %v4296_v23  ;;  %v3327_v53 = vsel %vm3324_vm13, %v4295_v24, %v4296_v23  ;;  %v3425_v26 = vld [vmem:[%s8414_s1 + $0xb20] sm:$0xff] }
 0x66d   : > { %v3353_v30 = vmax.f32 %v8008_v56, %v3327_v53  ;;  %3486 = vmatpush.msrb.mxu0 %v3425_v26  ;;  %v3424_v56 = vld [vmem:[%s8414_s1 + $0xb10] sm:$0xff]  ;;  %v3433_v23 = vld [vmem:[%s8414_s1 + $0xba0] sm:$0xff] }
 0x66e   : > { %v3368_v2 = vmax.f32 %v3354_v34, %v3356_v36  ;;  %v3432_v36 = vld [vmem:[%s8414_s1 + $0xb90] sm:$0xff] }
 0x66f   : > { %v3367_v20 = vmax.f32 %v3353_v30, %v3355_v3  ;;  %3487 = vmatpush.msrb.mxu0 %v3424_v56  ;;  %v3431_v3 = vld [vmem:[%s8414_s1 + $0xb80] sm:$0xff] }
 0x670   : > { %v3376_v11 = vmax.f32 %v3368_v2, 0.0 }
 0x671   : > { %v3375_v31 = vmax.f32 %v3367_v20, 0.0  ;;  %3488 = vmatpush.msrb.mxu0 %v3423_v10 }
 0x673   : > { %v4322_v18 = vpack.i.bf16 %v3376_v11, %v3375_v31  ;;  %3489 = vmatpush.msrb.mxu0 %v3422_v58 }
 0x675   : > { %4323 = vrot.lane.b32.xlu2 %v4322_v18, %s4411_s29  ;;  %3490 = vmatpush.msrb.mxu0 %v3421_v9  ;;  %s3638_s29 = sshll.u32 %s3634_s30, 4  ;;  %s3639_s29 = int_to_ptr.hbm [resolvable:$true] %s3638_s29 }
 0x676   : > { %s4351_s13 = sshra.s32 %s3639_s29, 4  ;;  %s4352_s13 = int_to_ptr.hbm [resolvable:$true] %s4351_s13 }
 0x677   : > { %3491 = vmatpush.msrb.mxu0 %v3420_v48  ;;  %v3428_v48 = vld [vmem:[%s8414_s1 + $0xb50] sm:$0xff]  ;;  %s4353_s28 = scalar_lea.hbm %s4352_s13, 8  ;;  %p4358_p0 = scmp.lt.s32.totalorder %s4352_s13, %s8415_s2 }
 0x678   : > { %p4354_p11 = scmp.ne.s32.totalorder %s4352_s13, %s4353_s28  ;;  %p4359_p1 = scmp.lt.s32.totalorder %s4357_s16, %s4353_s28 }
 0x679   : > { %3492 = vmatpush.msrb.mxu0 %v3419_v59 }
 0x67a   : > { %p4355_p12 = pnand %p4354_p11, %p4466_p5  ;;  %p4360_p2 = por %p4359_p1, %p4358_p0 }
 0x67b   : > { %3493 = vmatpush.msrb.mxu0 %v3418_v1  ;;  %v3427_v1 = vld [vmem:[%s8414_s1 + $0xb40] sm:$0xff] }
 0x67c   : > { %p4356_p13 = pneg %p4355_p12 }
 0x67d   : > { %3494 = vmatpush.msrb.mxu0 %v3417_v43 }
 0x67e   : > { %p4361_p3 = pnand %p4360_p2, %p4356_p13 }
 0x67f   : > { %3495 = vmatpush.msrb.mxu0 %v3416_v19  ;;  %v3458_v19 = vld [vmem:[%s8414_s1 + $0xd30] sm:$0xff] }
 0x681   : > { %3496 = vmatpush.msrb.mxu0 %v3415_v57  ;;  %v3457_v57 = vld [vmem:[%s8414_s1 + $0xd20] sm:$0xff] }
 0x683   : > { %3497 = vmatpush.msrb.mxu0 %v3414_v7  ;;  %v3456_v7 = vld [vmem:[%s8414_s1 + $0xd10] sm:$0xff] }
 0x685   : > { %3498 = vmatpush.msrb.mxu0 %v3413_v51 }
 0x687   : > { %3499 = vmatpush.msrb.mxu0 %v3412_v40  ;;  %v3453_v40 = vld [vmem:[%s8414_s1 + $0xce0] sm:$0xff] }
 0x689   : > { %v4304_v0 = vpop.permute.xlu0 %4303  ;;  %3500 = vmatpush.msrb.mxu0 %v3411_v32  ;;  %v3452_v32 = vld [vmem:[%s8414_s1 + $0xcd0] sm:$0xff] }
 0x68a   : > { %v4306_v21 = vunpack.i.h.bf16 %v4304_v0  ;;  %v4305_v37 = vunpack.i.l.bf16 %v4304_v0 }
 0x68b   : > { %3525 = vmatpush.msra.mxu0 %v3458_v19  ;;  %v3586_v19 = vld [vmem:[%s8414_s1 + $0xeb0] sm:$0xff] }
 0x68c   : > { %v3329_v35 = vsel %vm3324_vm13, %v4305_v37, %v4306_v21  ;;  %v3358_v15 = vmax.f32 %v8048_v50, %v4306_v21  ;;  %v3435_v50 = vld [vmem:[%s8414_s1 + $0xbc0] sm:$0xff]  ;;  %v3472_v37 = vld [vmem:[%s8414_s1 + $0xe10] sm:$0xff] }
 0x68d   : > { %v3357_v39 = vmax.f32 %v8045_v12, %v3329_v35  ;;  %v3434_v12 = vld [vmem:[%s8414_s1 + $0xbb0] sm:$0xff]  ;;  %3512 = vmatpush.msrb.mxu2 %v3435_v50  ;;  %3526 = vmatpush.msra.mxu0 %v3457_v57  ;;  %v3455_v21 = vld [vmem:[%s8414_s1 + $0xd00] sm:$0xff] }
 0x68e   : > { %v3468_v50 = vld [vmem:[%s8414_s1 + $0xdd0] sm:$0xff] }
 0x68f   : > { %3513 = vmatpush.msrb.mxu2 %v3434_v12  ;;  %3527 = vmatpush.msra.mxu0 %v3456_v7  ;;  %v3466_v12 = vld [vmem:[%s8414_s1 + $0xdb0] sm:$0xff] }
 0x691   : > { %3514 = vmatpush.msrb.mxu2 %v3433_v23  ;;  %3528 = vmatpush.msra.mxu0 %v3455_v21  ;;  %v3465_v23 = vld [vmem:[%s8414_s1 + $0xda0] sm:$0xff] }
 0x693   : > { %3515 = vmatpush.msrb.mxu2 %v3432_v36  ;;  %3529 = vmatpush.msra.mxu0 %v3454_v27  ;;  %v3464_v36 = vld [vmem:[%s8414_s1 + $0xd90] sm:$0xff] }
 0x695   : > { %3516 = vmatpush.msrb.mxu2 %v3431_v3  ;;  %3530 = vmatpush.msra.mxu0 %v3453_v40  ;;  %v3479_v3 = vld [vmem:[%s8414_s1 + $0xe80] sm:$0xff] }
 0x697   : > { %3517 = vmatpush.msrb.mxu2 %v3430_v60  ;;  %3531 = vmatpush.msra.mxu0 %v3452_v32  ;;  %v3459_v60 = vld [vmem:[%s8414_s1 + $0xd40] sm:$0xff] }
 0x699   : > { %v4309_v46 = vpop.permute.xlu1 %4308 }
 0x69a   : > { %v4311_v4 = vunpack.i.h.bf16 %v4309_v46  ;;  %v4310_v49 = vunpack.i.l.bf16 %v4309_v46  ;;  %v3451_v46 = vld [vmem:[%s8414_s1 + $0xcc0] sm:$0xff] }
 0x69b   : > { %3532 = vmatpush.msra.mxu0 %v3451_v46 }
 0x69c   : > { %v3360_v44 = vmax.f32 %v8070_v16, %v4311_v4  ;;  %v3330_v41 = vsel %vm3324_vm13, %v4310_v49, %v4311_v4 }
 0x69d   : > { %v3359_v52 = vmax.f32 %v8067_v38, %v3330_v41 }
 0x69e   : > { %v3370_v42 = vmax.f32 %v3358_v15, %v3360_v44 }
 0x69f   : > { %v3369_v29 = vmax.f32 %v3357_v39, %v3359_v52  ;;  %v3323_v24 = vpop.permute.xlu2 %3322  ;;  %v3450_v39 = vld [vmem:[%s8414_s1 + $0xcb0] sm:$0xff] }
 0x6a0   : > { %v3378_v33 = vmax.f32 %v3370_v42, 0.0  ;;  %v3364_v30 = vmax.f32 %v8107_v25, %v3323_v24  ;;  %v3429_v25 = vld [vmem:[%s8414_s1 + $0xb60] sm:$0xff]  ;;  %3533 = vmatpush.msra.mxu0 %v3450_v39  ;;  %v3470_v52 = vld [vmem:[%s8414_s1 + $0xdf0] sm:$0xff] }
 0x6a1   : > { %v3321_v16 = vpop.permute.xlu1 %3320  ;;  %v3377_v47 = vmax.f32 %v3369_v29, 0.0  ;;  %3518 = vmatpush.msrb.mxu2 %v3429_v25  ;;  %v3469_v42 = vld [vmem:[%s8414_s1 + $0xde0] sm:$0xff] }
 0x6a2   : > { %v3332_v34 = vsel %vm3324_vm13, %v3321_v16, %v3323_v24  ;;  %v3447_v29 = vld [vmem:[%s8414_s1 + $0xc80] sm:$0xff] }
 0x6a3   : > { %v4327_v38 = vpack.i.bf16 %v3378_v33, %v3377_v47  ;;  %v3363_v11 = vmax.f32 %v7861_v45, %v3332_v34  ;;  %3519 = vmatpush.msrb.mxu2 %v3428_v48  ;;  %v3446_v33 = vld [vmem:[%s8414_s1 + $0xc70] sm:$0xff]  ;;  %v3467_v16 = vld [vmem:[%s8414_s1 + $0xdc0] sm:$0xff] }
 0x6a4   : > { %v3445_v47 = vld [vmem:[%s8414_s1 + $0xc60] sm:$0xff]  ;;  %v3480_v34 = vld [vmem:[%s8414_s1 + $0xe90] sm:$0xff] }
 0x6a5   : > { %4328 = vrot.lane.b32.xlu0 %v4327_v38, %s4409_s25  ;;  %3520 = vmatpush.msrb.mxu2 %v3427_v1  ;;  %v3444_v38 = vld [vmem:[%s8414_s1 + $0xc50] sm:$0xff]  ;;  %v3443_v24 = vld [vmem:[%s8414_s1 + $0xc40] sm:$0xff] }
 0x6a6   : > { %v3591_v48 = vld [vmem:[%s8414_s1 + $0xf00] sm:$0xff] }
 0x6a7   : > { %v3319_v53 = vpop.permute.xlu0 %3318  ;;  %v3589_v1 = vld [vmem:[%s8414_s1 + $0xee0] sm:$0xff] }
 0x6a8   : > { %v3331_v2 = vsel %vm3324_vm13, %v8111_v8, %v3319_v53  ;;  %v3362_v20 = vmax.f32 %v8092_v14, %v3319_v53  ;;  %v3463_v53 = vld [vmem:[%s8414_s1 + $0xd80] sm:$0xff] }
 0x6a9   : > { %v3361_v31 = vmax.f32 %v7730_v54, %v3331_v2  ;;  %v4319_v18 = vpop.permute.xlu1 %4318  ;;  %v3478_v2 = vld [vmem:[%s8414_s1 + $0xe70] sm:$0xff] }
 0x6aa   : > { %v3372_v26 = vmax.f32 %v3362_v20, %v3364_v30  ;;  %v4321_v10 = vunpack.i.h.bf16 %v4319_v18  ;;  %v4320_v14 = vunpack.i.l.bf16 %v4319_v18  ;;  %v3462_v30 = vld [vmem:[%s8414_s1 + $0xd70] sm:$0xff]  ;;  %v3461_v20 = vld [vmem:[%s8414_s1 + $0xd60] sm:$0xff] }
 0x6ab   : > { %v3371_v56 = vmax.f32 %v3361_v31, %v3363_v11  ;;  %v3477_v11 = vld [vmem:[%s8414_s1 + $0xe60] sm:$0xff]  ;;  %v3460_v31 = vld [vmem:[%s8414_s1 + $0xd50] sm:$0xff] }
 0x6ac   : > { %v3380_v8 = vmax.f32 %v3372_v26, 0.0  ;;  %v3326_v45 = vsel %vm3324_vm13, %v4320_v14, %v4321_v10  ;;  %v3352_v17 = vmax.f32 %v7993_v13, %v4321_v10  ;;  %v3449_v13 = vld [vmem:[%s8414_s1 + $0xca0] sm:$0xff]  ;;  %v3476_v18 = vld [vmem:[%s8414_s1 + $0xe50] sm:$0xff] }
 0x6ad   : > { %v3379_v58 = vmax.f32 %v3371_v56, 0.0  ;;  %v3351_v6 = vmax.f32 %v8089_v28, %v3326_v45  ;;  %v3474_v28 = vld [vmem:[%s8414_s1 + $0xe30] sm:$0xff]  ;;  %3534 = vmatpush.msra.mxu0 %v3449_v13  ;;  %v3475_v26 = vld [vmem:[%s8414_s1 + $0xe40] sm:$0xff] }
 0x6ae   : > { %3403 = vrot.lane.b32.xlu2 %v3380_v8, %s4412_s14  ;;  %3545 = vmatpush.msra.mxu2 %v3474_v28 }
 0x6af   : > { %3401 = vrot.lane.b32.xlu1 %v3379_v58, %s4412_s14  ;;  %v4314_v54 = vpop.permute.xlu0 %4313  ;;  %3535 = vmatpush.msra.mxu0 %v3448_v5 }
 0x6b0   : > { %v4316_v62 = vunpack.i.h.bf16 %v4314_v54  ;;  %v4315_v9 = vunpack.i.l.bf16 %v4314_v54 }
 0x6b1   : > { %3536 = vmatpush.msra.mxu0 %v3447_v29 }
 0x6b2   : > { %v3325_v59 = vsel %vm3324_vm13, %v4315_v9, %v4316_v62  ;;  %v3350_v55 = vmax.f32 %v7980_v61, %v4316_v62  ;;  %v3471_v61 = vld [vmem:[%s8414_s1 + $0xe00] sm:$0xff]  ;;  %v3592_v9 = vld [vmem:[%s8414_s1 + $0xf10] sm:$0x3] }
 0x6b3   : > { %v3349_v43 = vmax.f32 %v8101_v22, %v3325_v59  ;;  %v3473_v22 = vld [vmem:[%s8414_s1 + $0xe20] sm:$0xff]  ;;  %3537 = vmatpush.msra.mxu0 %v3446_v33  ;;  %v3590_v59 = vld [vmem:[%s8414_s1 + $0xef0] sm:$0xff] }
 0x6b4   : > { %3546 = vmatpush.msra.mxu2 %v3473_v22  ;;  %v3366_v35 = vmax.f32 %v3350_v55, %v3352_v17  ;;  %v3593_v55 = vld [vmem:[%s8414_s1 + $0xf20] ss:$0 sm:$0xff] }
 0x6b5   : > { %v3365_v0 = vmax.f32 %v3349_v43, %v3351_v6  ;;  %3538 = vmatpush.msra.mxu0 %v3445_v47  ;;  %v3588_v6 = vld [vmem:[%s8414_s1 + $0xed0] sm:$0xff]  ;;  %v3587_v43 = vld [vmem:[%s8414_s1 + $0xec0] sm:$0xff] }
 0x6b6   : > { %3547 = vmatpush.msra.mxu2 %v3472_v37  ;;  %v3374_v49 = vmax.f32 %v3366_v35, 0.0 }
 0x6b7   : > { %v3373_v51 = vmax.f32 %v3365_v0, 0.0  ;;  %3539 = vmatpush.msra.mxu0 %v3444_v38  ;;  %v3481_v0 = vld [vmem:[%s8414_s1 + $0xea0] ss:$0 sm:$0xff] }
 0x6b8   : > { %3548 = vmatpush.msra.mxu2 %v3471_v61 }
 0x6b9   : > { %3501 = vmatmul.f32.vlgmr.msrb.gmra.mxu0 %v3373_v51 }
 0x6ba   : > { %3549 = vmatpush.msra.mxu2 %v3470_v52  ;;  %3540 = vmatpush.msra.mxu0 %v3443_v24 }
 0x6bc   : > { %3550 = vmatpush.msra.mxu2 %v3469_v42  ;;  %3575 = vmatpush.msrb.mxu0 %v3480_v34 }
 0x6be   : > { %3551 = vmatpush.msra.mxu2 %v3468_v50  ;;  %3576 = vmatpush.msrb.mxu0 %v3479_v3 }
 0x6c0   : > { %3552 = vmatpush.msra.mxu2 %v3467_v16  ;;  %3577 = vmatpush.msrb.mxu0 %v3478_v2 }
 0x6c2   : > { %3553 = vmatpush.msra.mxu2 %v3466_v12  ;;  %3578 = vmatpush.msrb.mxu0 %v3477_v11 }
 0x6c4   : > { %3554 = vmatpush.msra.mxu2 %v3465_v23  ;;  %3579 = vmatpush.msrb.mxu0 %v3476_v18 }
 0x6c6   : > { %3555 = vmatpush.msra.mxu2 %v3464_v36  ;;  %3580 = vmatpush.msrb.mxu0 %v3475_v26 }
 0x6c8   : > { %3556 = vmatpush.msra.mxu2 %v3463_v53 }
 0x6ca   : > { %3557 = vmatpush.msra.mxu2 %v3462_v30 }
 0x6cc   : > { %3558 = vmatpush.msra.mxu2 %v3461_v20 }
 0x6ce   : > { %3559 = vmatpush.msra.mxu2 %v3460_v31 }
 0x6cf   : > { %v4324_v4 = vpop.permute.xlu2 %4323 }
 0x6d0   : > { %v4326_v63 = vunpack.i.h.bf16 %v4324_v4  ;;  %v4325_v15 = vunpack.i.l.bf16 %v4324_v4  ;;  %3560 = vmatpush.msra.mxu2 %v3459_v60 }
 0x6d2   : > { %v3387_v44 = vsel %vm628_vm1, %v4325_v15, %v4326_v63  ;;  %v3408_v41 = vsel %vm628_vm1, %v3374_v49, %v4325_v15  ;;  %vm3621_vm1 = vcmask 80896  }
 0x6d3   : > { %3521 = vmatmul.f32.vlgmr.msrb.gmra.mxu2 %v3408_v41 }
 0x6d4   : > { %3789 = vmatpush.msk.msrb.mxu2 %vm3597_vm0, %v3592_v9 }
 0x6d6   : > { %3611 = vmatpush.msrb.mxu2 %v3591_v48 }
 0x6d8   : > { %3612 = vmatpush.msrb.mxu2 %v3590_v59 }
 0x6da   : > { %3613 = vmatpush.msrb.mxu2 %v3589_v1 }
 0x6dc   : > { %3614 = vmatpush.msrb.mxu2 %v3588_v6 }
 0x6de   : > { %3615 = vmatpush.msrb.mxu2 %v3587_v43 }
 0x6e0   : > { %3616 = vmatpush.msrb.mxu2 %v3586_v19 }
 0x708   : > { %v3404_v14 = vpop.permute.xlu2 %3403 }
 0x717   : > { %v4329_v56 = vpop.permute.xlu0 %4328 }
 0x718   : > { %v4330_v25 = vunpack.i.l.bf16 %v4329_v56  ;;  %v4331_v10 = vunpack.i.h.bf16 %v4329_v56 }
 0x71a   : > { %v3409_v8 = vsel %vm1862_vm11, %v3387_v44, %v4330_v25  ;;  %v3396_v54 = vsel %vm1862_vm11, %v4330_v25, %v4331_v10 }
 0x71b   : > { %3541 = vmatmul.f32.vlgmr.msra.gmra.mxu0 %v3409_v8 }
 0x721   : > { %v3402_v58 = vpop.permute.xlu1 %3401 }
 0x722   : > { %v3406_v45 = vsel %vm3405_vm14, %v3402_v58, %v3404_v14  ;;  %v3410_v62 = vsel %vm3405_vm14, %v3396_v54, %v3402_v58 }
 0x723   : > { %3561 = vmatmul.f32.vlgmr.msra.gmra.mxu2 %v3410_v62  ;;  %3788 = vmatmul.msk.f32.vlgmr.msrb.gmra.mxu0 %vm3482_vm15, %v3406_v45 }
 0x736   : > { %v3502_v57 = vpop.f32.mrf.mxu0 }
 0x737   : > { %v3503_v22 = vadd.f32 %v3502_v57, %v3481_v0 }
 0x756   : > { %v3522_v7 = vpop.f32.mrf.mxu2 }
 0x757   : > { %v3523_v51 = vadd.f32 %v3522_v7, %v3503_v22 }
 0x798   : > { %v3542_v28 = vpop.f32.mrf.mxu0 }
 0x799   : > { %v3543_v21 = vadd.f32 %v3542_v28, %v3523_v51 }
 0x7a0   : > { %v3582_v40 = vpop.f32.mrf.mxu0 }
 0x7a6   : > { %v3562_v37 = vpop.f32.mrf.mxu2 }
 0x7a7   : > { %v3563_v27 = vadd.f32 %v3562_v37, %v3543_v21 }
 0x7a9   : > { %v3583_v32 = vadd.f32 %v3582_v40, %v3563_v27 }
 0x7ab   : > { %v3585_v46 = vmax.f32 %v3583_v32, 0.0 }
 0x7ad   : > { %3790 = vmatmul.msk.f32.vlgmr.msrb.gmra.mxu2 %vm1737_vm9, %v3585_v46 }
 0x830   : > { %v3618_v17 = vpop.f32.mrf.mxu2 }
 0x831   : > { %v3619_v35 = vadd.f32 %v3618_v17, %v3593_v55 }
 0x833   : > { %3622 = vst.msk [vmem:[%s136_s26] sm:$0xff] %vm3621_vm1, %v3619_v35 }
 0x834   : > { %4364 = shalt.err (!%p4361_p3)
}
 0x835   : > { %3796 = dma.vmem_to_hbm [thread:$0]  (%p4466_p5), %s3637_s3, 128, %s3639_s29, %s3624_s7  }
 0x836 PF: > { %p3802_p4 = scmp.ge.s32.totalorder %s4399_s12, 2  ;;  %s3650_s17 = sand.u32 1, %s4387_s9  }
 0x837   : > { %s3651_s21 = scalar_lea.sflag [#allocation3], %s3650_s17 }
 0x838   : > { %p3799_p7 = pnand %p3802_p4, %p4470_p6 }
 0x83a   : > { %p3800_p8 = pneg %p3799_p7 }
 0x83c   : > { %4382 = dma.done.wait (%p3800_p8), %s3651_s21, 128  }
 0x83d   : > { %4384 = vsyncadd (%p3800_p8), %s3651_s21, 4294967168  ;;  %p12_p9 = scmp.ge.s32.totalorder %s4453_s15, 4   ;;  %s8913_s9 = smov %s4391_s10 }
 0x83e   : > { %s8914_s10 = smov %s4395_s11  ;;  %s8915_s11 = smov %s4464_s18 }
 0x83f   : > { %s8916_s12 = smov %s4453_s15  ;;  %14 = sbr.rel (!%p12_p9) target bundleno = 3 (0x3), region = 65 }
 0x844   :  { %3657 = vsyncpa [#allocation3], 1 }
 0x845   :  { %3659 = vsyncpa [#allocation3 + $0x1], 1 }

</bundles_post_ra>
